<compile_context>
chip_gen: v7x
topology: tpu7x:2x2x1
jax: 0.10.0
libtpu: 0.0.40
codegen_flags: <defaults>
</compile_context>

<pallas_src>
import functools

import jax
import jax.numpy as jnp
from jax.experimental import pallas as pl
from jax.experimental.pallas import tpu as pltpu

# ---- mini-RoBERTa config (scaled-down roberta-base; synthetic weights) ----
VOCAB = 100
MAX_POS = 64
HIDDEN = 128
N_LAYERS = 2
N_HEADS = 4
HEAD_DIM = HIDDEN // N_HEADS
FFN = 256
NUM_ENTITY_TYPES = 8
NUM_RELATION_TYPES = 4
LN_EPS = 1e-5
HEAD_OUT_PAD = 128          # lane-dense classifier output width
MASK_NEG = -1e9


# --------------------------- in-kernel helpers ------------------------------
def _ln(x, g, b, eps=LN_EPS):
    """Row LayerNorm, all stats in f32."""
    mu = jnp.mean(x, axis=-1, keepdims=True)
    xc = x - mu
    var = jnp.mean(xc * xc, axis=-1, keepdims=True)
    return xc * jax.lax.rsqrt(var + eps) * g + b


# ------------------------------- mega-kernel --------------------------------
def _kg_kernel(e1pos_ref, e2pos_ref,                       # scalar prefetch (SMEM)
               x_ref, mask_ref, embg_ref, embb_ref,
               wqkv_ref, bqkv_ref, wo_ref, bo_ref, ln1g_ref, ln1b_ref,
               w1_ref, b1_ref, w2_ref, b2_ref, ln2g_ref, ln2b_ref,
               ew1_ref, eb1_ref, elng_ref, elnb_ref, ew2_ref, eb2_ref,
               rw1_ref, rb1_ref, rlng_ref, rlnb_ref, rw2_ref, rb2_ref,
               ent1_ref, ent2_ref, rel_ref,
               x_sc,                                       # VMEM (S,H) f32 carry
               *, nheads, head_dim, seq):
    b = pl.program_id(0)
    layer = pl.program_id(1)
    n_layers = pl.num_programs(1)
    hidden = nheads * head_dim

    # embedding LayerNorm folded into the first layer step
    @pl.when(layer == 0)
    def _():
        x_sc[...] = _ln(x_ref[...], embg_ref[...], embb_ref[...])

    # ----------------------- transformer layer `layer` ----------------------
    x = x_sc[...]                                          # (S, H) f32 resident
    xb = x.astype(jnp.bfloat16)

    # fused QKV projection; attention scale is pre-folded into the Q columns.
    # One wide f32->bf16 cast after the bias add (not 12 narrow per-head casts).
    qkv = (jnp.dot(xb, wqkv_ref[...], preferred_element_type=jnp.float32)
           + bqkv_ref[...]).astype(jnp.bfloat16)           # (S, 3H) bf16

    # additive key-mask bias, broadcast ONCE outside the head loop
    bias = jnp.broadcast_to(mask_ref[...], (seq, seq))     # (S, S) f32

    # per-head attention; output projection accumulated per head
    # (mathematically identical to concat(heads) @ wo, no lane stitching)
    a = jnp.zeros((seq, hidden), jnp.float32)
    for h in range(nheads):                                # static unroll
        lo = h * head_dim
        qh = qkv[:, lo:lo + head_dim]
        kh = qkv[:, hidden + lo:hidden + lo + head_dim]
        vh = qkv[:, 2 * hidden + lo:2 * hidden + lo + head_dim]
        # contract last dims of q and k: no explicit K^T (XLU transpose)
        s = jax.lax.dot_general(qh, kh, (((1,), (1,)), ((), ())),
                                preferred_element_type=jnp.float32) + bias
        s = s - jnp.max(s, axis=-1, keepdims=True)
        p = jnp.exp(s)
        p = p * pl.reciprocal(jnp.sum(p, axis=-1, keepdims=True), approx=True)
        hv = jnp.dot(p.astype(jnp.bfloat16), vh,
                     preferred_element_type=jnp.float32)   # (S, hd) f32
        a = a + jnp.dot(hv.astype(jnp.bfloat16), wo_ref[lo:lo + head_dim, :],
                        preferred_element_type=jnp.float32)

    # attention out-proj bias + residual + LayerNorm (all kept in VMEM)
    x1 = _ln(x + a + bo_ref[...], ln1g_ref[...], ln1b_ref[...])

    # FFN + residual + LayerNorm
    # TODO(synk): tanh-approx GELU; HF RoBERTa uses exact erf-GELU.
    hmid = jax.nn.gelu(jnp.dot(x1.astype(jnp.bfloat16), w1_ref[...],
                               preferred_element_type=jnp.float32) + b1_ref[...])
    h2 = jnp.dot(hmid.astype(jnp.bfloat16), w2_ref[...],
                 preferred_element_type=jnp.float32) + b2_ref[...]
    x_sc[...] = _ln(x1 + h2, ln2g_ref[...], ln2b_ref[...])

    # ------------- fused entity / relation heads on the final state ---------
    @pl.when(layer == n_layers - 1)
    def _():
        e1 = x_sc[pl.ds(e1pos_ref[b], 1), :]               # (1, H) in-kernel gather
        e2 = x_sc[pl.ds(e2pos_ref[b], 1), :]

        # entity head runs once on both rows (shared weights)
        xe = jnp.concatenate([e1, e2], axis=0)             # (2, H)
        he = jnp.dot(xe.astype(jnp.bfloat16), ew1_ref[...],
                     preferred_element_type=jnp.float32) + eb1_ref[...]
        he = jnp.maximum(_ln(he, elng_ref[...], elnb_ref[...]), 0.0)
        # TODO(synk): Dropout(p=0.5) implemented as identity (eval-mode).
        el = jnp.dot(he.astype(jnp.bfloat16), ew2_ref[...],
                     preferred_element_type=jnp.float32) + eb2_ref[...]
        ent1_ref[...] = el[0:1, :]
        ent2_ref[...] = el[1:2, :]

        # relation head on [e1 ; e2] concat along features
        xr = jnp.concatenate([e1, e2], axis=1)             # (1, 2H)
        hr = jnp.dot(xr.astype(jnp.bfloat16), rw1_ref[...],
                     preferred_element_type=jnp.float32) + rb1_ref[...]
        hr = jnp.maximum(_ln(hr, rlng_ref[...], rlnb_ref[...]), 0.0)
        rel_ref[...] = jnp.dot(hr.astype(jnp.bfloat16), rw2_ref[...],
                               preferred_element_type=jnp.float32) + rb2_ref[...]


# ------------------------- parameter construction ---------------------------
def init_params(key):
    keys = iter(jax.random.split(key, 32))

    def wf32(shape, std=0.02):
        return jax.random.normal(next(keys), shape, jnp.float32) * std

    def ones(shape):
        return jnp.ones(shape, jnp.float32)

    def zeros(shape):
        return jnp.zeros(shape, jnp.float32)

    # fold the attention scale 1/sqrt(head_dim) into the Q columns of wqkv/bqkv
    scale = 1.0 / (HEAD_DIM ** 0.5)
    wqkv = wf32((N_LAYERS, HIDDEN, 3 * HIDDEN))
    wqkv = wqkv.at[:, :, :HIDDEN].multiply(scale)
    bqkv = zeros((N_LAYERS, 1, 3 * HIDDEN))                # zero bias (scale no-op)

    return {
        # embeddings
        "word_emb": wf32((VOCAB, HIDDEN)),
        "pos_emb": wf32((MAX_POS, HIDDEN)),
        "tok_emb": wf32((1, HIDDEN)),
        "emb_ln_g": ones((1, HIDDEN)), "emb_ln_b": zeros((1, HIDDEN)),
        # stacked per-layer encoder weights (leading axis = layer)
        "wqkv": wqkv.astype(jnp.bfloat16), "bqkv": bqkv,
        "wo": wf32((N_LAYERS, HIDDEN, HIDDEN)).astype(jnp.bfloat16),
        "bo": zeros((N_LAYERS, 1, HIDDEN)),
        "ln1_g": ones((N_LAYERS, 1, HIDDEN)), "ln1_b": zeros((N_LAYERS, 1, HIDDEN)),
        "w1": wf32((N_LAYERS, HIDDEN, FFN)).astype(jnp.bfloat16),
        "b1": zeros((N_LAYERS, 1, FFN)),
        "w2": wf32((N_LAYERS, FFN, HIDDEN)).astype(jnp.bfloat16),
        "b2": zeros((N_LAYERS, 1, HIDDEN)),
        "ln2_g": ones((N_LAYERS, 1, HIDDEN)), "ln2_b": zeros((N_LAYERS, 1, HIDDEN)),
        # entity classifier: Linear(H,H) -> LN -> ReLU -> Dropout -> Linear(H,E)
        "ew1": wf32((HIDDEN, HIDDEN)).astype(jnp.bfloat16), "eb1": zeros((1, HIDDEN)),
        "eln_g": ones((1, HIDDEN)), "eln_b": zeros((1, HIDDEN)),
        "ew2p": jnp.pad(wf32((HIDDEN, NUM_ENTITY_TYPES)),
                        ((0, 0), (0, HEAD_OUT_PAD - NUM_ENTITY_TYPES))
                        ).astype(jnp.bfloat16),
        "eb2p": zeros((1, HEAD_OUT_PAD)),
        # relation classifier: Linear(2H,H) -> LN -> ReLU -> Dropout -> Linear(H,R)
        "rw1": wf32((2 * HIDDEN, HIDDEN)).astype(jnp.bfloat16), "rb1": zeros((1, HIDDEN)),
        "rln_g": ones((1, HIDDEN)), "rln_b": zeros((1, HIDDEN)),
        "rw2p": jnp.pad(wf32((HIDDEN, NUM_RELATION_TYPES)),
                        ((0, 0), (0, HEAD_OUT_PAD - NUM_RELATION_TYPES))
                        ).astype(jnp.bfloat16),
        "rb2p": zeros((1, HEAD_OUT_PAD)),
    }


# ------------------------------ forward pass ---------------------------------
def kg_bert_forward(params, input_ids, attention_mask, entity1_pos, entity2_pos):
    B, S = input_ids.shape
    H = HIDDEN

    # embedding-table gather / position add is plain-JAX glue (XLA gather)
    x_emb = (jnp.take(params["word_emb"], input_ids, axis=0)
             + params["pos_emb"][None, :S, :]
             + params["tok_emb"][None, :, :]).reshape(B * S, H)
    mask_bias = ((1.0 - attention_mask.astype(jnp.float32)) * MASK_NEG
                 ).reshape(B, 1, S)

    # BlockSpec helpers (index_maps also receive the 2 scalar-prefetch refs)
    shared = lambda r, c: pl.BlockSpec((r, c), lambda b, l, *_: (0, 0))
    per_layer = lambda r, c: pl.BlockSpec((None, r, c), lambda b, l, *_: (l, 0, 0))

    in_specs = [
        pl.BlockSpec((S, H), lambda b, l, *_: (b, 0)),            # x_emb rows of b
        pl.BlockSpec((None, 1, S), lambda b, l, *_: (b, 0, 0)),   # mask bias of b
        shared(1, H), shared(1, H),                               # emb LN g, b
        per_layer(H, 3 * H), per_layer(1, 3 * H),                 # wqkv, bqkv
        per_layer(H, H), per_layer(1, H),                         # wo, bo
        per_layer(1, H), per_layer(1, H),                         # ln1 g, b
        per_layer(H, FFN), per_layer(1, FFN),                     # w1, b1
        per_layer(FFN, H), per_layer(1, H),                       # w2, b2
        per_layer(1, H), per_layer(1, H),                         # ln2 g, b
        shared(H, H), shared(1, H), shared(1, H), shared(1, H),   # entity w1,b1,ln
        shared(H, HEAD_OUT_PAD), shared(1, HEAD_OUT_PAD),         # entity w2p,b2p
        shared(2 * H, H), shared(1, H), shared(1, H), shared(1, H),  # relation w1,b1,ln
        shared(H, HEAD_OUT_PAD), shared(1, HEAD_OUT_PAD),         # relation w2p,b2p
    ]
    out_spec = pl.BlockSpec((None, 1, HEAD_OUT_PAD), lambda b, l, *_: (b, 0, 0))
    out_sds = jax.ShapeDtypeStruct((B, 1, HEAD_OUT_PAD), jnp.float32)

    ent1, ent2, rel = pl.pallas_call(
        functools.partial(_kg_kernel, nheads=N_HEADS, head_dim=HEAD_DIM, seq=S),
        out_shape=(out_sds, out_sds, out_sds),
        grid_spec=pltpu.PrefetchScalarGridSpec(
            num_scalar_prefetch=2,
            grid=(B, N_LAYERS),
            in_specs=in_specs,
            out_specs=(out_spec, out_spec, out_spec),
            scratch_shapes=[pltpu.VMEM((S, H), jnp.float32)]),
        compiler_params=pltpu.CompilerParams(
            dimension_semantics=("parallel", "arbitrary")),
    )(entity1_pos, entity2_pos,
      x_emb, mask_bias, params["emb_ln_g"], params["emb_ln_b"],
      params["wqkv"], params["bqkv"], params["wo"], params["bo"],
      params["ln1_g"], params["ln1_b"], params["w1"], params["b1"],
      params["w2"], params["b2"], params["ln2_g"], params["ln2_b"],
      params["ew1"], params["eb1"], params["eln_g"], params["eln_b"],
      params["ew2p"], params["eb2p"],
      params["rw1"], params["rb1"], params["rln_g"], params["rln_b"],
      params["rw2p"], params["rb2p"])

    return (ent1[:, 0, :NUM_ENTITY_TYPES],
            ent2[:, 0, :NUM_ENTITY_TYPES],
            rel[:, 0, :NUM_RELATION_TYPES])


# ---------------------------------- main -------------------------------------
if __name__ == "__main__":
    key = jax.random.PRNGKey(0)
    kp, ki = jax.random.split(key, 2)
    params = init_params(kp)

    B, S = 2, 16
    input_ids = jax.random.randint(ki, (B, S), 0, VOCAB, dtype=jnp.int32)
    attention_mask = jnp.ones((B, S), jnp.int32).at[1, 12:].set(0)
    entity1_pos = jnp.array([1, 3], jnp.int32)
    entity2_pos = jnp.array([5, 7], jnp.int32)

    fwd = jax.jit(kg_bert_forward)
    e1l, e2l, rl = fwd(params, input_ids, attention_mask, entity1_pos, entity2_pos)
    jax.block_until_ready((e1l, e2l, rl))

    assert e1l.shape == (B, NUM_ENTITY_TYPES)
    assert e2l.shape == (B, NUM_ENTITY_TYPES)
    assert rl.shape == (B, NUM_RELATION_TYPES)
    assert bool(jnp.all(jnp.isfinite(e1l))) and bool(jnp.all(jnp.isfinite(e2l)))
    assert bool(jnp.all(jnp.isfinite(rl)))
    print("KERNEL_OK")
</pallas_src>

<mosaic_0001>
module attributes {stable_mosaic.version = 11 : i64} {
  func.func @_kg_kernel(%arg0: i32, %arg1: i32, %arg2: memref<2xi32, #tpu.memory_space<smem>>, %arg3: memref<2xi32, #tpu.memory_space<smem>>, %arg4: memref<16x128xf32, #tpu.memory_space<vmem>>, %arg5: memref<1x1x16xf32, #tpu.memory_space<vmem>>, %arg6: memref<1x128xf32, #tpu.memory_space<vmem>>, %arg7: memref<1x128xf32, #tpu.memory_space<vmem>>, %arg8: memref<1x128x384xbf16, #tpu.memory_space<vmem>>, %arg9: memref<1x1x384xf32, #tpu.memory_space<vmem>>, %arg10: memref<1x128x128xbf16, #tpu.memory_space<vmem>>, %arg11: memref<1x1x128xf32, #tpu.memory_space<vmem>>, %arg12: memref<1x1x128xf32, #tpu.memory_space<vmem>>, %arg13: memref<1x1x128xf32, #tpu.memory_space<vmem>>, %arg14: memref<1x128x256xbf16, #tpu.memory_space<vmem>>, %arg15: memref<1x1x256xf32, #tpu.memory_space<vmem>>, %arg16: memref<1x256x128xbf16, #tpu.memory_space<vmem>>, %arg17: memref<1x1x128xf32, #tpu.memory_space<vmem>>, %arg18: memref<1x1x128xf32, #tpu.memory_space<vmem>>, %arg19: memref<1x1x128xf32, #tpu.memory_space<vmem>>, %arg20: memref<128x128xbf16, #tpu.memory_space<vmem>>, %arg21: memref<1x128xf32, #tpu.memory_space<vmem>>, %arg22: memref<1x128xf32, #tpu.memory_space<vmem>>, %arg23: memref<1x128xf32, #tpu.memory_space<vmem>>, %arg24: memref<128x128xbf16, #tpu.memory_space<vmem>>, %arg25: memref<1x128xf32, #tpu.memory_space<vmem>>, %arg26: memref<256x128xbf16, #tpu.memory_space<vmem>>, %arg27: memref<1x128xf32, #tpu.memory_space<vmem>>, %arg28: memref<1x128xf32, #tpu.memory_space<vmem>>, %arg29: memref<1x128xf32, #tpu.memory_space<vmem>>, %arg30: memref<128x128xbf16, #tpu.memory_space<vmem>>, %arg31: memref<1x128xf32, #tpu.memory_space<vmem>>, %arg32: memref<1x1x128xf32, #tpu.memory_space<vmem>>, %arg33: memref<1x1x128xf32, #tpu.memory_space<vmem>>, %arg34: memref<1x1x128xf32, #tpu.memory_space<vmem>>, %arg35: memref<16x128xf32, #tpu.memory_space<vmem>>) attributes {dimension_semantics = [#tpu.dimension_semantics<parallel>, #tpu.dimension_semantics<arbitrary>], iteration_bounds = array<i64: 2, 2>, scalar_prefetch = 2 : i64, scratch_operands = 1 : i64, tpu.core_type = #tpu.core_type<tc>, window_params = [{transform_indices = @transform_0, window_bounds = array<i64: 16, 128>}, {transform_indices = @transform_1, window_bounds = array<i64: 1, 1, 16>}, {pipeline_mode = #tpu.pipeline_mode<synchronous>, transform_indices = @transform_2, window_bounds = array<i64: 1, 128>}, {pipeline_mode = #tpu.pipeline_mode<synchronous>, transform_indices = @transform_3, window_bounds = array<i64: 1, 128>}, {transform_indices = @transform_4, window_bounds = array<i64: 1, 128, 384>}, {transform_indices = @transform_5, window_bounds = array<i64: 1, 1, 384>}, {transform_indices = @transform_6, window_bounds = array<i64: 1, 128, 128>}, {transform_indices = @transform_7, window_bounds = array<i64: 1, 1, 128>}, {transform_indices = @transform_8, window_bounds = array<i64: 1, 1, 128>}, {transform_indices = @transform_9, window_bounds = array<i64: 1, 1, 128>}, {transform_indices = @transform_10, window_bounds = array<i64: 1, 128, 256>}, {transform_indices = @transform_11, window_bounds = array<i64: 1, 1, 256>}, {transform_indices = @transform_12, window_bounds = array<i64: 1, 256, 128>}, {transform_indices = @transform_13, window_bounds = array<i64: 1, 1, 128>}, {transform_indices = @transform_14, window_bounds = array<i64: 1, 1, 128>}, {transform_indices = @transform_15, window_bounds = array<i64: 1, 1, 128>}, {pipeline_mode = #tpu.pipeline_mode<synchronous>, transform_indices = @transform_16, window_bounds = array<i64: 128, 128>}, {pipeline_mode = #tpu.pipeline_mode<synchronous>, transform_indices = @transform_17, window_bounds = array<i64: 1, 128>}, {pipeline_mode = #tpu.pipeline_mode<synchronous>, transform_indices = @transform_18, window_bounds = array<i64: 1, 128>}, {pipeline_mode = #tpu.pipeline_mode<synchronous>, transform_indices = @transform_19, window_bounds = array<i64: 1, 128>}, {pipeline_mode = #tpu.pipeline_mode<synchronous>, transform_indices = @transform_20, window_bounds = array<i64: 128, 128>}, {pipeline_mode = #tpu.pipeline_mode<synchronous>, transform_indices = @transform_21, window_bounds = array<i64: 1, 128>}, {pipeline_mode = #tpu.pipeline_mode<synchronous>, transform_indices = @transform_22, window_bounds = array<i64: 256, 128>}, {pipeline_mode = #tpu.pipeline_mode<synchronous>, transform_indices = @transform_23, window_bounds = array<i64: 1, 128>}, {pipeline_mode = #tpu.pipeline_mode<synchronous>, transform_indices = @transform_24, window_bounds = array<i64: 1, 128>}, {pipeline_mode = #tpu.pipeline_mode<synchronous>, transform_indices = @transform_25, window_bounds = array<i64: 1, 128>}, {pipeline_mode = #tpu.pipeline_mode<synchronous>, transform_indices = @transform_26, window_bounds = array<i64: 128, 128>}, {pipeline_mode = #tpu.pipeline_mode<synchronous>, transform_indices = @transform_27, window_bounds = array<i64: 1, 128>}, {transform_indices = @transform_28, window_bounds = array<i64: 1, 1, 128>}, {transform_indices = @transform_29, window_bounds = array<i64: 1, 1, 128>}, {transform_indices = @transform_30, window_bounds = array<i64: 1, 1, 128>}]} {
    %c0_i32 = arith.constant 0 : i32
    %0 = arith.cmpi eq, %arg1, %c0_i32 : i32
    %1 = arith.extui %0 : i1 to i32
    %c0_i32_0 = arith.constant 0 : i32
    %2 = arith.cmpi ne, %1, %c0_i32_0 : i32
    scf.if %2 {
      %c0_87 = arith.constant 0 : index
      %c0_88 = arith.constant 0 : index
      %193 = vector.load %arg4[%c0_87, %c0_88] : memref<16x128xf32, #tpu.memory_space<vmem>>, vector<16x128xf32>
      %c0_89 = arith.constant 0 : index
      %c0_90 = arith.constant 0 : index
      %194 = vector.load %arg6[%c0_89, %c0_90] : memref<1x128xf32, #tpu.memory_space<vmem>>, vector<1x128xf32>
      %c0_91 = arith.constant 0 : index
      %c0_92 = arith.constant 0 : index
      %195 = vector.load %arg7[%c0_91, %c0_92] : memref<1x128xf32, #tpu.memory_space<vmem>>, vector<1x128xf32>
      %cst_93 = arith.constant dense<0.000000e+00> : vector<16xf32>
      %196 = vector.multi_reduction <add>, %193, %cst_93 [1] : vector<16x128xf32> to vector<16xf32>
      %197 = vector.shape_cast %196 : vector<16xf32> to vector<16x1xf32>
      %cst_94 = arith.constant 1.280000e+02 : f32
      %198 = vector.broadcast %cst_94 : f32 to vector<16x1xf32>
      %199 = arith.divf %197, %198 : vector<16x1xf32>
      %200 = vector.broadcast %199 : vector<16x1xf32> to vector<16x128xf32>
      %201 = arith.subf %193, %200 : vector<16x128xf32>
      %202 = arith.mulf %201, %201 : vector<16x128xf32>
      %cst_95 = arith.constant dense<0.000000e+00> : vector<16xf32>
      %203 = vector.multi_reduction <add>, %202, %cst_95 [1] : vector<16x128xf32> to vector<16xf32>
      %204 = vector.shape_cast %203 : vector<16xf32> to vector<16x1xf32>
      %cst_96 = arith.constant 1.280000e+02 : f32
      %205 = vector.broadcast %cst_96 : f32 to vector<16x1xf32>
      %206 = arith.divf %204, %205 : vector<16x1xf32>
      %cst_97 = arith.constant 9.99999974E-6 : f32
      %207 = vector.broadcast %cst_97 : f32 to vector<16x1xf32>
      %208 = arith.addf %206, %207 : vector<16x1xf32>
      %209 = math.rsqrt %208 : vector<16x1xf32>
      %210 = vector.broadcast %209 : vector<16x1xf32> to vector<16x128xf32>
      %211 = arith.mulf %201, %210 : vector<16x128xf32>
      %212 = vector.broadcast %194 : vector<1x128xf32> to vector<16x128xf32>
      %213 = arith.mulf %211, %212 : vector<16x128xf32>
      %214 = vector.broadcast %195 : vector<1x128xf32> to vector<16x128xf32>
      %215 = arith.addf %213, %214 : vector<16x128xf32>
      %c0_98 = arith.constant 0 : index
      %c0_99 = arith.constant 0 : index
      %216 = vector.load %arg35[%c0_98, %c0_99] : memref<16x128xf32, #tpu.memory_space<vmem>>, vector<16x128xf32>
      tpu.vector_store %arg35[%c0_98, %c0_99], %215 {strides = array<i32>} : memref<16x128xf32, #tpu.memory_space<vmem>>, vector<16x128xf32>,
    } else {
    }
    %c0 = arith.constant 0 : index
    %c0_1 = arith.constant 0 : index
    %3 = vector.load %arg35[%c0, %c0_1] : memref<16x128xf32, #tpu.memory_space<vmem>>, vector<16x128xf32>
    %4 = arith.truncf %3 : vector<16x128xf32> to vector<16x128xbf16>
    %c0_2 = arith.constant 0 : index
    %c0_3 = arith.constant 0 : index
    %c0_4 = arith.constant 0 : index
    %5 = vector.load %arg8[%c0_2, %c0_3, %c0_4] : memref<1x128x384xbf16, #tpu.memory_space<vmem>>, vector<1x128x384xbf16>
    %6 = vector.shape_cast %5 : vector<1x128x384xbf16> to vector<128x384xbf16>
    %cst = arith.constant dense<0.000000e+00> : vector<16x384xf32>
    %7 = tpu.matmul %4, %6, %cst {dimension_numbers = #tpu.dot_dimension_numbers<[1], [0], [0], [1], [0, 0, 1, 1], [], []>} : vector<16x128xbf16>, vector<128x384xbf16>, vector<16x384xf32> -> vector<16x384xf32>
    %c0_5 = arith.constant 0 : index
    %c0_6 = arith.constant 0 : index
    %c0_7 = arith.constant 0 : index
    %8 = vector.load %arg9[%c0_5, %c0_6, %c0_7] : memref<1x1x384xf32, #tpu.memory_space<vmem>>, vector<1x1x384xf32>
    %9 = vector.shape_cast %8 : vector<1x1x384xf32> to vector<1x384xf32>
    %10 = vector.broadcast %9 : vector<1x384xf32> to vector<16x384xf32>
    %11 = arith.addf %7, %10 : vector<16x384xf32>
    %12 = arith.truncf %11 : vector<16x384xf32> to vector<16x384xbf16>
    %c0_8 = arith.constant 0 : index
    %c0_9 = arith.constant 0 : index
    %c0_10 = arith.constant 0 : index
    %13 = vector.load %arg5[%c0_8, %c0_9, %c0_10] : memref<1x1x16xf32, #tpu.memory_space<vmem>>, vector<1x1x16xf32>
    %14 = vector.shape_cast %13 : vector<1x1x16xf32> to vector<1x16xf32>
    %15 = vector.shape_cast %14 : vector<1x16xf32> to vector<1x16xf32>
    %16 = vector.broadcast %15 : vector<1x16xf32> to vector<16x16xf32>
    %cst_11 = arith.constant 0.000000e+00 : f32
    %17 = vector.broadcast %cst_11 : f32 to vector<16x128xf32>
    %18 = vector.extract_strided_slice %12 {offsets = [0, 0], sizes = [16, 32], strides = [1, 1]} : vector<16x384xbf16> to vector<16x32xbf16>
    %19 = vector.extract_strided_slice %12 {offsets = [0, 128], sizes = [16, 32], strides = [1, 1]} : vector<16x384xbf16> to vector<16x32xbf16>
    %20 = vector.extract_strided_slice %12 {offsets = [0, 256], sizes = [16, 32], strides = [1, 1]} : vector<16x384xbf16> to vector<16x32xbf16>
    %cst_12 = arith.constant dense<0.000000e+00> : vector<16x16xf32>
    %21 = tpu.matmul %18, %19, %cst_12 {dimension_numbers = #tpu.dot_dimension_numbers<[1], [1], [0], [0], [0, 0, 1, 0], [], []>} : vector<16x32xbf16>, vector<16x32xbf16>, vector<16x16xf32> -> vector<16x16xf32>
    %22 = arith.addf %21, %16 : vector<16x16xf32>
    %cst_13 = arith.constant dense<0xFF800000> : vector<16xf32>
    %23 = vector.multi_reduction <maximumf>, %22, %cst_13 [1] : vector<16x16xf32> to vector<16xf32>
    %24 = vector.shape_cast %23 : vector<16xf32> to vector<16x1xf32>
    %25 = vector.broadcast %24 : vector<16x1xf32> to vector<16x16xf32>
    %26 = arith.subf %22, %25 : vector<16x16xf32>
    %27 = math.exp %26 : vector<16x16xf32>
    %cst_14 = arith.constant dense<0.000000e+00> : vector<16xf32>
    %28 = vector.multi_reduction <add>, %27, %cst_14 [1] : vector<16x16xf32> to vector<16xf32>
    %29 = vector.shape_cast %28 : vector<16xf32> to vector<16x1xf32>
    %30 = tpu.reciprocal %29 {approx = true} : vector<16x1xf32> -> vector<16x1xf32>
    %31 = vector.broadcast %30 : vector<16x1xf32> to vector<16x16xf32>
    %32 = arith.mulf %27, %31 : vector<16x16xf32>
    %33 = arith.truncf %32 : vector<16x16xf32> to vector<16x16xbf16>
    %cst_15 = arith.constant dense<0.000000e+00> : vector<16x32xf32>
    %34 = tpu.matmul %33, %20, %cst_15 {dimension_numbers = #tpu.dot_dimension_numbers<[1], [0], [0], [1], [0, 0, 1, 1], [], []>} : vector<16x16xbf16>, vector<16x32xbf16>, vector<16x32xf32> -> vector<16x32xf32>
    %35 = arith.truncf %34 : vector<16x32xf32> to vector<16x32xbf16>
    %c0_16 = arith.constant 0 : index
    %c0_17 = arith.constant 0 : index
    %c0_18 = arith.constant 0 : index
    %36 = vector.load %arg10[%c0_16, %c0_17, %c0_18] : memref<1x128x128xbf16, #tpu.memory_space<vmem>>, vector<1x32x128xbf16>
    %37 = vector.shape_cast %36 : vector<1x32x128xbf16> to vector<32x128xbf16>
    %cst_19 = arith.constant dense<0.000000e+00> : vector<16x128xf32>
    %38 = tpu.matmul %35, %37, %cst_19 {dimension_numbers = #tpu.dot_dimension_numbers<[1], [0], [0], [1], [0, 0, 1, 1], [], []>} : vector<16x32xbf16>, vector<32x128xbf16>, vector<16x128xf32> -> vector<16x128xf32>
    %39 = arith.addf %17, %38 : vector<16x128xf32>
    %40 = vector.extract_strided_slice %12 {offsets = [0, 32], sizes = [16, 32], strides = [1, 1]} : vector<16x384xbf16> to vector<16x32xbf16>
    %41 = vector.extract_strided_slice %12 {offsets = [0, 160], sizes = [16, 32], strides = [1, 1]} : vector<16x384xbf16> to vector<16x32xbf16>
    %42 = vector.extract_strided_slice %12 {offsets = [0, 288], sizes = [16, 32], strides = [1, 1]} : vector<16x384xbf16> to vector<16x32xbf16>
    %cst_20 = arith.constant dense<0.000000e+00> : vector<16x16xf32>
    %43 = tpu.matmul %40, %41, %cst_20 {dimension_numbers = #tpu.dot_dimension_numbers<[1], [1], [0], [0], [0, 0, 1, 0], [], []>} : vector<16x32xbf16>, vector<16x32xbf16>, vector<16x16xf32> -> vector<16x16xf32>
    %44 = arith.addf %43, %16 : vector<16x16xf32>
    %cst_21 = arith.constant dense<0xFF800000> : vector<16xf32>
    %45 = vector.multi_reduction <maximumf>, %44, %cst_21 [1] : vector<16x16xf32> to vector<16xf32>
    %46 = vector.shape_cast %45 : vector<16xf32> to vector<16x1xf32>
    %47 = vector.broadcast %46 : vector<16x1xf32> to vector<16x16xf32>
    %48 = arith.subf %44, %47 : vector<16x16xf32>
    %49 = math.exp %48 : vector<16x16xf32>
    %cst_22 = arith.constant dense<0.000000e+00> : vector<16xf32>
    %50 = vector.multi_reduction <add>, %49, %cst_22 [1] : vector<16x16xf32> to vector<16xf32>
    %51 = vector.shape_cast %50 : vector<16xf32> to vector<16x1xf32>
    %52 = tpu.reciprocal %51 {approx = true} : vector<16x1xf32> -> vector<16x1xf32>
    %53 = vector.broadcast %52 : vector<16x1xf32> to vector<16x16xf32>
    %54 = arith.mulf %49, %53 : vector<16x16xf32>
    %55 = arith.truncf %54 : vector<16x16xf32> to vector<16x16xbf16>
    %cst_23 = arith.constant dense<0.000000e+00> : vector<16x32xf32>
    %56 = tpu.matmul %55, %42, %cst_23 {dimension_numbers = #tpu.dot_dimension_numbers<[1], [0], [0], [1], [0, 0, 1, 1], [], []>} : vector<16x16xbf16>, vector<16x32xbf16>, vector<16x32xf32> -> vector<16x32xf32>
    %57 = arith.truncf %56 : vector<16x32xf32> to vector<16x32xbf16>
    %c0_24 = arith.constant 0 : index
    %c32 = arith.constant 32 : index
    %c0_25 = arith.constant 0 : index
    %58 = vector.load %arg10[%c0_24, %c32, %c0_25] : memref<1x128x128xbf16, #tpu.memory_space<vmem>>, vector<1x32x128xbf16>
    %59 = vector.shape_cast %58 : vector<1x32x128xbf16> to vector<32x128xbf16>
    %cst_26 = arith.constant dense<0.000000e+00> : vector<16x128xf32>
    %60 = tpu.matmul %57, %59, %cst_26 {dimension_numbers = #tpu.dot_dimension_numbers<[1], [0], [0], [1], [0, 0, 1, 1], [], []>} : vector<16x32xbf16>, vector<32x128xbf16>, vector<16x128xf32> -> vector<16x128xf32>
    %61 = arith.addf %39, %60 : vector<16x128xf32>
    %62 = vector.extract_strided_slice %12 {offsets = [0, 64], sizes = [16, 32], strides = [1, 1]} : vector<16x384xbf16> to vector<16x32xbf16>
    %63 = vector.extract_strided_slice %12 {offsets = [0, 192], sizes = [16, 32], strides = [1, 1]} : vector<16x384xbf16> to vector<16x32xbf16>
    %64 = vector.extract_strided_slice %12 {offsets = [0, 320], sizes = [16, 32], strides = [1, 1]} : vector<16x384xbf16> to vector<16x32xbf16>
    %cst_27 = arith.constant dense<0.000000e+00> : vector<16x16xf32>
    %65 = tpu.matmul %62, %63, %cst_27 {dimension_numbers = #tpu.dot_dimension_numbers<[1], [1], [0], [0], [0, 0, 1, 0], [], []>} : vector<16x32xbf16>, vector<16x32xbf16>, vector<16x16xf32> -> vector<16x16xf32>
    %66 = arith.addf %65, %16 : vector<16x16xf32>
    %cst_28 = arith.constant dense<0xFF800000> : vector<16xf32>
    %67 = vector.multi_reduction <maximumf>, %66, %cst_28 [1] : vector<16x16xf32> to vector<16xf32>
    %68 = vector.shape_cast %67 : vector<16xf32> to vector<16x1xf32>
    %69 = vector.broadcast %68 : vector<16x1xf32> to vector<16x16xf32>
    %70 = arith.subf %66, %69 : vector<16x16xf32>
    %71 = math.exp %70 : vector<16x16xf32>
    %cst_29 = arith.constant dense<0.000000e+00> : vector<16xf32>
    %72 = vector.multi_reduction <add>, %71, %cst_29 [1] : vector<16x16xf32> to vector<16xf32>
    %73 = vector.shape_cast %72 : vector<16xf32> to vector<16x1xf32>
    %74 = tpu.reciprocal %73 {approx = true} : vector<16x1xf32> -> vector<16x1xf32>
    %75 = vector.broadcast %74 : vector<16x1xf32> to vector<16x16xf32>
    %76 = arith.mulf %71, %75 : vector<16x16xf32>
    %77 = arith.truncf %76 : vector<16x16xf32> to vector<16x16xbf16>
    %cst_30 = arith.constant dense<0.000000e+00> : vector<16x32xf32>
    %78 = tpu.matmul %77, %64, %cst_30 {dimension_numbers = #tpu.dot_dimension_numbers<[1], [0], [0], [1], [0, 0, 1, 1], [], []>} : vector<16x16xbf16>, vector<16x32xbf16>, vector<16x32xf32> -> vector<16x32xf32>
    %79 = arith.truncf %78 : vector<16x32xf32> to vector<16x32xbf16>
    %c0_31 = arith.constant 0 : index
    %c64 = arith.constant 64 : index
    %c0_32 = arith.constant 0 : index
    %80 = vector.load %arg10[%c0_31, %c64, %c0_32] : memref<1x128x128xbf16, #tpu.memory_space<vmem>>, vector<1x32x128xbf16>
    %81 = vector.shape_cast %80 : vector<1x32x128xbf16> to vector<32x128xbf16>
    %cst_33 = arith.constant dense<0.000000e+00> : vector<16x128xf32>
    %82 = tpu.matmul %79, %81, %cst_33 {dimension_numbers = #tpu.dot_dimension_numbers<[1], [0], [0], [1], [0, 0, 1, 1], [], []>} : vector<16x32xbf16>, vector<32x128xbf16>, vector<16x128xf32> -> vector<16x128xf32>
    %83 = arith.addf %61, %82 : vector<16x128xf32>
    %84 = vector.extract_strided_slice %12 {offsets = [0, 96], sizes = [16, 32], strides = [1, 1]} : vector<16x384xbf16> to vector<16x32xbf16>
    %85 = vector.extract_strided_slice %12 {offsets = [0, 224], sizes = [16, 32], strides = [1, 1]} : vector<16x384xbf16> to vector<16x32xbf16>
    %86 = vector.extract_strided_slice %12 {offsets = [0, 352], sizes = [16, 32], strides = [1, 1]} : vector<16x384xbf16> to vector<16x32xbf16>
    %cst_34 = arith.constant dense<0.000000e+00> : vector<16x16xf32>
    %87 = tpu.matmul %84, %85, %cst_34 {dimension_numbers = #tpu.dot_dimension_numbers<[1], [1], [0], [0], [0, 0, 1, 0], [], []>} : vector<16x32xbf16>, vector<16x32xbf16>, vector<16x16xf32> -> vector<16x16xf32>
    %88 = arith.addf %87, %16 : vector<16x16xf32>
    %cst_35 = arith.constant dense<0xFF800000> : vector<16xf32>
    %89 = vector.multi_reduction <maximumf>, %88, %cst_35 [1] : vector<16x16xf32> to vector<16xf32>
    %90 = vector.shape_cast %89 : vector<16xf32> to vector<16x1xf32>
    %91 = vector.broadcast %90 : vector<16x1xf32> to vector<16x16xf32>
    %92 = arith.subf %88, %91 : vector<16x16xf32>
    %93 = math.exp %92 : vector<16x16xf32>
    %cst_36 = arith.constant dense<0.000000e+00> : vector<16xf32>
    %94 = vector.multi_reduction <add>, %93, %cst_36 [1] : vector<16x16xf32> to vector<16xf32>
    %95 = vector.shape_cast %94 : vector<16xf32> to vector<16x1xf32>
    %96 = tpu.reciprocal %95 {approx = true} : vector<16x1xf32> -> vector<16x1xf32>
    %97 = vector.broadcast %96 : vector<16x1xf32> to vector<16x16xf32>
    %98 = arith.mulf %93, %97 : vector<16x16xf32>
    %99 = arith.truncf %98 : vector<16x16xf32> to vector<16x16xbf16>
    %cst_37 = arith.constant dense<0.000000e+00> : vector<16x32xf32>
    %100 = tpu.matmul %99, %86, %cst_37 {dimension_numbers = #tpu.dot_dimension_numbers<[1], [0], [0], [1], [0, 0, 1, 1], [], []>} : vector<16x16xbf16>, vector<16x32xbf16>, vector<16x32xf32> -> vector<16x32xf32>
    %101 = arith.truncf %100 : vector<16x32xf32> to vector<16x32xbf16>
    %c0_38 = arith.constant 0 : index
    %c96 = arith.constant 96 : index
    %c0_39 = arith.constant 0 : index
    %102 = vector.load %arg10[%c0_38, %c96, %c0_39] : memref<1x128x128xbf16, #tpu.memory_space<vmem>>, vector<1x32x128xbf16>
    %103 = vector.shape_cast %102 : vector<1x32x128xbf16> to vector<32x128xbf16>
    %cst_40 = arith.constant dense<0.000000e+00> : vector<16x128xf32>
    %104 = tpu.matmul %101, %103, %cst_40 {dimension_numbers = #tpu.dot_dimension_numbers<[1], [0], [0], [1], [0, 0, 1, 1], [], []>} : vector<16x32xbf16>, vector<32x128xbf16>, vector<16x128xf32> -> vector<16x128xf32>
    %105 = arith.addf %83, %104 : vector<16x128xf32>
    %106 = arith.addf %3, %105 : vector<16x128xf32>
    %c0_41 = arith.constant 0 : index
    %c0_42 = arith.constant 0 : index
    %c0_43 = arith.constant 0 : index
    %107 = vector.load %arg11[%c0_41, %c0_42, %c0_43] : memref<1x1x128xf32, #tpu.memory_space<vmem>>, vector<1x1x128xf32>
    %108 = vector.shape_cast %107 : vector<1x1x128xf32> to vector<1x128xf32>
    %109 = vector.broadcast %108 : vector<1x128xf32> to vector<16x128xf32>
    %110 = arith.addf %106, %109 : vector<16x128xf32>
    %c0_44 = arith.constant 0 : index
    %c0_45 = arith.constant 0 : index
    %c0_46 = arith.constant 0 : index
    %111 = vector.load %arg12[%c0_44, %c0_45, %c0_46] : memref<1x1x128xf32, #tpu.memory_space<vmem>>, vector<1x1x128xf32>
    %112 = vector.shape_cast %111 : vector<1x1x128xf32> to vector<1x128xf32>
    %c0_47 = arith.constant 0 : index
    %c0_48 = arith.constant 0 : index
    %c0_49 = arith.constant 0 : index
    %113 = vector.load %arg13[%c0_47, %c0_48, %c0_49] : memref<1x1x128xf32, #tpu.memory_space<vmem>>, vector<1x1x128xf32>
    %114 = vector.shape_cast %113 : vector<1x1x128xf32> to vector<1x128xf32>
    %cst_50 = arith.constant dense<0.000000e+00> : vector<16xf32>
    %115 = vector.multi_reduction <add>, %110, %cst_50 [1] : vector<16x128xf32> to vector<16xf32>
    %116 = vector.shape_cast %115 : vector<16xf32> to vector<16x1xf32>
    %cst_51 = arith.constant 1.280000e+02 : f32
    %117 = vector.broadcast %cst_51 : f32 to vector<16x1xf32>
    %118 = arith.divf %116, %117 : vector<16x1xf32>
    %119 = vector.broadcast %118 : vector<16x1xf32> to vector<16x128xf32>
    %120 = arith.subf %110, %119 : vector<16x128xf32>
    %121 = arith.mulf %120, %120 : vector<16x128xf32>
    %cst_52 = arith.constant dense<0.000000e+00> : vector<16xf32>
    %122 = vector.multi_reduction <add>, %121, %cst_52 [1] : vector<16x128xf32> to vector<16xf32>
    %123 = vector.shape_cast %122 : vector<16xf32> to vector<16x1xf32>
    %cst_53 = arith.constant 1.280000e+02 : f32
    %124 = vector.broadcast %cst_53 : f32 to vector<16x1xf32>
    %125 = arith.divf %123, %124 : vector<16x1xf32>
    %cst_54 = arith.constant 9.99999974E-6 : f32
    %126 = vector.broadcast %cst_54 : f32 to vector<16x1xf32>
    %127 = arith.addf %125, %126 : vector<16x1xf32>
    %128 = math.rsqrt %127 : vector<16x1xf32>
    %129 = vector.broadcast %128 : vector<16x1xf32> to vector<16x128xf32>
    %130 = arith.mulf %120, %129 : vector<16x128xf32>
    %131 = vector.broadcast %112 : vector<1x128xf32> to vector<16x128xf32>
    %132 = arith.mulf %130, %131 : vector<16x128xf32>
    %133 = vector.broadcast %114 : vector<1x128xf32> to vector<16x128xf32>
    %134 = arith.addf %132, %133 : vector<16x128xf32>
    %135 = arith.truncf %134 : vector<16x128xf32> to vector<16x128xbf16>
    %c0_55 = arith.constant 0 : index
    %c0_56 = arith.constant 0 : index
    %c0_57 = arith.constant 0 : index
    %136 = vector.load %arg14[%c0_55, %c0_56, %c0_57] : memref<1x128x256xbf16, #tpu.memory_space<vmem>>, vector<1x128x256xbf16>
    %137 = vector.shape_cast %136 : vector<1x128x256xbf16> to vector<128x256xbf16>
    %cst_58 = arith.constant dense<0.000000e+00> : vector<16x256xf32>
    %138 = tpu.matmul %135, %137, %cst_58 {dimension_numbers = #tpu.dot_dimension_numbers<[1], [0], [0], [1], [0, 0, 1, 1], [], []>} : vector<16x128xbf16>, vector<128x256xbf16>, vector<16x256xf32> -> vector<16x256xf32>
    %c0_59 = arith.constant 0 : index
    %c0_60 = arith.constant 0 : index
    %c0_61 = arith.constant 0 : index
    %139 = vector.load %arg15[%c0_59, %c0_60, %c0_61] : memref<1x1x256xf32, #tpu.memory_space<vmem>>, vector<1x1x256xf32>
    %140 = vector.shape_cast %139 : vector<1x1x256xf32> to vector<1x256xf32>
    %141 = vector.broadcast %140 : vector<1x256xf32> to vector<16x256xf32>
    %142 = arith.addf %138, %141 : vector<16x256xf32>
    %143 = arith.mulf %142, %142 : vector<16x256xf32>
    %144 = arith.mulf %142, %143 : vector<16x256xf32>
    %cst_62 = arith.constant 4.471500e-02 : f32
    %145 = vector.broadcast %cst_62 : f32 to vector<16x256xf32>
    %146 = arith.mulf %145, %144 : vector<16x256xf32>
    %147 = arith.addf %142, %146 : vector<16x256xf32>
    %cst_63 = arith.constant 0.797884583 : f32
    %148 = vector.broadcast %cst_63 : f32 to vector<16x256xf32>
    %149 = arith.mulf %148, %147 : vector<16x256xf32>
    %150 = math.tanh %149 : vector<16x256xf32>
    %cst_64 = arith.constant 1.000000e+00 : f32
    %151 = vector.broadcast %cst_64 : f32 to vector<16x256xf32>
    %152 = arith.addf %151, %150 : vector<16x256xf32>
    %cst_65 = arith.constant 5.000000e-01 : f32
    %153 = vector.broadcast %cst_65 : f32 to vector<16x256xf32>
    %154 = arith.mulf %153, %152 : vector<16x256xf32>
    %155 = arith.mulf %142, %154 : vector<16x256xf32>
    %156 = arith.truncf %155 : vector<16x256xf32> to vector<16x256xbf16>
    %c0_66 = arith.constant 0 : index
    %c0_67 = arith.constant 0 : index
    %c0_68 = arith.constant 0 : index
    %157 = vector.load %arg16[%c0_66, %c0_67, %c0_68] : memref<1x256x128xbf16, #tpu.memory_space<vmem>>, vector<1x256x128xbf16>
    %158 = vector.shape_cast %157 : vector<1x256x128xbf16> to vector<256x128xbf16>
    %cst_69 = arith.constant dense<0.000000e+00> : vector<16x128xf32>
    %159 = tpu.matmul %156, %158, %cst_69 {dimension_numbers = #tpu.dot_dimension_numbers<[1], [0], [0], [1], [0, 0, 1, 1], [], []>} : vector<16x256xbf16>, vector<256x128xbf16>, vector<16x128xf32> -> vector<16x128xf32>
    %c0_70 = arith.constant 0 : index
    %c0_71 = arith.constant 0 : index
    %c0_72 = arith.constant 0 : index
    %160 = vector.load %arg17[%c0_70, %c0_71, %c0_72] : memref<1x1x128xf32, #tpu.memory_space<vmem>>, vector<1x1x128xf32>
    %161 = vector.shape_cast %160 : vector<1x1x128xf32> to vector<1x128xf32>
    %162 = vector.broadcast %161 : vector<1x128xf32> to vector<16x128xf32>
    %163 = arith.addf %159, %162 : vector<16x128xf32>
    %164 = arith.addf %134, %163 : vector<16x128xf32>
    %c0_73 = arith.constant 0 : index
    %c0_74 = arith.constant 0 : index
    %c0_75 = arith.constant 0 : index
    %165 = vector.load %arg18[%c0_73, %c0_74, %c0_75] : memref<1x1x128xf32, #tpu.memory_space<vmem>>, vector<1x1x128xf32>
    %166 = vector.shape_cast %165 : vector<1x1x128xf32> to vector<1x128xf32>
    %c0_76 = arith.constant 0 : index
    %c0_77 = arith.constant 0 : index
    %c0_78 = arith.constant 0 : index
    %167 = vector.load %arg19[%c0_76, %c0_77, %c0_78] : memref<1x1x128xf32, #tpu.memory_space<vmem>>, vector<1x1x128xf32>
    %168 = vector.shape_cast %167 : vector<1x1x128xf32> to vector<1x128xf32>
    %cst_79 = arith.constant dense<0.000000e+00> : vector<16xf32>
    %169 = vector.multi_reduction <add>, %164, %cst_79 [1] : vector<16x128xf32> to vector<16xf32>
    %170 = vector.shape_cast %169 : vector<16xf32> to vector<16x1xf32>
    %cst_80 = arith.constant 1.280000e+02 : f32
    %171 = vector.broadcast %cst_80 : f32 to vector<16x1xf32>
    %172 = arith.divf %170, %171 : vector<16x1xf32>
    %173 = vector.broadcast %172 : vector<16x1xf32> to vector<16x128xf32>
    %174 = arith.subf %164, %173 : vector<16x128xf32>
    %175 = arith.mulf %174, %174 : vector<16x128xf32>
    %cst_81 = arith.constant dense<0.000000e+00> : vector<16xf32>
    %176 = vector.multi_reduction <add>, %175, %cst_81 [1] : vector<16x128xf32> to vector<16xf32>
    %177 = vector.shape_cast %176 : vector<16xf32> to vector<16x1xf32>
    %cst_82 = arith.constant 1.280000e+02 : f32
    %178 = vector.broadcast %cst_82 : f32 to vector<16x1xf32>
    %179 = arith.divf %177, %178 : vector<16x1xf32>
    %cst_83 = arith.constant 9.99999974E-6 : f32
    %180 = vector.broadcast %cst_83 : f32 to vector<16x1xf32>
    %181 = arith.addf %179, %180 : vector<16x1xf32>
    %182 = math.rsqrt %181 : vector<16x1xf32>
    %183 = vector.broadcast %182 : vector<16x1xf32> to vector<16x128xf32>
    %184 = arith.mulf %174, %183 : vector<16x128xf32>
    %185 = vector.broadcast %166 : vector<1x128xf32> to vector<16x128xf32>
    %186 = arith.mulf %184, %185 : vector<16x128xf32>
    %187 = vector.broadcast %168 : vector<1x128xf32> to vector<16x128xf32>
    %188 = arith.addf %186, %187 : vector<16x128xf32>
    %c0_84 = arith.constant 0 : index
    %c0_85 = arith.constant 0 : index
    %189 = vector.load %arg35[%c0_84, %c0_85] : memref<16x128xf32, #tpu.memory_space<vmem>>, vector<16x128xf32>
    tpu.vector_store %arg35[%c0_84, %c0_85], %188 {strides = array<i32>} : memref<16x128xf32, #tpu.memory_space<vmem>>, vector<16x128xf32>,
    %c1_i32 = arith.constant 1 : i32
    %190 = arith.cmpi eq, %arg1, %c1_i32 : i32
    %191 = arith.extui %190 : i1 to i32
    %c0_i32_86 = arith.constant 0 : i32
    %192 = arith.cmpi ne, %191, %c0_i32_86 : i32
    scf.if %192 {
      %193 = arith.index_cast %arg0 : i32 to index
      %194 = memref.load %arg2[%193] : memref<2xi32, #tpu.memory_space<smem>>
      %195 = arith.index_cast %194 : i32 to index
      %c0_87 = arith.constant 0 : index
      %196 = vector.load %arg35[%195, %c0_87] : memref<16x128xf32, #tpu.memory_space<vmem>>, vector<1x128xf32>
      %197 = arith.index_cast %arg0 : i32 to index
      %198 = memref.load %arg3[%197] : memref<2xi32, #tpu.memory_space<smem>>
      %199 = arith.index_cast %198 : i32 to index
      %c0_88 = arith.constant 0 : index
      %200 = vector.load %arg35[%199, %c0_88] : memref<16x128xf32, #tpu.memory_space<vmem>>, vector<1x128xf32>
      %201 = tpu.concatenate %196, %200 in 0 : vector<1x128xf32>, vector<1x128xf32> -> vector<2x128xf32>
      %202 = arith.truncf %201 : vector<2x128xf32> to vector<2x128xbf16>
      %c0_89 = arith.constant 0 : index
      %c0_90 = arith.constant 0 : index
      %203 = vector.load %arg20[%c0_89, %c0_90] : memref<128x128xbf16, #tpu.memory_space<vmem>>, vector<128x128xbf16>
      %cst_91 = arith.constant dense<0.000000e+00> : vector<2x128xf32>
      %204 = tpu.matmul %202, %203, %cst_91 {dimension_numbers = #tpu.dot_dimension_numbers<[1], [0], [0], [1], [0, 0, 1, 1], [], []>} : vector<2x128xbf16>, vector<128x128xbf16>, vector<2x128xf32> -> vector<2x128xf32>
      %c0_92 = arith.constant 0 : index
      %c0_93 = arith.constant 0 : index
      %205 = vector.load %arg21[%c0_92, %c0_93] : memref<1x128xf32, #tpu.memory_space<vmem>>, vector<1x128xf32>
      %206 = vector.broadcast %205 : vector<1x128xf32> to vector<2x128xf32>
      %207 = arith.addf %204, %206 : vector<2x128xf32>
      %c0_94 = arith.constant 0 : index
      %c0_95 = arith.constant 0 : index
      %208 = vector.load %arg22[%c0_94, %c0_95] : memref<1x128xf32, #tpu.memory_space<vmem>>, vector<1x128xf32>
      %c0_96 = arith.constant 0 : index
      %c0_97 = arith.constant 0 : index
      %209 = vector.load %arg23[%c0_96, %c0_97] : memref<1x128xf32, #tpu.memory_space<vmem>>, vector<1x128xf32>
      %cst_98 = arith.constant dense<0.000000e+00> : vector<2xf32>
      %210 = vector.multi_reduction <add>, %207, %cst_98 [1] : vector<2x128xf32> to vector<2xf32>
      %211 = vector.shape_cast %210 : vector<2xf32> to vector<2x1xf32>
      %cst_99 = arith.constant 1.280000e+02 : f32
      %212 = vector.broadcast %cst_99 : f32 to vector<2x1xf32>
      %213 = arith.divf %211, %212 : vector<2x1xf32>
      %214 = vector.broadcast %213 : vector<2x1xf32> to vector<2x128xf32>
      %215 = arith.subf %207, %214 : vector<2x128xf32>
      %216 = arith.mulf %215, %215 : vector<2x128xf32>
      %cst_100 = arith.constant dense<0.000000e+00> : vector<2xf32>
      %217 = vector.multi_reduction <add>, %216, %cst_100 [1] : vector<2x128xf32> to vector<2xf32>
      %218 = vector.shape_cast %217 : vector<2xf32> to vector<2x1xf32>
      %cst_101 = arith.constant 1.280000e+02 : f32
      %219 = vector.broadcast %cst_101 : f32 to vector<2x1xf32>
      %220 = arith.divf %218, %219 : vector<2x1xf32>
      %cst_102 = arith.constant 9.99999974E-6 : f32
      %221 = vector.broadcast %cst_102 : f32 to vector<2x1xf32>
      %222 = arith.addf %220, %221 : vector<2x1xf32>
      %223 = math.rsqrt %222 : vector<2x1xf32>
      %224 = vector.broadcast %223 : vector<2x1xf32> to vector<2x128xf32>
      %225 = arith.mulf %215, %224 : vector<2x128xf32>
      %226 = vector.broadcast %208 : vector<1x128xf32> to vector<2x128xf32>
      %227 = arith.mulf %225, %226 : vector<2x128xf32>
      %228 = vector.broadcast %209 : vector<1x128xf32> to vector<2x128xf32>
      %229 = arith.addf %227, %228 : vector<2x128xf32>
      %cst_103 = arith.constant 0.000000e+00 : f32
      %230 = vector.broadcast %cst_103 : f32 to vector<2x128xf32>
      %231 = arith.maximumf %229, %230 : vector<2x128xf32>
      %232 = arith.truncf %231 : vector<2x128xf32> to vector<2x128xbf16>
      %c0_104 = arith.constant 0 : index
      %c0_105 = arith.constant 0 : index
      %233 = vector.load %arg24[%c0_104, %c0_105] : memref<128x128xbf16, #tpu.memory_space<vmem>>, vector<128x128xbf16>
      %cst_106 = arith.constant dense<0.000000e+00> : vector<2x128xf32>
      %234 = tpu.matmul %232, %233, %cst_106 {dimension_numbers = #tpu.dot_dimension_numbers<[1], [0], [0], [1], [0, 0, 1, 1], [], []>} : vector<2x128xbf16>, vector<128x128xbf16>, vector<2x128xf32> -> vector<2x128xf32>
      %c0_107 = arith.constant 0 : index
      %c0_108 = arith.constant 0 : index
      %235 = vector.load %arg25[%c0_107, %c0_108] : memref<1x128xf32, #tpu.memory_space<vmem>>, vector<1x128xf32>
      %236 = vector.broadcast %235 : vector<1x128xf32> to vector<2x128xf32>
      %237 = arith.addf %234, %236 : vector<2x128xf32>
      %238 = vector.extract_strided_slice %237 {offsets = [0, 0], sizes = [1, 128], strides = [1, 1]} : vector<2x128xf32> to vector<1x128xf32>
      %c0_109 = arith.constant 0 : index
      %c0_110 = arith.constant 0 : index
      %c0_111 = arith.constant 0 : index
      %239 = vector.load %arg32[%c0_109, %c0_110, %c0_111] : memref<1x1x128xf32, #tpu.memory_space<vmem>>, vector<1x1x128xf32>
      %240 = vector.shape_cast %239 : vector<1x1x128xf32> to vector<1x128xf32>
      %241 = vector.shape_cast %238 : vector<1x128xf32> to vector<1x1x128xf32>
      tpu.vector_store %arg32[%c0_109, %c0_110, %c0_111], %241 {strides = array<i32>} : memref<1x1x128xf32, #tpu.memory_space<vmem>>, vector<1x1x128xf32>,
      %242 = vector.extract_strided_slice %237 {offsets = [1, 0], sizes = [1, 128], strides = [1, 1]} : vector<2x128xf32> to vector<1x128xf32>
      %c0_112 = arith.constant 0 : index
      %c0_113 = arith.constant 0 : index
      %c0_114 = arith.constant 0 : index
      %243 = vector.load %arg33[%c0_112, %c0_113, %c0_114] : memref<1x1x128xf32, #tpu.memory_space<vmem>>, vector<1x1x128xf32>
      %244 = vector.shape_cast %243 : vector<1x1x128xf32> to vector<1x128xf32>
      %245 = vector.shape_cast %242 : vector<1x128xf32> to vector<1x1x128xf32>
      tpu.vector_store %arg33[%c0_112, %c0_113, %c0_114], %245 {strides = array<i32>} : memref<1x1x128xf32, #tpu.memory_space<vmem>>, vector<1x1x128xf32>,
      %246 = tpu.concatenate %196, %200 in 1 : vector<1x128xf32>, vector<1x128xf32> -> vector<1x256xf32>
      %247 = arith.truncf %246 : vector<1x256xf32> to vector<1x256xbf16>
      %c0_115 = arith.constant 0 : index
      %c0_116 = arith.constant 0 : index
      %248 = vector.load %arg26[%c0_115, %c0_116] : memref<256x128xbf16, #tpu.memory_space<vmem>>, vector<256x128xbf16>
      %cst_117 = arith.constant dense<0.000000e+00> : vector<1x128xf32>
      %249 = tpu.matmul %247, %248, %cst_117 {dimension_numbers = #tpu.dot_dimension_numbers<[1], [0], [0], [1], [0, 0, 1, 1], [], []>} : vector<1x256xbf16>, vector<256x128xbf16>, vector<1x128xf32> -> vector<1x128xf32>
      %c0_118 = arith.constant 0 : index
      %c0_119 = arith.constant 0 : index
      %250 = vector.load %arg27[%c0_118, %c0_119] : memref<1x128xf32, #tpu.memory_space<vmem>>, vector<1x128xf32>
      %251 = arith.addf %249, %250 : vector<1x128xf32>
      %c0_120 = arith.constant 0 : index
      %c0_121 = arith.constant 0 : index
      %252 = vector.load %arg28[%c0_120, %c0_121] : memref<1x128xf32, #tpu.memory_space<vmem>>, vector<1x128xf32>
      %c0_122 = arith.constant 0 : index
      %c0_123 = arith.constant 0 : index
      %253 = vector.load %arg29[%c0_122, %c0_123] : memref<1x128xf32, #tpu.memory_space<vmem>>, vector<1x128xf32>
      %cst_124 = arith.constant dense<0.000000e+00> : vector<1xf32>
      %254 = vector.multi_reduction <add>, %251, %cst_124 [1] : vector<1x128xf32> to vector<1xf32>
      %255 = vector.shape_cast %254 : vector<1xf32> to vector<1x1xf32>
      %cst_125 = arith.constant 1.280000e+02 : f32
      %256 = vector.broadcast %cst_125 : f32 to vector<1x1xf32>
      %257 = arith.divf %255, %256 : vector<1x1xf32>
      %258 = vector.broadcast %257 : vector<1x1xf32> to vector<1x128xf32>
      %259 = arith.subf %251, %258 : vector<1x128xf32>
      %260 = arith.mulf %259, %259 : vector<1x128xf32>
      %cst_126 = arith.constant dense<0.000000e+00> : vector<1xf32>
      %261 = vector.multi_reduction <add>, %260, %cst_126 [1] : vector<1x128xf32> to vector<1xf32>
      %262 = vector.shape_cast %261 : vector<1xf32> to vector<1x1xf32>
      %cst_127 = arith.constant 1.280000e+02 : f32
      %263 = vector.broadcast %cst_127 : f32 to vector<1x1xf32>
      %264 = arith.divf %262, %263 : vector<1x1xf32>
      %cst_128 = arith.constant 9.99999974E-6 : f32
      %265 = vector.broadcast %cst_128 : f32 to vector<1x1xf32>
      %266 = arith.addf %264, %265 : vector<1x1xf32>
      %267 = math.rsqrt %266 : vector<1x1xf32>
      %268 = vector.broadcast %267 : vector<1x1xf32> to vector<1x128xf32>
      %269 = arith.mulf %259, %268 : vector<1x128xf32>
      %270 = arith.mulf %269, %252 : vector<1x128xf32>
      %271 = arith.addf %270, %253 : vector<1x128xf32>
      %cst_129 = arith.constant 0.000000e+00 : f32
      %272 = vector.broadcast %cst_129 : f32 to vector<1x128xf32>
      %273 = arith.maximumf %271, %272 : vector<1x128xf32>
      %274 = arith.truncf %273 : vector<1x128xf32> to vector<1x128xbf16>
      %c0_130 = arith.constant 0 : index
      %c0_131 = arith.constant 0 : index
      %275 = vector.load %arg30[%c0_130, %c0_131] : memref<128x128xbf16, #tpu.memory_space<vmem>>, vector<128x128xbf16>
      %cst_132 = arith.constant dense<0.000000e+00> : vector<1x128xf32>
      %276 = tpu.matmul %274, %275, %cst_132 {dimension_numbers = #tpu.dot_dimension_numbers<[1], [0], [0], [1], [0, 0, 1, 1], [], []>} : vector<1x128xbf16>, vector<128x128xbf16>, vector<1x128xf32> -> vector<1x128xf32>
      %c0_133 = arith.constant 0 : index
      %c0_134 = arith.constant 0 : index
      %277 = vector.load %arg31[%c0_133, %c0_134] : memref<1x128xf32, #tpu.memory_space<vmem>>, vector<1x128xf32>
      %278 = arith.addf %276, %277 : vector<1x128xf32>
      %c0_135 = arith.constant 0 : index
      %c0_136 = arith.constant 0 : index
      %c0_137 = arith.constant 0 : index
      %279 = vector.load %arg34[%c0_135, %c0_136, %c0_137] : memref<1x1x128xf32, #tpu.memory_space<vmem>>, vector<1x1x128xf32>
      %280 = vector.shape_cast %279 : vector<1x1x128xf32> to vector<1x128xf32>
      %281 = vector.shape_cast %278 : vector<1x128xf32> to vector<1x1x128xf32>
      tpu.vector_store %arg34[%c0_135, %c0_136, %c0_137], %281 {strides = array<i32>} : memref<1x1x128xf32, #tpu.memory_space<vmem>>, vector<1x1x128xf32>,
    } else {
    }
    return
  }
  func.func @transform_0(%arg0: i32, %arg1: i32, %arg2: memref<2xi32, #tpu.memory_space<smem>>, %arg3: memref<2xi32, #tpu.memory_space<smem>>) -> (i32, i32) {
    %c0_i32 = arith.constant 0 : i32
    %c0_i32_0 = arith.constant 0 : i32
    return %arg0, %c0_i32 : i32, i32
  }
  func.func @transform_1(%arg0: i32, %arg1: i32, %arg2: memref<2xi32, #tpu.memory_space<smem>>, %arg3: memref<2xi32, #tpu.memory_space<smem>>) -> (i32, i32, i32) {
    %c0_i32 = arith.constant 0 : i32
    %c0_i32_0 = arith.constant 0 : i32
    %c0_i32_1 = arith.constant 0 : i32
    return %arg0, %c0_i32, %c0_i32_0 : i32, i32, i32
  }
  func.func @transform_2(%arg0: i32, %arg1: i32, %arg2: memref<2xi32, #tpu.memory_space<smem>>, %arg3: memref<2xi32, #tpu.memory_space<smem>>) -> (i32, i32) {
    %c0_i32 = arith.constant 0 : i32
    %c0_i32_0 = arith.constant 0 : i32
    %c0_i32_1 = arith.constant 0 : i32
    return %c0_i32, %c0_i32_0 : i32, i32
  }
  func.func @transform_3(%arg0: i32, %arg1: i32, %arg2: memref<2xi32, #tpu.memory_space<smem>>, %arg3: memref<2xi32, #tpu.memory_space<smem>>) -> (i32, i32) {
    %c0_i32 = arith.constant 0 : i32
    %c0_i32_0 = arith.constant 0 : i32
    %c0_i32_1 = arith.constant 0 : i32
    return %c0_i32, %c0_i32_0 : i32, i32
  }
  func.func @transform_4(%arg0: i32, %arg1: i32, %arg2: memref<2xi32, #tpu.memory_space<smem>>, %arg3: memref<2xi32, #tpu.memory_space<smem>>) -> (i32, i32, i32) {
    %c0_i32 = arith.constant 0 : i32
    %c0_i32_0 = arith.constant 0 : i32
    %c0_i32_1 = arith.constant 0 : i32
    return %arg1, %c0_i32, %c0_i32_0 : i32, i32, i32
  }
  func.func @transform_5(%arg0: i32, %arg1: i32, %arg2: memref<2xi32, #tpu.memory_space<smem>>, %arg3: memref<2xi32, #tpu.memory_space<smem>>) -> (i32, i32, i32) {
    %c0_i32 = arith.constant 0 : i32
    %c0_i32_0 = arith.constant 0 : i32
    %c0_i32_1 = arith.constant 0 : i32
    return %arg1, %c0_i32, %c0_i32_0 : i32, i32, i32
  }
  func.func @transform_6(%arg0: i32, %arg1: i32, %arg2: memref<2xi32, #tpu.memory_space<smem>>, %arg3: memref<2xi32, #tpu.memory_space<smem>>) -> (i32, i32, i32) {
    %c0_i32 = arith.constant 0 : i32
    %c0_i32_0 = arith.constant 0 : i32
    %c0_i32_1 = arith.constant 0 : i32
    return %arg1, %c0_i32, %c0_i32_0 : i32, i32, i32
  }
  func.func @transform_7(%arg0: i32, %arg1: i32, %arg2: memref<2xi32, #tpu.memory_space<smem>>, %arg3: memref<2xi32, #tpu.memory_space<smem>>) -> (i32, i32, i32) {
    %c0_i32 = arith.constant 0 : i32
    %c0_i32_0 = arith.constant 0 : i32
    %c0_i32_1 = arith.constant 0 : i32
    return %arg1, %c0_i32, %c0_i32_0 : i32, i32, i32
  }
  func.func @transform_8(%arg0: i32, %arg1: i32, %arg2: memref<2xi32, #tpu.memory_space<smem>>, %arg3: memref<2xi32, #tpu.memory_space<smem>>) -> (i32, i32, i32) {
    %c0_i32 = arith.constant 0 : i32
    %c0_i32_0 = arith.constant 0 : i32
    %c0_i32_1 = arith.constant 0 : i32
    return %arg1, %c0_i32, %c0_i32_0 : i32, i32, i32
  }
  func.func @transform_9(%arg0: i32, %arg1: i32, %arg2: memref<2xi32, #tpu.memory_space<smem>>, %arg3: memref<2xi32, #tpu.memory_space<smem>>) -> (i32, i32, i32) {
    %c0_i32 = arith.constant 0 : i32
    %c0_i32_0 = arith.constant 0 : i32
    %c0_i32_1 = arith.constant 0 : i32
    return %arg1, %c0_i32, %c0_i32_0 : i32, i32, i32
  }
  func.func @transform_10(%arg0: i32, %arg1: i32, %arg2: memref<2xi32, #tpu.memory_space<smem>>, %arg3: memref<2xi32, #tpu.memory_space<smem>>) -> (i32, i32, i32) {
    %c0_i32 = arith.constant 0 : i32
    %c0_i32_0 = arith.constant 0 : i32
    %c0_i32_1 = arith.constant 0 : i32
    return %arg1, %c0_i32, %c0_i32_0 : i32, i32, i32
  }
  func.func @transform_11(%arg0: i32, %arg1: i32, %arg2: memref<2xi32, #tpu.memory_space<smem>>, %arg3: memref<2xi32, #tpu.memory_space<smem>>) -> (i32, i32, i32) {
    %c0_i32 = arith.constant 0 : i32
    %c0_i32_0 = arith.constant 0 : i32
    %c0_i32_1 = arith.constant 0 : i32
    return %arg1, %c0_i32, %c0_i32_0 : i32, i32, i32
  }
  func.func @transform_12(%arg0: i32, %arg1: i32, %arg2: memref<2xi32, #tpu.memory_space<smem>>, %arg3: memref<2xi32, #tpu.memory_space<smem>>) -> (i32, i32, i32) {
    %c0_i32 = arith.constant 0 : i32
    %c0_i32_0 = arith.constant 0 : i32
    %c0_i32_1 = arith.constant 0 : i32
    return %arg1, %c0_i32, %c0_i32_0 : i32, i32, i32
  }
  func.func @transform_13(%arg0: i32, %arg1: i32, %arg2: memref<2xi32, #tpu.memory_space<smem>>, %arg3: memref<2xi32, #tpu.memory_space<smem>>) -> (i32, i32, i32) {
    %c0_i32 = arith.constant 0 : i32
    %c0_i32_0 = arith.constant 0 : i32
    %c0_i32_1 = arith.constant 0 : i32
    return %arg1, %c0_i32, %c0_i32_0 : i32, i32, i32
  }
  func.func @transform_14(%arg0: i32, %arg1: i32, %arg2: memref<2xi32, #tpu.memory_space<smem>>, %arg3: memref<2xi32, #tpu.memory_space<smem>>) -> (i32, i32, i32) {
    %c0_i32 = arith.constant 0 : i32
    %c0_i32_0 = arith.constant 0 : i32
    %c0_i32_1 = arith.constant 0 : i32
    return %arg1, %c0_i32, %c0_i32_0 : i32, i32, i32
  }
  func.func @transform_15(%arg0: i32, %arg1: i32, %arg2: memref<2xi32, #tpu.memory_space<smem>>, %arg3: memref<2xi32, #tpu.memory_space<smem>>) -> (i32, i32, i32) {
    %c0_i32 = arith.constant 0 : i32
    %c0_i32_0 = arith.constant 0 : i32
    %c0_i32_1 = arith.constant 0 : i32
    return %arg1, %c0_i32, %c0_i32_0 : i32, i32, i32
  }
  func.func @transform_16(%arg0: i32, %arg1: i32, %arg2: memref<2xi32, #tpu.memory_space<smem>>, %arg3: memref<2xi32, #tpu.memory_space<smem>>) -> (i32, i32) {
    %c0_i32 = arith.constant 0 : i32
    %c0_i32_0 = arith.constant 0 : i32
    %c0_i32_1 = arith.constant 0 : i32
    return %c0_i32, %c0_i32_0 : i32, i32
  }
  func.func @transform_17(%arg0: i32, %arg1: i32, %arg2: memref<2xi32, #tpu.memory_space<smem>>, %arg3: memref<2xi32, #tpu.memory_space<smem>>) -> (i32, i32) {
    %c0_i32 = arith.constant 0 : i32
    %c0_i32_0 = arith.constant 0 : i32
    %c0_i32_1 = arith.constant 0 : i32
    return %c0_i32, %c0_i32_0 : i32, i32
  }
  func.func @transform_18(%arg0: i32, %arg1: i32, %arg2: memref<2xi32, #tpu.memory_space<smem>>, %arg3: memref<2xi32, #tpu.memory_space<smem>>) -> (i32, i32) {
    %c0_i32 = arith.constant 0 : i32
    %c0_i32_0 = arith.constant 0 : i32
    %c0_i32_1 = arith.constant 0 : i32
    return %c0_i32, %c0_i32_0 : i32, i32
  }
  func.func @transform_19(%arg0: i32, %arg1: i32, %arg2: memref<2xi32, #tpu.memory_space<smem>>, %arg3: memref<2xi32, #tpu.memory_space<smem>>) -> (i32, i32) {
    %c0_i32 = arith.constant 0 : i32
    %c0_i32_0 = arith.constant 0 : i32
    %c0_i32_1 = arith.constant 0 : i32
    return %c0_i32, %c0_i32_0 : i32, i32
  }
  func.func @transform_20(%arg0: i32, %arg1: i32, %arg2: memref<2xi32, #tpu.memory_space<smem>>, %arg3: memref<2xi32, #tpu.memory_space<smem>>) -> (i32, i32) {
    %c0_i32 = arith.constant 0 : i32
    %c0_i32_0 = arith.constant 0 : i32
    %c0_i32_1 = arith.constant 0 : i32
    return %c0_i32, %c0_i32_0 : i32, i32
  }
  func.func @transform_21(%arg0: i32, %arg1: i32, %arg2: memref<2xi32, #tpu.memory_space<smem>>, %arg3: memref<2xi32, #tpu.memory_space<smem>>) -> (i32, i32) {
    %c0_i32 = arith.constant 0 : i32
    %c0_i32_0 = arith.constant 0 : i32
    %c0_i32_1 = arith.constant 0 : i32
    return %c0_i32, %c0_i32_0 : i32, i32
  }
  func.func @transform_22(%arg0: i32, %arg1: i32, %arg2: memref<2xi32, #tpu.memory_space<smem>>, %arg3: memref<2xi32, #tpu.memory_space<smem>>) -> (i32, i32) {
    %c0_i32 = arith.constant 0 : i32
    %c0_i32_0 = arith.constant 0 : i32
    %c0_i32_1 = arith.constant 0 : i32
    return %c0_i32, %c0_i32_0 : i32, i32
  }
  func.func @transform_23(%arg0: i32, %arg1: i32, %arg2: memref<2xi32, #tpu.memory_space<smem>>, %arg3: memref<2xi32, #tpu.memory_space<smem>>) -> (i32, i32) {
    %c0_i32 = arith.constant 0 : i32
    %c0_i32_0 = arith.constant 0 : i32
    %c0_i32_1 = arith.constant 0 : i32
    return %c0_i32, %c0_i32_0 : i32, i32
  }
  func.func @transform_24(%arg0: i32, %arg1: i32, %arg2: memref<2xi32, #tpu.memory_space<smem>>, %arg3: memref<2xi32, #tpu.memory_space<smem>>) -> (i32, i32) {
    %c0_i32 = arith.constant 0 : i32
    %c0_i32_0 = arith.constant 0 : i32
    %c0_i32_1 = arith.constant 0 : i32
    return %c0_i32, %c0_i32_0 : i32, i32
  }
  func.func @transform_25(%arg0: i32, %arg1: i32, %arg2: memref<2xi32, #tpu.memory_space<smem>>, %arg3: memref<2xi32, #tpu.memory_space<smem>>) -> (i32, i32) {
    %c0_i32 = arith.constant 0 : i32
    %c0_i32_0 = arith.constant 0 : i32
    %c0_i32_1 = arith.constant 0 : i32
    return %c0_i32, %c0_i32_0 : i32, i32
  }
  func.func @transform_26(%arg0: i32, %arg1: i32, %arg2: memref<2xi32, #tpu.memory_space<smem>>, %arg3: memref<2xi32, #tpu.memory_space<smem>>) -> (i32, i32) {
    %c0_i32 = arith.constant 0 : i32
    %c0_i32_0 = arith.constant 0 : i32
    %c0_i32_1 = arith.constant 0 : i32
    return %c0_i32, %c0_i32_0 : i32, i32
  }
  func.func @transform_27(%arg0: i32, %arg1: i32, %arg2: memref<2xi32, #tpu.memory_space<smem>>, %arg3: memref<2xi32, #tpu.memory_space<smem>>) -> (i32, i32) {
    %c0_i32 = arith.constant 0 : i32
    %c0_i32_0 = arith.constant 0 : i32
    %c0_i32_1 = arith.constant 0 : i32
    return %c0_i32, %c0_i32_0 : i32, i32
  }
  func.func @transform_28(%arg0: i32, %arg1: i32, %arg2: memref<2xi32, #tpu.memory_space<smem>>, %arg3: memref<2xi32, #tpu.memory_space<smem>>) -> (i32, i32, i32) {
    %c0_i32 = arith.constant 0 : i32
    %c0_i32_0 = arith.constant 0 : i32
    %c0_i32_1 = arith.constant 0 : i32
    return %arg0, %c0_i32, %c0_i32_0 : i32, i32, i32
  }
  func.func @transform_29(%arg0: i32, %arg1: i32, %arg2: memref<2xi32, #tpu.memory_space<smem>>, %arg3: memref<2xi32, #tpu.memory_space<smem>>) -> (i32, i32, i32) {
    %c0_i32 = arith.constant 0 : i32
    %c0_i32_0 = arith.constant 0 : i32
    %c0_i32_1 = arith.constant 0 : i32
    return %arg0, %c0_i32, %c0_i32_0 : i32, i32, i32
  }
  func.func @transform_30(%arg0: i32, %arg1: i32, %arg2: memref<2xi32, #tpu.memory_space<smem>>, %arg3: memref<2xi32, #tpu.memory_space<smem>>) -> (i32, i32, i32) {
    %c0_i32 = arith.constant 0 : i32
    %c0_i32_0 = arith.constant 0 : i32
    %c0_i32_1 = arith.constant 0 : i32
    return %arg0, %c0_i32, %c0_i32_0 : i32, i32, i32
  }
}

</mosaic_0001>

<bundles_post_ra>
// kernel: kg_bert_forward.1
= control target key start
LH: loop header
LB: loop body
LE: loop exit
PB: predicated region body
PF: predicated region fallthrough
CT: control target
= control target key end

     0   :  { %s5358_s6 = smov 2   ;;  %s5359_s10 = smov 3   ;;  %s6509_s0 = inlined_call_operand.smem [shape: u32[33], index: -1, kind: input, shape index: {}] }
   0x1   :  { %s5427_s5 = sld [smem:[%s6509_s0]]   ;;  %s5360_s14 = smov 4  }
   0x2   :  { %s5432_s9 = sld [smem:[%s6509_s0 + %s5358_s6]]   ;;  %s5361_s18 = smov 5  }
   0x3   :  { %s5437_s13 = sld [smem:[%s6509_s0 + %s5359_s10]]   ;;  %s5362_s22 = smov 6  }
   0x4   :  { %s5442_s17 = sld [smem:[%s6509_s0 + %s5360_s14]]   ;;  %s5363_s26 = smov 7  }
   0x5   :  { %s5447_s21 = sld [smem:[%s6509_s0 + %s5361_s18]]   ;;  %s5364_s30 = smov 8  }
   0x6   :  { %s5452_s25 = sld [smem:[%s6509_s0 + %s5362_s22]]   ;;  %s5365_s4 = smov 9  }
   0x7   :  { %s5457_s29 = sld [smem:[%s6509_s0 + %s5363_s26]]   ;;  %s5366_s10 = smov 10  }
   0x8   :  { %6563 = sst [smem:[#allocation40_spill]] %s5432_s9  ;;  %s5367_s15 = smov 11  }
   0x9   :  { %6564 = sst [smem:[#allocation41_spill]] %s5437_s13  ;;  %s5368_s20 = smov 12  }
   0xa   :  { %6565 = sst [smem:[#allocation42_spill]] %s5442_s17  ;;  %s5369_s26 = smov 13  }
   0xb   :  { %6566 = sst [smem:[#allocation43_spill]] %s5447_s21  ;;  %s5370_s1 = smov 14  }
   0xc   :  { %6567 = sst [smem:[#allocation44_spill]] %s5452_s25  ;;  %s5371_s7 = smov 15  }
   0xd   :  { %6568 = sst [smem:[#allocation45_spill]] %s5457_s29  ;;  %s5373_s22 = smov 17  }
   0xe   :  { %s5462_s3 = sld [smem:[%s6509_s0 + %s5364_s30]]   ;;  %s5374_s28 = smov 18  }
   0xf   :  { %s5467_s8 = sld [smem:[%s6509_s0 + %s5365_s4]]   ;;  %s71_s29 = sshll.u32 %s5427_s5, 4  ;;  %s72_s29 = int_to_ptr.vmem [resolvable:$true] %s71_s29 }
  0x10   :  { %s5472_s14 = sld [smem:[%s6509_s0 + %s5366_s10]]   ;;  %p4783_p1 = scmp.lt.s32.totalorder %s72_s29, %s72_s29 }
  0x11   :  { %s5477_s19 = sld [smem:[%s6509_s0 + %s5367_s15]]   ;;  %s5372_s15 = smov 16  }
  0x12   :  { %s5482_s24 = sld [smem:[%s6509_s0 + %s5368_s20]]  }
  0x13   :  { %s5487_s30 = sld [smem:[%s6509_s0 + %s5369_s26]]  }
  0x14   :  { %6569 = sst [smem:[#allocation46_spill]] %s5462_s3 }
  0x15   :  { %6570 = sst [smem:[#allocation47_spill]] %s5467_s8 }
  0x16   :  { %6571 = sst [smem:[#allocation48_spill]] %s5472_s14 }
  0x17   :  { %6572 = sst [smem:[#allocation49_spill]] %s5477_s19 }
  0x18   :  { %6573 = sst [smem:[#allocation50_spill]] %s5482_s24 }
  0x19   :  { %6574 = sst [smem:[#allocation51_spill]] %s5487_s30 }
  0x1a   :  { %s5492_s6 = sld [smem:[%s6509_s0 + %s5370_s1]]  }
  0x1b   :  { %s5497_s12 = sld [smem:[%s6509_s0 + %s5371_s7]]   ;;  %s5375_s7 = smov 19  }
  0x1c   :  { %s5502_s20 = sld [smem:[%s6509_s0 + %s5372_s15]]   ;;  %s5376_s15 = smov 20  }
  0x1d   :  { %s5507_s27 = sld [smem:[%s6509_s0 + %s5373_s22]]   ;;  %s5377_s22 = smov 21  }
  0x1e   :  { %s5512_s4 = sld [smem:[%s6509_s0 + %s5374_s28]]   ;;  %s5378_s28 = smov 22  }
  0x1f   :  { %s5517_s21 = sld [smem:[%s6509_s0 + %s5375_s7]]   ;;  %s5379_s7 = smov 23  }
  0x20   :  { %6575 = sst [smem:[#allocation52_spill]] %s5492_s6 }
  0x21   :  { %6576 = sst [smem:[#allocation53_spill]] %s5497_s12 }
  0x22   :  { %6577 = sst [smem:[#allocation54_spill]] %s5502_s20 }
  0x23   :  { %6578 = sst [smem:[#allocation55_spill]] %s5507_s27 }
  0x24   :  { %6579 = sst [smem:[#allocation56_spill]] %s5512_s4 }
  0x25   :  { %6580 = sst [smem:[#allocation57_spill]] %s5517_s21 }
  0x26   :  { %s5522_s17 = sld [smem:[%s6509_s0 + %s5376_s15]]   ;;  %s5380_s15 = smov 24  }
  0x27   :  { %s5527_s12 = sld [smem:[%s6509_s0 + %s5377_s22]]   ;;  %s5381_s22 = smov 25  }
  0x28   :  { %s5532_s30 = sld [smem:[%s6509_s0 + %s5378_s28]]   ;;  %s5382_s28 = smov 26  }
  0x29   :  { %s5537_s21 = sld [smem:[%s6509_s0 + %s5379_s7]]   ;;  %s5383_s7 = smov 27  }
  0x2a   :  { %s5547_s1 = sld [smem:[%s6509_s0 + %s5381_s22]]   ;;  %s5385_s22 = smov 29  }
  0x2b   :  { %s5552_s10 = sld [smem:[%s6509_s0 + %s5382_s28]]  }
  0x2c   :  { %6581 = sst [smem:[#allocation58_spill]] %s5522_s17 }
  0x2d   :  { %6582 = sst [smem:[#allocation59_spill]] %s5527_s12  ;;  %s5386_s12 = smov 30  }
  0x2e   :  { %6583 = sst [smem:[#allocation60_spill]] %s5532_s30 }
  0x2f   :  { %6584 = sst [smem:[#allocation61_spill]] %s5537_s21  ;;  %s5387_s21 = smov 31  }
  0x30   :  { %s5542_s17 = sld [smem:[%s6509_s0 + %s5380_s15]]   ;;  %s5384_s15 = smov 28  }
  0x31   :  { %6586 = sst [smem:[#allocation63_spill]] %s5547_s1 }
  0x32   :  { %6587 = sst [smem:[#allocation64_spill]] %s5552_s10 }
  0x33   :  { %s5557_s16 = sld [smem:[%s6509_s0 + %s5383_s7]]  }
  0x34   :  { %s5562_s23 = sld [smem:[%s6509_s0 + %s5384_s15]]  }
  0x35   :  { %s5567_s19 = sld [smem:[%s6509_s0 + %s5385_s22]]   ;;  %s4778_s22 = scalar_lea.vmem %s72_s29, 16 }
  0x36   :  { %6585 = sst [smem:[#allocation62_spill]] %s5542_s17  ;;  %s5388_s17 = smov 32  }
  0x37   :  { %s5572_s25 = sld [smem:[%s6509_s0 + %s5386_s12]]   ;;  %p4779_p0 = scmp.ne.s32.totalorder %s72_s29, %s4778_s22 }
  0x38   :  { %s5577_s14 = sld [smem:[%s6509_s0 + %s5387_s21]]   ;;  %p4784_p2 = scmp.lt.s32.totalorder %s4778_s22, %s4778_s22 }
  0x39   :  { %6588 = sst [smem:[#allocation65_spill]] %s5557_s16 }
  0x3a   :  { %6589 = sst [smem:[#allocation66_spill]] %s5562_s23  ;;  %p4785_p3 = por %p4784_p2, %p4783_p1 }
  0x3b   :  { %6590 = sst [smem:[#allocation67_spill]] %s5567_s19 }
  0x3c   :  { %s5582_s8 = sld [smem:[%s6509_s0 + %s5388_s17]]   ;;  %p4786_p4 = pnand %p4785_p3, %p4779_p0 }
  0x3d   :  { %6591 = sst [smem:[#allocation68_spill]] %s5572_s25 }
  0x3e   :  { %6592 = sst [smem:[#allocation69_spill]] %s5577_s14 }
  0x42   :  { %6593 = sst [smem:[#allocation70_spill]] %s5582_s8 }
  0x43   :  { %4789 = shalt.err (!%p4786_p4)  }
  0x44   :  { %s5389_s26 = smov [#allocation4]   ;;  %s5390_s12 = smov 1  }
  0x45   :  { %74 = dma.vmem_to_smem %s72_s29, 16, %s5389_s26, [#allocation3] }
  0x46   :  { %s3875_s21 = sld [smem:[%s6509_s0 + %s5390_s12]]  }
  0x4c   :  { %s75_s7 = sshll.u32 %s3875_s21, 4  ;;  %s76_s7 = int_to_ptr.vmem [resolvable:$true] %s75_s7 }
  0x4d   :  { %s4790_s11 = scalar_lea.vmem %s76_s7, 16  ;;  %p4795_p6 = scmp.lt.s32.totalorder %s76_s7, %s76_s7 }
  0x4e   :  { %p4791_p5 = scmp.ne.s32.totalorder %s76_s7, %s4790_s11  ;;  %p4796_p7 = scmp.lt.s32.totalorder %s4790_s11, %s4790_s11 }
  0x50   :  { %p4797_p8 = por %p4796_p7, %p4795_p6 }
  0x52   :  { %p4798_p9 = pnand %p4797_p8, %p4791_p5 }
  0x54   :  { %4801 = shalt.err (!%p4798_p9)  }
  0x55   :  { %s5391_s5 = smov [#allocation5]  }
  0x56   :  { %78 = dma.vmem_to_smem %s76_s7, 16, %s5391_s5, [#allocation3] }
  0x57   :  { %5276 = dma.done.wait [#allocation3], 32 }
  0x58   :  { %5277 = vsyncadd [#allocation3], 4294967264 }
  0x59   :  { %80 = sfence }
  0x5a   :  { %81 = vsyncpa [#allocation7], 0 }
  0x5b   :  { %83 = vsyncpa [#allocation7 + $0x1], 0 }
  0x5c   :  { %84 = vsyncpa [#allocation10], 0 }
  0x5d   :  { %86 = vsyncpa [#allocation10 + $0x1], 0 }
  0x5e   :  { %87 = vsyncpa [#allocation13], 0 }
  0x5f   :  { %89 = vsyncpa [#allocation13 + $0x1], 0 }
  0x60   :  { %90 = vsyncpa [#allocation16], 0 }
  0x61   :  { %91 = vsyncpa [#allocation19], 0 }
  0x62   :  { %92 = vsyncpa [#allocation22], 0 }
  0x63   :  { %93 = vsyncpa [#allocation25], 0 }
  0x64   :  { %94 = vsyncpa [#allocation8], 0 }
  0x65   :  { %96 = vsyncpa [#allocation8 + $0x1], 0 }
  0x66   :  { %97 = vsyncpa [#allocation28], 0 }
  0x67   :  { %99 = vsyncpa [#allocation28 + $0x1], 0  ;;  %s5588_s0 = smov 0   ;;  %s5590_s17 = smov 0  }
  0x68   :  { %s5592_s15 = smov 0   ;;  %s5594_s18 = smov 0  }
  0x69   :  { %s5596_s29 = smov 0   ;;  %s5598_s22 = smov 0  }
  0x6a   :  { %s5600_s26 = smov 0   ;;  %s5602_s12 = smov 0  }
  0x6b   :  { %s5604_s28 = smov 0   ;;  %s5606_s2 = smov 0  }
  0x6c   :  { %s5608_s21 = smov 0  }
  0x6d LB: > { %s6594_s30 = sld [smem:[#allocation60_spill]]  ;;  %s6595_s27 = sld [smem:[#allocation55_spill]]  ;;  %s5356_s21 = sphi %s5608_s21, %s105_s21   ;;  %s5352_s2 = sphi %s5606_s2, %s6705_s2   ;;  %s5348_s28 = sphi %s5604_s28, %s6704_s28   ;;  %s5344_s12 = sphi %s5602_s12, %s6703_s12   ;;  %s5340_s26 = sphi %s5600_s26, %s6702_s26   ;;  %s5336_s22 = sphi %s5598_s22, %s6701_s22   ;;  %s5332_s29 = sphi %s5596_s29, %s6700_s29   ;;  %s5328_s18 = sphi %s5594_s18, %s6699_s18   ;;  %s5324_s15 = sphi %s5592_s15, %s6698_s15   ;;  %s5320_s17 = sphi %s5590_s17, %s6697_s17   ;;  %s5316_s0 = sphi %s5588_s0, %s6696_s0  }
  0x6e   : > { %s6596_s23 = sld [smem:[#allocation66_spill]]  ;;  %s6597_s20 = sld [smem:[#allocation54_spill]] }
  0x6f   : > { %s6598_s19 = sld [smem:[#allocation67_spill]]  ;;  %s6599_s6 = sld [smem:[#allocation52_spill]] }
  0x70   : > { %s6600_s10 = sld [smem:[#allocation64_spill]]  ;;  %s6601_s24 = sld [smem:[#allocation50_spill]] }
  0x71   : > { %s6602_s16 = sld [smem:[#allocation65_spill]]  ;;  %s6603_s4 = sld [smem:[#allocation56_spill]] }
  0x72   : > { %s6604_s1 = sld [smem:[#allocation63_spill]]  ;;  %6605 = sst [smem:[#allocation71_spill]] %s5316_s0 }
  0x73   : > { %6606 = sst [smem:[#allocation72_spill]] %s5320_s17  ;;  %s5644_s7 = sadd.s32 4294967295, %s5356_s21  }
  0x74   : > { %6607 = sst [smem:[#allocation73_spill]] %s5324_s15  ;;  %p3909_p10 = scmp.ge.s32.totalorder %s5356_s21, 1 }
  0x75   : > { %6608 = sst [smem:[#allocation74_spill]] %s5332_s29  ;;  %p6517_p11 = scmp.eq.s32.totalorder %s5644_s7, 0 }
  0x76   : > { %6609 = sst [smem:[#allocation75_spill]] %s5336_s22  ;;  %p858_p13 = scmp.lt.s32.totalorder %s5356_s21, 5 }
  0x77   : > { %6610 = sst [smem:[#allocation76_spill]] %s5340_s26  ;;  %s5392_s5 = smov [#allocation15]  }
  0x78   : > { %6611 = sst [smem:[#allocation77_spill]] %s5344_s12  ;;  %p5650_p0 = pnand %p3909_p10, %p858_p13 }
  0x79   : > { %6612 = sst [smem:[#allocation78_spill]] %s5348_s28  ;;  %s876_s8 = sshll.u32 %s5392_s5, 4  ;;  %s5654_s8 = int_to_ptr.vmem [resolvable:$true] %s876_s8 }
  0x7a   : > { %6613 = sst [smem:[#allocation79_spill]] %s5352_s2  ;;  %p4397_p1 = pneg %p5650_p0 }
  0x7b   : > { %s6614_s11 = scalar_select %p5650_p0, 1, 0 }
  0x7c   : > { %p5660_p2 = pnand %p4397_p1, %p6517_p11  ;;  %s5393_s14 = smov [#allocation18]  }
  0x7d   : > { %6615 = sst [smem:[#allocation80_spill]] %s6614_s11  ;;  %s918_s13 = sshll.u32 %s5393_s14, 4  ;;  %s5664_s13 = int_to_ptr.vmem [resolvable:$true] %s918_s13 }
  0x7e   : > { %s6616_s25 = scalar_select %p5660_p2, 1, 0 }
  0x7f   : > { %s5394_s9 = smov [#allocation21]   ;;  %s4802_s12 = scalar_lea.hbm %s6603_s4, 1024 }
  0x80   : > { %s940_s26 = sshll.u32 %s5394_s9, 4  ;;  %p4803_p3 = scmp.ne.s32.totalorder %s6603_s4, %s4802_s12  ;;  %s5666_s26 = int_to_ptr.vmem [resolvable:$true] %s940_s26 }
  0x81   : > { %p5672_p4 = pneg %p5660_p2  ;;  %p4809_p7 = scmp.lt.u32.totalorder %s4802_s12, %s6603_s4 }
  0x83   : > { %s6617_s5 = scalar_select %p5672_p4, 1, 0 }
  0x84   : > { %p4805_p5 = pnand %p5672_p4, %p4803_p3 }
  0x86   : > { %p4806_p6 = pneg %p4805_p5 }
  0x88   : > { %p4811_p8 = pnand %p4809_p7, %p4806_p6 }
  0x8a   : > { %4814 = shalt.err (!%p4811_p8)
}
  0x8b   : > { %s4815_s9 = scalar_lea.vmem %s5654_s8, 1024  ;;  %p4823_p1 = scmp.lt.s32.totalorder %s5654_s8, %s5654_s8 }
  0x8c   : > { %p4816_p9 = scmp.ne.s32.totalorder %s5654_s8, %s4815_s9  ;;  %p4824_p12 = scmp.lt.s32.totalorder %s4815_s9, %s4815_s9 }
  0x8e   : > { %p4818_p10 = pnand %p4816_p9, %p5672_p4  ;;  %p4825_p11 = por %p4824_p12, %p4823_p1 }
  0x90   : > { %p4819_p13 = pneg %p4818_p10 }
  0x92   : > { %p4826_p0 = pnand %p4825_p11, %p4819_p13 }
  0x94   : > { %4829 = shalt.err (!%p4826_p0)
}
  0x95   : > { %s6521_s14 = smov 64   ;;  %s6523_s12 = smov 4  }
  0x96   : > { %4400 = dma.hbm_to_vmem [thread:$0]  (!%p5660_p2), %s6603_s4, 1024, %s5654_s8, [#allocation16], %s6521_s14, %s6521_s14, %s6523_s12  }
  0x97   : > { %s4830_s11 = scalar_lea.hbm %s6604_s1, 16 }
  0x98   : > { %p4831_p3 = scmp.ne.s32.totalorder %s6604_s1, %s4830_s11  ;;  %p4837_p0 = scmp.lt.u32.totalorder %s4830_s11, %s6604_s1 }
  0x9a   : > { %p4833_p12 = pnand %p4831_p3, %p5672_p4 }
  0x9c   : > { %p4834_p11 = pneg %p4833_p12 }
  0x9e   : > { %p4839_p5 = pnand %p4837_p0, %p4834_p11 }
  0xa0   : > { %4842 = shalt.err (!%p4839_p5)
}
  0xa1   : > { %s4843_s9 = scalar_lea.vmem %s5664_s13, 16  ;;  %s4850_s3 = scalar_lea.vmem %s5664_s13, 32 }
  0xa2   : > { %p4844_p6 = scmp.ne.s32.totalorder %s5664_s13, %s4843_s9  ;;  %p4851_p9 = scmp.lt.s32.totalorder %s5664_s13, %s5664_s13 }
  0xa3   : > { %p4852_p10 = scmp.lt.s32.totalorder %s4850_s3, %s4843_s9 }
  0xa4   : > { %p4846_p7 = pnand %p4844_p6, %p5672_p4 }
  0xa5   : > { %p4853_p13 = por %p4852_p10, %p4851_p9 }
  0xa6   : > { %p4847_p8 = pneg %p4846_p7 }
  0xa8   : > { %p4854_p1 = pnand %p4853_p13, %p4847_p8 }
  0xaa   : > { %4857 = shalt.err (!%p4854_p1)
}
  0xab   : > { %4406 = dma.hbm_to_vmem [thread:$0]  (!%p5660_p2), %s6604_s1, 16, %s5664_s13, [#allocation19]  }
  0xac   : > { %s4858_s8 = scalar_lea.hbm %s6602_s16, 16 }
  0xad   : > { %p4859_p3 = scmp.ne.s32.totalorder %s6602_s16, %s4858_s8  ;;  %p4865_p0 = scmp.lt.u32.totalorder %s4858_s8, %s6602_s16 }
  0xaf   : > { %p4861_p12 = pnand %p4859_p3, %p5672_p4 }
  0xb1   : > { %p4862_p11 = pneg %p4861_p12 }
  0xb3   : > { %p4867_p5 = pnand %p4865_p0, %p4862_p11 }
  0xb5   : > { %4870 = shalt.err (!%p4867_p5)
}
  0xb6   : > { %s4871_s3 = scalar_lea.vmem %s5666_s26, 16  ;;  %s4878_s11 = scalar_lea.vmem %s5666_s26, 32 }
  0xb7   : > { %p4872_p6 = scmp.ne.s32.totalorder %s5666_s26, %s4871_s3  ;;  %p4879_p9 = scmp.lt.s32.totalorder %s5666_s26, %s5666_s26 }
  0xb8   : > { %p4880_p10 = scmp.lt.s32.totalorder %s4878_s11, %s4871_s3 }
  0xb9   : > { %p4874_p7 = pnand %p4872_p6, %p5672_p4 }
  0xba   : > { %p4881_p13 = por %p4880_p10, %p4879_p9 }
  0xbb   : > { %p4875_p8 = pneg %p4874_p7 }
  0xbd   : > { %p4882_p1 = pnand %p4881_p13, %p4875_p8 }
  0xbf   : > { %4885 = shalt.err (!%p4882_p1)
}
  0xc0   : > { %4412 = dma.hbm_to_vmem [thread:$0]  (!%p5660_p2), %s6602_s16, 16, %s5666_s26, [#allocation22]  }
  0xc1   : > { %s114_s9 = sadd.s32 1, %s5348_s28  ;;  %s117_s8 = sadd.s32 1, %s5352_s2 }
  0xc2   : > { %p115_p3 = scmp.ge.s32.totalorder %s114_s9, 2  ;;  %s270_s3 = sadd.s32 1, %s5336_s22 }
  0xc3   : > { %p277_p12 = scmp.ne.s32.totalorder %s5336_s22, %s5332_s29  ;;  %p278_p11 = scmp.eq.s32.totalorder %s5356_s21, 0 }
  0xc4   : > { %s6707_s9 = smov (%p115_p3, %s114_s9), 0  ;;  %s6709_s8 = smov (!%p115_p3, %s117_s8), %s5352_s2 }
  0xc5   : > { %6618 = sst [smem:[#allocation81_spill]] %s6707_s9  ;;  %s267_s26 = ssub.s32 %s5348_s28, %s6707_s9 }
  0xc6   : > { %p119_p0 = scmp.ge.s32.totalorder %s6709_s8, 2  ;;  %p268_p5 = scmp.eq.s32.totalorder %s267_s26, 0 }
  0xc7   : > { %p5736_p6 = por %p278_p11, %p277_p12  ;;  %p283_p7 = scmp.ne.s32.totalorder %s5332_s29, %s5328_s18 }
  0xc8   : > { %s6711_s8 = smov (%p119_p0, %s6709_s8), 0  ;;  %p6622_p8 = scmp.eq.s32.totalorder %s5644_s7, 0 }
  0xc9   : > { %6620 = sst [smem:[#allocation82_spill]] %s6711_s8  ;;  %s779_s26 = ssub.s32 %s5352_s2, %s6711_s8 }
  0xca   : > { %s5745_s14 = scalar_select %p268_p5, %s5336_s22, %s270_s3  }
  0xcb   : > { %p5749_p9 = por %p6622_p8, %p283_p7  ;;  %p780_p10 = scmp.eq.s32.totalorder %s779_s26, 0 }
  0xcc   : > { %6621 = sst [smem:[#allocation83_spill]] %s5745_s14  ;;  %s782_s13 = sadd.s32 1, %s5324_s15 }
  0xcd   : > { %s6623_s12 = scalar_select %p5749_p9, 1, 0 }
  0xce   : > { %p792_p13 = scmp.ne.s32.totalorder %s5324_s15, %s5320_s17  ;;  %p798_p1 = scmp.ne.s32.totalorder %s5320_s17, %s5316_s0 }
  0xcf   : > { %s5761_s18 = scalar_select %p780_p10, %s5324_s15, %s782_s13  }
  0xd0   : > { %p6625_p3 = scmp.eq.s32.totalorder %s5644_s7, 3  ;;  %s6628_s1 = sadd.s32 4294967294, %s5356_s21  }
  0xd1   : > { %6624 = sst [smem:[#allocation84_spill]] %s5761_s18  ;;  %p799_p11 = scmp.eq.s32.totalorder %s6628_s1, 3 }
  0xd2   : > { %p5765_p12 = por %p6625_p3, %p792_p13  ;;  %p4452_p0 = scmp.lt.s32.totalorder %s5356_s21, 4 }
  0xd3   : > { %s5773_s4 = sand.u32 1, %s5336_s22   ;;  %p5775_p5 = por %p799_p11, %p798_p1 }
  0xd4   : > { %s6626_s3 = scalar_select %p5765_p12, 1, 0 }
  0xd5   : > { %s6629_s26 = scalar_select %p5775_p5, 1, 0 }
  0xd6   : > { %6627 = sst [smem:[#allocation85_spill]] %s6626_s3  ;;  %s6539_s13 = sand.u32 1, %s5356_s21  }
  0xd7   : > { %6630 = sst [smem:[#allocation86_spill]] %s6629_s26  ;;  %p5782_p7 = pnand %p4452_p0, %p5736_p6 }
  0xd8   : > { %s6540_s8 = sshll.u32 %s5773_s4, 7  ;;  %s6532_s1 = sshll.u32 %s5348_s28, 11 }
  0xd9   : > { %s6631_s16 = scalar_select %p5782_p7, 1, 0 }
  0xda   : > { %s5791_s9 = scalar_lea.hbm %s6601_s24, %s6532_s1  ;;  %s1048_s2 = scalar_lea.vmem [#allocation9], %s6540_s8 }
  0xdb   : > { %s1055_s14 = sshll.u32 %s1048_s2, 4  ;;  %s5799_s11 = scalar_lea.sflag [#allocation10], %s6539_s13  ;;  %s5795_s14 = int_to_ptr.vmem [resolvable:$true] %s1055_s14 }
  0xdc   : > { %s4886_s22 = scalar_lea.hbm %s5791_s9, 2048  ;;  %p5805_p8 = pneg %p5782_p7 }
  0xdd   : > { %p4887_p6 = scmp.ne.s32.totalorder %s5791_s9, %s4886_s22  ;;  %s4891_s1 = scalar_lea.hbm %s6601_s24, 4096 }
  0xde   : > { %s6632_s18 = scalar_select %p5805_p8, 1, 0 }
  0xdf   : > { %p4889_p10 = pnand %p5805_p8, %p4887_p6  ;;  %p4892_p1 = scmp.lt.u32.totalorder %s5791_s9, %s6601_s24 }
  0xe0   : > { %p4893_p3 = scmp.lt.u32.totalorder %s4891_s1, %s4886_s22  ;;  %p4895_p0 = scmp.lt.u32.totalorder %s4886_s22, %s5791_s9 }
  0xe1   : > { %p4890_p13 = pneg %p4889_p10 }
  0xe2   : > { %p4894_p11 = por %p4893_p3, %p4892_p1 }
  0xe4   : > { %p4896_p5 = por %p4895_p0, %p4894_p11 }
  0xe6   : > { %p4897_p12 = pnand %p4896_p5, %p4890_p13 }
  0xe8   : > { %4900 = shalt.err (!%p4897_p12)
}
  0xe9   : > { %s4901_s2 = scalar_lea.vmem %s5795_s14, 2048  ;;  %s5397_s13 = smov [#allocation9]  }
  0xea   : > { %p4902_p9 = scmp.ne.s32.totalorder %s5795_s14, %s4901_s2  ;;  %s4906_s8 = sshll.u32 %s5397_s13, 4  ;;  %s4907_s8 = int_to_ptr.vmem [resolvable:$false] %s4906_s8 }
  0xeb   : > { %s4908_s15 = scalar_lea.vmem %s4907_s8, 4096  ;;  %p4909_p6 = scmp.lt.s32.totalorder %s5795_s14, %s4907_s8 }
  0xec   : > { %p4904_p2 = pnand %p4902_p9, %p5805_p8  ;;  %p4910_p10 = scmp.lt.s32.totalorder %s4908_s15, %s4901_s2 }
  0xee   : > { %p4905_p4 = pneg %p4904_p2  ;;  %p4911_p1 = por %p4910_p10, %p4909_p6 }
  0xf0   : > { %p4912_p3 = pnand %p4911_p1, %p4905_p4 }
  0xf2   : > { %4915 = shalt.err (!%p4912_p3)
}
  0xf3   : > { %s5398_s22 = smov 128   ;;  %s5399_s13 = smov 8  }
  0xf4   : > { %4425 = dma.hbm_to_vmem [thread:$0]  (!%p5782_p7), %s5791_s9, 2048, %s5795_s14, %s5799_s11, %s5398_s22, %s5398_s22, %s5399_s13  }
  0xf5   : > { %s6633_s15 = sshll.u32 %s5348_s28, 11  ;;  %s6634_s1 = sshll.u32 %s5773_s4, 7 }
  0xf6   : > { %s5828_s8 = scalar_lea.hbm %s6599_s6, %s6633_s15  ;;  %s1076_s2 = scalar_lea.vmem [#allocation11], %s6634_s1 }
  0xf7   : > { %s1083_s24 = sshll.u32 %s1076_s2, 4  ;;  %s3927_s26 = sshll.u32 %s5348_s28, 4  ;;  %s5832_s24 = int_to_ptr.vmem [resolvable:$true] %s1083_s24 }
  0xf8   : > { %s5836_s0 = scalar_lea.hbm %s6597_s20, %s3927_s26  ;;  %s1102_s3 = scalar_lea.vmem [#allocation12], %s5773_s4 }
  0xf9   : > { %s1109_s17 = sshll.u32 %s1102_s3, 4  ;;  %s5842_s14 = scalar_lea.hbm %s6595_s27, %s3927_s26  ;;  %s5839_s17 = int_to_ptr.vmem [resolvable:$true] %s1109_s17 }
  0xfa   : > { %s6635_s9 = sand.u32 1, %s5356_s21   ;;  %s4916_s13 = scalar_lea.hbm %s5836_s0, 16 }
  0xfb   : > { %s5846_s22 = scalar_lea.sflag [#allocation13], %s6635_s9  ;;  %p4917_p2 = scmp.ne.s32.totalorder %s5836_s0, %s4916_s13 }
  0xfc   : > { %s4921_s15 = scalar_lea.hbm %s6597_s20, 32  ;;  %p4922_p12 = scmp.lt.u32.totalorder %s5836_s0, %s6597_s20 }
  0xfd   : > { %p4919_p4 = pnand %p4917_p2, %p5805_p8  ;;  %p4923_p5 = scmp.lt.u32.totalorder %s4921_s15, %s4916_s13 }
  0xfe   : > { %p4925_p11 = scmp.lt.u32.totalorder %s4916_s13, %s5836_s0 }
  0xff   : > { %p4920_p9 = pneg %p4919_p4  ;;  %p4924_p13 = por %p4923_p5, %p4922_p12 }
 0x101   : > { %p4926_p0 = por %p4925_p11, %p4924_p13 }
 0x103   : > { %p4927_p6 = pnand %p4926_p0, %p4920_p9 }
 0x105   : > { %4930 = shalt.err (!%p4927_p6)
}
 0x106   : > { %s4931_s3 = scalar_lea.vmem %s5839_s17, 16  ;;  %s5400_s26 = smov [#allocation12]  }
 0x107   : > { %p4932_p10 = scmp.ne.s32.totalorder %s5839_s17, %s4931_s3  ;;  %s4936_s1 = sshll.u32 %s5400_s26, 4  ;;  %s4937_s1 = int_to_ptr.vmem [resolvable:$false] %s4936_s1 }
 0x108   : > { %s4938_s2 = scalar_lea.vmem %s4937_s1, 32  ;;  %p4939_p2 = scmp.lt.s32.totalorder %s5839_s17, %s4937_s1 }
 0x109   : > { %p4934_p1 = pnand %p4932_p10, %p5805_p8  ;;  %p4940_p4 = scmp.lt.s32.totalorder %s4938_s2, %s4931_s3 }
 0x10b   : > { %p4935_p3 = pneg %p4934_p1  ;;  %p4941_p12 = por %p4940_p4, %p4939_p2 }
 0x10d   : > { %p4942_p5 = pnand %p4941_p12, %p4935_p3 }
 0x10f   : > { %4945 = shalt.err (!%p4942_p5)
}
 0x110   : > { %4431 = dma.hbm_to_vmem [thread:$0]  (!%p5782_p7), %s5836_s0, 16, %s5839_s17, %s5846_s22  }
 0x111   : > { %s5401_s9 = smov [#allocation17]   ;;  %s5402_s15 = smov [#allocation20]  }
 0x112   : > { %s898_s13 = sshll.u32 %s5401_s9, 4  ;;  %s929_s26 = sshll.u32 %s5402_s15, 4  ;;  %s899_s13 = int_to_ptr.vmem [resolvable:$true] %s898_s13  ;;  %s5866_s26 = int_to_ptr.vmem [resolvable:$true] %s929_s26 }
 0x113   : > { %s4946_s3 = scalar_lea.hbm %s6594_s30, 1024  ;;  %p6636_p13 = scmp.ne.s32.totalorder %s6617_s5, 0 }
 0x114   : > { %p4947_p9 = scmp.ne.s32.totalorder %s6594_s30, %s4946_s3  ;;  %p4953_p6 = scmp.lt.u32.totalorder %s4946_s3, %s6594_s30 }
 0x116   : > { %p4949_p11 = pnand %p4947_p9, %p6636_p13 }
 0x118   : > { %p4950_p0 = pneg %p4949_p11 }
 0x11a   : > { %p4955_p10 = pnand %p4953_p6, %p4950_p0 }
 0x11c   : > { %4958 = shalt.err (!%p4955_p10)
}
 0x11d   : > { %s4959_s1 = scalar_lea.vmem %s899_s13, 1024  ;;  %p4967_p4 = scmp.lt.s32.totalorder %s899_s13, %s899_s13 }
 0x11e   : > { %p4960_p1 = scmp.ne.s32.totalorder %s899_s13, %s4959_s1  ;;  %p4968_p12 = scmp.lt.s32.totalorder %s4959_s1, %s4959_s1 }
 0x120   : > { %p4962_p3 = pnand %p4960_p1, %p6636_p13  ;;  %p4969_p5 = por %p4968_p12, %p4967_p4 }
 0x122   : > { %p4963_p2 = pneg %p4962_p3 }
 0x124   : > { %p4970_p7 = pnand %p4969_p5, %p4963_p2 }
 0x126   : > { %4973 = shalt.err (!%p4970_p7)
}
 0x127   : > { %p6637_p8 = scmp.ne.s32.totalorder %s6616_s25, 0  ;;  %s6638_s0 = smov 4  }
 0x128   : > { %s6639_s17 = smov 64   ;;  %s4974_s2 = scalar_lea.hbm %s6600_s10, 16 }
 0x129   : > { %4403 = dma.hbm_to_vmem [thread:$0]  (!%p6637_p8), %s6594_s30, 1024, %s899_s13, [#allocation16], %s6639_s17, %s6639_s17, %s6638_s0  }
 0x12a   : > { %p4975_p9 = scmp.ne.s32.totalorder %s6600_s10, %s4974_s2  ;;  %p4981_p6 = scmp.lt.u32.totalorder %s4974_s2, %s6600_s10 }
 0x12c   : > { %p4977_p11 = pnand %p4975_p9, %p6636_p13 }
 0x12e   : > { %p4978_p0 = pneg %p4977_p11 }
 0x130   : > { %p4983_p10 = pnand %p4981_p6, %p4978_p0 }
 0x132   : > { %4986 = shalt.err (!%p4983_p10)
}
 0x133   : > { %s4987_s9 = scalar_lea.vmem %s5866_s26, 16  ;;  %s4994_s15 = scalar_lea.vmem %s5866_s26, 32 }
 0x134   : > { %p4988_p7 = scmp.ne.s32.totalorder %s5866_s26, %s4987_s9  ;;  %p4995_p2 = scmp.lt.s32.totalorder %s5866_s26, %s5866_s26 }
 0x135   : > { %p4996_p4 = scmp.lt.s32.totalorder %s4994_s15, %s4987_s9 }
 0x136   : > { %p4990_p1 = pnand %p4988_p7, %p6636_p13 }
 0x137   : > { %p4997_p12 = por %p4996_p4, %p4995_p2 }
 0x138   : > { %p4991_p3 = pneg %p4990_p1 }
 0x13a   : > { %p4998_p5 = pnand %p4997_p12, %p4991_p3 }
 0x13c   : > { %5001 = shalt.err (!%p4998_p5)
}
 0x13d   : > { %4409 = dma.hbm_to_vmem [thread:$0]  (!%p6637_p8), %s6600_s10, 16, %s5866_s26, [#allocation19]  }
 0x13e   : > { %s5403_s13 = smov [#allocation23]   ;;  %s5404_s1 = smov [#allocation24]  }
 0x13f   : > { %s950_s3 = sshll.u32 %s5403_s13, 4  ;;  %s964_s2 = sshll.u32 %s5404_s1, 4  ;;  %s951_s3 = int_to_ptr.vmem [resolvable:$true] %s950_s3  ;;  %s5897_s2 = int_to_ptr.vmem [resolvable:$true] %s964_s2 }
 0x140   : > { %s5002_s9 = scalar_lea.hbm %s6596_s23, 1024 }
 0x141   : > { %p5003_p9 = scmp.ne.s32.totalorder %s6596_s23, %s5002_s9  ;;  %p5009_p6 = scmp.lt.u32.totalorder %s5002_s9, %s6596_s23 }
 0x143   : > { %p5005_p11 = pnand %p5003_p9, %p6636_p13 }
 0x145   : > { %p5006_p0 = pneg %p5005_p11 }
 0x147   : > { %p5011_p10 = pnand %p5009_p6, %p5006_p0 }
 0x149   : > { %5014 = shalt.err (!%p5011_p10)
}
 0x14a   : > { %s5015_s15 = scalar_lea.vmem %s951_s3, 1024  ;;  %p5023_p2 = scmp.lt.s32.totalorder %s951_s3, %s951_s3 }
 0x14b   : > { %p5016_p7 = scmp.ne.s32.totalorder %s951_s3, %s5015_s15  ;;  %p5024_p4 = scmp.lt.s32.totalorder %s5015_s15, %s5015_s15 }
 0x14d   : > { %p5018_p1 = pnand %p5016_p7, %p6636_p13  ;;  %p5025_p12 = por %p5024_p4, %p5023_p2 }
 0x14f   : > { %p5019_p3 = pneg %p5018_p1 }
 0x151   : > { %p5026_p5 = pnand %p5025_p12, %p5019_p3 }
 0x153   : > { %5029 = shalt.err (!%p5026_p5)
}
 0x154   : > { %4415 = dma.hbm_to_vmem [thread:$0]  (!%p6637_p8), %s6596_s23, 1024, %s951_s3, [#allocation22], %s6639_s17, %s6639_s17, %s6638_s0  }
 0x155   : > { %s5030_s26 = scalar_lea.hbm %s6598_s19, 16 }
 0x156   : > { %p5031_p9 = scmp.ne.s32.totalorder %s6598_s19, %s5030_s26  ;;  %p5037_p6 = scmp.lt.u32.totalorder %s5030_s26, %s6598_s19 }
 0x158   : > { %p5033_p11 = pnand %p5031_p9, %p6636_p13 }
 0x15a   : > { %p5034_p0 = pneg %p5033_p11 }
 0x15c   : > { %p5039_p10 = pnand %p5037_p6, %p5034_p0 }
 0x15e   : > { %5042 = shalt.err (!%p5039_p10)
}
 0x15f   : > { %s5043_s13 = scalar_lea.vmem %s5897_s2, 16  ;;  %s5050_s1 = scalar_lea.vmem %s5897_s2, 32 }
 0x160   : > { %p5044_p7 = scmp.ne.s32.totalorder %s5897_s2, %s5043_s13  ;;  %p5051_p2 = scmp.lt.s32.totalorder %s5897_s2, %s5897_s2 }
 0x161   : > { %p5052_p4 = scmp.lt.s32.totalorder %s5050_s1, %s5043_s13 }
 0x162   : > { %p5046_p1 = pnand %p5044_p7, %p6636_p13 }
 0x163   : > { %p5053_p12 = por %p5052_p4, %p5051_p2 }
 0x164   : > { %p5047_p3 = pneg %p5046_p1 }
 0x166   : > { %p5054_p5 = pnand %p5053_p12, %p5047_p3 }
 0x168   : > { %5057 = shalt.err (!%p5054_p5)
}
 0x169   : > { %s6640_s3 = sld [smem:[#allocation46_spill]]  ;;  %s3918_s5 = sshll.u32 %s5773_s4, 6 }
 0x16a   : > { %4418 = dma.hbm_to_vmem [thread:$0]  (!%p6637_p8), %s6598_s19, 16, %s5897_s2, [#allocation25]  }
 0x16b   : > { %s4080_s9 = sshll.u32 %s5348_s28, 10  ;;  %s1009_s26 = scalar_lea.vmem [#allocation6], %s3918_s5 }
 0x16c   : > { %s1016_s25 = sshll.u32 %s1009_s26, 4  ;;  %s1006_s13 = scalar_lea.sflag [#allocation7], %s5773_s4  ;;  %s5933_s25 = int_to_ptr.vmem [resolvable:$true] %s1016_s25 }
 0x16d   : > { %p6641_p9 = scmp.ne.s32.totalorder %s6632_s18, 0 }
 0x16f   : > { %s5931_s15 = scalar_lea.hbm %s6640_s3, %s4080_s9  ;;  %s5063_s10 = scalar_lea.hbm %s6640_s3, 2048 }
 0x170   : > { %s5058_s1 = scalar_lea.hbm %s5931_s15, 1024  ;;  %p5064_p8 = scmp.lt.u32.totalorder %s5931_s15, %s6640_s3 }
 0x171   : > { %p5059_p13 = scmp.ne.s32.totalorder %s5931_s15, %s5058_s1  ;;  %p5065_p6 = scmp.lt.u32.totalorder %s5063_s10, %s5058_s1 }
 0x172   : > { %p5067_p7 = scmp.lt.u32.totalorder %s5058_s1, %s5931_s15 }
 0x173   : > { %p5061_p11 = pnand %p5059_p13, %p6641_p9  ;;  %p5066_p10 = por %p5065_p6, %p5064_p8 }
 0x175   : > { %p5062_p0 = pneg %p5061_p11  ;;  %p5068_p1 = por %p5067_p7, %p5066_p10 }
 0x177   : > { %p5069_p3 = pnand %p5068_p1, %p5062_p0 }
 0x179   : > { %5072 = shalt.err (!%p5069_p3)
}
 0x17a   : > { %s5073_s2 = scalar_lea.vmem %s5933_s25, 1024  ;;  %s5405_s5 = smov [#allocation6]  }
 0x17b   : > { %p5074_p2 = scmp.ne.s32.totalorder %s5933_s25, %s5073_s2  ;;  %s5078_s9 = sshll.u32 %s5405_s5, 4  ;;  %s5079_s9 = int_to_ptr.vmem [resolvable:$false] %s5078_s9 }
 0x17c   : > { %s5080_s26 = scalar_lea.vmem %s5079_s9, 2048  ;;  %p5081_p5 = scmp.lt.s32.totalorder %s5933_s25, %s5079_s9 }
 0x17d   : > { %p5076_p4 = pnand %p5074_p2, %p6641_p9  ;;  %p5082_p13 = scmp.lt.s32.totalorder %s5080_s26, %s5073_s2 }
 0x17f   : > { %p5077_p12 = pneg %p5076_p4  ;;  %p5083_p11 = por %p5082_p13, %p5081_p5 }
 0x181   : > { %p5084_p8 = pnand %p5083_p11, %p5077_p12 }
 0x183   : > { %5087 = shalt.err (!%p5084_p8)
}
 0x184   : > { %p6642_p0 = scmp.ne.s32.totalorder %s6631_s16, 0  ;;  %s5088_s10 = scalar_lea.hbm %s5828_s8, 2048 }
 0x185   : > { %p5089_p6 = scmp.ne.s32.totalorder %s5828_s8, %s5088_s10  ;;  %s5093_s1 = scalar_lea.hbm %s6599_s6, 4096 }
 0x186   : > { %4422 = dma.hbm_to_vmem [thread:$0]  (!%p6642_p0), %s5931_s15, 1024, %s5933_s25, %s1006_s13, %s6639_s17, %s6639_s17, %s6638_s0  }
 0x187   : > { %p5091_p10 = pnand %p5089_p6, %p6641_p9  ;;  %p5094_p1 = scmp.lt.u32.totalorder %s5828_s8, %s6599_s6 }
 0x188   : > { %p5095_p3 = scmp.lt.u32.totalorder %s5093_s1, %s5088_s10  ;;  %p5097_p4 = scmp.lt.u32.totalorder %s5088_s10, %s5828_s8 }
 0x189   : > { %p5092_p7 = pneg %p5091_p10 }
 0x18a   : > { %p5096_p2 = por %p5095_p3, %p5094_p1 }
 0x18c   : > { %p5098_p12 = por %p5097_p4, %p5096_p2 }
 0x18e   : > { %p5099_p5 = pnand %p5098_p12, %p5092_p7 }
 0x190   : > { %5102 = shalt.err (!%p5099_p5)
}
 0x191   : > { %s5103_s2 = scalar_lea.vmem %s5832_s24, 2048  ;;  %s5406_s15 = smov [#allocation11]  }
 0x192   : > { %p5104_p13 = scmp.ne.s32.totalorder %s5832_s24, %s5103_s2  ;;  %s5108_s25 = sshll.u32 %s5406_s15, 4  ;;  %s5109_s25 = int_to_ptr.vmem [resolvable:$false] %s5108_s25 }
 0x193   : > { %s5110_s13 = scalar_lea.vmem %s5109_s25, 4096  ;;  %p5111_p6 = scmp.lt.s32.totalorder %s5832_s24, %s5109_s25 }
 0x194   : > { %p5106_p11 = pnand %p5104_p13, %p6641_p9  ;;  %p5112_p10 = scmp.lt.s32.totalorder %s5110_s13, %s5103_s2 }
 0x196   : > { %p5107_p8 = pneg %p5106_p11  ;;  %p5113_p1 = por %p5112_p10, %p5111_p6 }
 0x198   : > { %p5114_p3 = pnand %p5113_p1, %p5107_p8 }
 0x19a   : > { %5117 = shalt.err (!%p5114_p3)
}
 0x19b   : > { %4428 = dma.hbm_to_vmem [thread:$0]  (!%p6642_p0), %s5828_s8, 2048, %s5832_s24, %s5799_s11, %s6639_s17, %s6639_s17, %s6638_s0  }
 0x19c   : > { %s1119_s5 = scalar_lea.vmem [#allocation14], %s5773_s4  ;;  %s5118_s26 = scalar_lea.hbm %s5842_s14, 16 }
 0x19d   : > { %s1126_s9 = sshll.u32 %s1119_s5, 4  ;;  %p5119_p7 = scmp.ne.s32.totalorder %s5842_s14, %s5118_s26  ;;  %s1127_s9 = int_to_ptr.vmem [resolvable:$true] %s1126_s9 }
 0x19e   : > { %s5123_s10 = scalar_lea.hbm %s6595_s27, 32  ;;  %p5124_p12 = scmp.lt.u32.totalorder %s5842_s14, %s6595_s27 }
 0x19f   : > { %p5121_p2 = pnand %p5119_p7, %p6641_p9  ;;  %p5125_p5 = scmp.lt.u32.totalorder %s5123_s10, %s5118_s26 }
 0x1a0   : > { %p5127_p11 = scmp.lt.u32.totalorder %s5118_s26, %s5842_s14 }
 0x1a1   : > { %p5122_p4 = pneg %p5121_p2  ;;  %p5126_p13 = por %p5125_p5, %p5124_p12 }
 0x1a3   : > { %p5128_p8 = por %p5127_p11, %p5126_p13 }
 0x1a5   : > { %p5129_p6 = pnand %p5128_p8, %p5122_p4 }
 0x1a7   : > { %5132 = shalt.err (!%p5129_p6)
}
 0x1a8   : > { %s5133_s1 = scalar_lea.vmem %s1127_s9, 16  ;;  %s5407_s24 = smov [#allocation14]  }
 0x1a9   : > { %p5134_p10 = scmp.ne.s32.totalorder %s1127_s9, %s5133_s1  ;;  %s5138_s4 = sshll.u32 %s5407_s24, 4  ;;  %s5139_s4 = int_to_ptr.vmem [resolvable:$false] %s5138_s4 }
 0x1aa   : > { %s5140_s11 = scalar_lea.vmem %s5139_s4, 32  ;;  %p5141_p7 = scmp.lt.s32.totalorder %s1127_s9, %s5139_s4 }
 0x1ab   : > { %p5136_p1 = pnand %p5134_p10, %p6641_p9  ;;  %p5142_p2 = scmp.lt.s32.totalorder %s5140_s11, %s5133_s1 }
 0x1ad   : > { %p5137_p3 = pneg %p5136_p1  ;;  %p5143_p0 = por %p5142_p2, %p5141_p7 }
 0x1af   : > { %p5144_p5 = pnand %p5143_p0, %p5137_p3 }
 0x1b1   : > { %5147 = shalt.err (!%p5144_p5)
}
 0x1b2   : > { %p6643_p12 = scmp.ne.s32.totalorder %s6631_s16, 0  ;;  %s6644_s8 = sld [smem:[#allocation80_spill]] }
 0x1b4   : > { %4434 = dma.hbm_to_vmem [thread:$0]  (!%p6643_p12), %s5842_s14, 16, %s1127_s9, %s5846_s22  }
 0x1b8   : > { %p6645_p4 = scmp.ne.s32.totalorder %s6644_s8, 0 }
 0x1b9   : > { %s5997_s18 = sand.u32 (!%p6645_p4), 1, %s5332_s29   ;;  %p6646_p9 = scmp.ne.s32.totalorder (!%p6645_p4), %s6623_s12, 0 }
 0x1ba   : > { %1135 = sbr.rel (%p6645_p4) target bundleno = 5410 (0x1522), region = 132  ;;  %s3930_s0 = sshll.u32 (!%p6645_p4), %s5997_s18, 6 }
 0x1bb   : > { %s1138_s17 = scalar_lea.sflag (!%p6645_p4), [#allocation7], %s5997_s18  ;;  %s6001_s2 = scalar_lea.vmem (!%p6645_p4), [#allocation6], %s3930_s0 }
 0x1c1   : > { %5279 = dma.done.wait (%p6646_p9), %s1138_s17, 1024  }
 0x1c2   : > { %5281 = vsyncadd (%p6646_p9), %s1138_s17, 4294966272  ;;  %s6008_s16 = sand.u32 1, %s5644_s7   ;;  %s3931_s14 = sshll.u32 %s5997_s18, 7 }
 0x1c3   : > { %s1147_s22 = scalar_lea.sflag [#allocation10], %s6008_s16  ;;  %s6012_s15 = scalar_lea.vmem [#allocation9], %s3931_s14 }
 0x1c4   : > { %5283 = dma.done.wait (%p6646_p9), %s1147_s22, 4096  }
 0x1c5   : > { %5285 = vsyncadd (%p6646_p9), %s1147_s22, 4294963200  ;;  %s6018_s25 = scalar_lea.vmem [#allocation11], %s3931_s14  ;;  %s1165_s13 = scalar_lea.sflag [#allocation13], %s6008_s16 }
 0x1c6   : > { %5287 = dma.done.wait (%p6646_p9), %s1165_s13, 32  }
 0x1c7   : > { %5289 = vsyncadd (%p6646_p9), %s1165_s13, 4294967264  ;;  %p6647_p0 = scmp.eq.s32.totalorder %s5644_s7, 0 }
 0x1c9   : > { %5291 = dma.done.wait (%p6647_p0), [#allocation16], 2048   ;;  %p6648_p13 = pmov %p6647_p0 }
 0x1ca   : > { %p6649_p11 = pmov %p6647_p0 }
 0x1cb   : > { %5293 = vsyncadd (%p6648_p13), [#allocation16], 4294965248 }
 0x1cc   : > { %5295 = dma.done.wait (%p6649_p11), [#allocation19], 32   ;;  %p6650_p8 = pmov %p6647_p0 }
 0x1cd   : > { %p6651_p6 = pmov %p6647_p0 }
 0x1ce   : > { %5297 = vsyncadd (%p6650_p8), [#allocation19], 4294967264 }
 0x1cf   : > { %5299 = dma.done.wait (%p6651_p6), [#allocation22], 1040   ;;  %p6652_p10 = pmov %p6647_p0 }
 0x1d0   : > { %p6653_p1 = pmov %p6647_p0 }
 0x1d1   : > { %5301 = vsyncadd (%p6652_p10), [#allocation22], 4294966256 }
 0x1d2   : > { %5303 = dma.done.wait (%p6653_p1), [#allocation25], 16   ;;  %p6654_p3 = pmov %p6647_p0 }
 0x1d3   : > { %s6655_s12 = sld [smem:[#allocation72_spill]]  ;;  %s6656_s26 = sld [smem:[#allocation77_spill]] }
 0x1d4   : > { %5305 = vsyncadd (%p6654_p3), [#allocation25], 4294967280  ;;  %s6657_s10 = sld [smem:[#allocation76_spill]]  ;;  %s6658_s1 = sld [smem:[#allocation40_spill]] }
 0x1d5   : > { %s6660_s4 = sld [smem:[#allocation47_spill]]  ;;  %s6661_s11 = sld [smem:[#allocation48_spill]] }
 0x1d6   : > { %s6662_s8 = sld [smem:[#allocation44_spill]]  ;;  %s6663_s17 = sld [smem:[#allocation49_spill]] }
 0x1d7   : > { %s6664_s22 = sld [smem:[#allocation45_spill]]  ;;  %s6665_s7 = sld [smem:[#allocation51_spill]] }
 0x1d8   : > { %s6666_s13 = sld [smem:[#allocation53_spill]] }
 0x1d9   : > { %s6044_s0 = sand.u32 1, %s6655_s12   ;;  %s3940_s14 = sshll.u32 %s6656_s26, 1 }
 0x1da   : > { %p1339_p7 = scmp.lt.s32.totalorder %s3940_s14, 3  ;;  %p1344_p2 = scmp.lt.s32.totalorder %s6656_s26, 1 }
 0x1db   : > { %p1347_p5 = scmp.lt.s32.totalorder %s6657_s10, 1  ;;  %s1325_s3 = scalar_lea.vmem [#allocation26], %s6044_s0 }
 0x1dc   : > { %s6713_s14 = smov (!%p1339_p7, %s3940_s14), 3  ;;  %s6715_s26 = smov (!%p1344_p2, %s6656_s26), 1 }
 0x1dd   : > { %s3941_s9 = sshll.u32 %s6713_s14, 3  ;;  %s1331_s28 = scalar_lea.vmem [#allocation27], %s6044_s0 }
 0x1de   : > { %s1342_s5 = scalar_lea.vmem %s6658_s1, %s3941_s9  ;;  %s1337_s29 = scalar_lea.vmem [#allocation29], %s6044_s0 }
 0x1df   : > { %s6056_s12 = scalar_select %p1347_p5, %s6657_s10, 1 }
 0x1e0   : > { %p3944_p12 = scmp.ne.s32.totalorder %s6657_s10, 0 }
 0x1e1   : > { %s4351_s6 = smul.u32 192, %s6056_s12  ;;  %s1358_s19 = scalar_lea.vmem %s6660_s4, %s6056_s12  ;;  %v1377_v0 = vld [vmem:[%s1342_s5] sm:$0xff] (!%p3944_p12)  ;;  %v1378_v1 = vld [vmem:[%s1342_s5 + $0x8] sm:$0xff] (!%p3944_p12) }
 0x1e2   : > { %s4352_s20 = smul.u32 3, %s6056_s12  ;;  %s1361_s23 = scalar_lea.vmem %s6661_s11, %s6056_s12  ;;  %1381 = vadd.xlane.f32.xlu0 (!%p3944_p12), %v1377_v0 }
 0x1e3   : > { %s6065_s27 = scalar_lea.vmem %s6662_s8, %s4351_s6  ;;  %s1364_s30 = scalar_lea.vmem %s6663_s17, %s6056_s12 }
 0x1e4   : > { %s6070_s14 = scalar_lea.vmem %s6664_s22, %s4352_s20  ;;  %s3943_s9 = sshll.u32 %s6056_s12, 1 }
 0x1e5   : > { %s6074_s1 = scalar_lea.vmem %s6665_s7, %s3943_s9  ;;  %s1371_s24 = scalar_lea.vmem %s6666_s13, %s6056_s12 }
 0x1e6   : > { %1376 = sbr.rel (%p3944_p12) target bundleno = 798 (0x31e), region = 184  ;;  %1383 = vadd.xlane.f32.xlu0 (!%p3944_p12), %v1378_v1  ;;  %s6667_s6 = sld [smem:[#allocation42_spill]] (!%p3944_p12) }
 0x1e7   : > { %s6668_s20 = sld [smem:[#allocation43_spill]] (!%p3944_p12) }
 0x1ec   : > { %v3945_v17 = vld [vmem:[%s6667_s6] ss:$0 sm:$0xff] (!%p3944_p12) }
 0x1ed   : > { %v3946_v19 = vld [vmem:[%s6668_s20] ss:$0 sm:$0xff] }
 0x26f   : > { %v1382_v2 = vpop.xlane.xlu0 %1381 }
 0x270   : > { %v1386_v3 = vmul.f32 0.0078125, %v1382_v2 }
 0x272   : > { %v1388_v4 = vsub.f32 %v1377_v0, %v1386_v3 }
 0x273   : > { %v1384_v5 = vpop.xlane.xlu0 %1383 }
 0x274   : > { %v1387_v6 = vmul.f32 0.0078125, %v1384_v5  ;;  %v1390_v7 = vmul.f32 %v1388_v4, %v1388_v4 }
 0x276   : > { %v1389_v8 = vsub.f32 %v1378_v1, %v1387_v6  ;;  %1392 = vadd.xlane.f32.xlu1 %v1390_v7 }
 0x278   : > { %v1391_v9 = vmul.f32 %v1389_v8, %v1389_v8 }
 0x27a   : > { %1394 = vadd.xlane.f32.xlu1 %v1391_v9 }
 0x303   : > { %v1393_v10 = vpop.xlane.xlu1 %1392 }
 0x304   : > { %v1396_v11 = vmul.f32 0.0078125, %v1393_v10 }
 0x306   : > { %v1398_v12 = vadd.f32 1e-05, %v1396_v11 }
 0x307   : > { %v1395_v13 = vpop.xlane.xlu1 %1394 }
 0x308   : > { %4602 = vrsqrt.f32 %v1398_v12  ;;  %v1397_v14 = vmul.f32 0.0078125, %v1395_v13 }
 0x30a   : > { %v1399_v15 = vadd.f32 1e-05, %v1397_v14 }
 0x30c   : > { %4604 = vrsqrt.f32 %v1399_v15 }
 0x312   : > { %v4603_v16 = vpop.eup %4602 }
 0x313   : > { %v1402_v18 = vmul.f32 %v4603_v16, %v1388_v4 }
 0x315   : > { %v1410_v20 = vmul.f32 %v3945_v17, %v1402_v18 }
 0x316   : > { %v4605_v21 = vpop.eup %4604 }
 0x317   : > { %v1418_v22 = vadd.f32 %v3946_v19, %v1410_v20  ;;  %v1403_v23 = vmul.f32 %v4605_v21, %v1389_v8 }
 0x319   : > { %1420 = vst [vmem:[#allocation2] sm:$0xff] %v1418_v22  ;;  %v1411_v24 = vmul.f32 %v3945_v17, %v1403_v23 }
 0x31b   : > { %v1419_v25 = vadd.f32 %v3946_v19, %v1411_v24 }
 0x31d   : > { %1421 = vst [vmem:[#allocation2 + $0x8] sm:$0xff] %v1419_v25 }
 0x31e PF: > { %v4606_v26 = vld [vmem:[%s6065_s27 + $0x4] ss:$12 sps:$4 sm:$0xff]   ;;  %v4608_v27 = vld [vmem:[%s6065_s27] ss:$12 sps:$4 sm:$0xff]   ;;  %v5408_v28 = vmov 0   ;;  %v5409_v46 = vmov 0.0   ;;  %v1459_v47 = vlaneseq }
 0x31f   : > { %1634 = vmatprep.mubr.bf16.mxu0 %v5408_v28  ;;  %1602 = vmatprep.subr.bf16.mxu0 %v4606_v26  ;;  %v4609_v29 = vld [vmem:[%s6065_s27 + $0x1c] ss:$12 sps:$4 sm:$0xff]   ;;  %v4611_v30 = vld [vmem:[%s6065_s27 + $0x18] ss:$12 sps:$4 sm:$0xff]   ;;  %v4612_v31 = vld [vmem:[%s6065_s27 + $0x34] ss:$12 sps:$4 sm:$0xff]  }
 0x320   : > { %1603 = vmatpush1.bf16.msra.mxu0 %v4608_v27  ;;  %v4614_v32 = vld [vmem:[%s6065_s27 + $0x30] ss:$12 sps:$4 sm:$0xff]   ;;  %v4615_v33 = vld [vmem:[%s6065_s27 + $0x4c] ss:$12 sps:$4 sm:$0xff]   ;;  %v4617_v34 = vld [vmem:[%s6065_s27 + $0x48] ss:$12 sps:$4 sm:$0xff]   ;;  %4191 = vmatprep.subr.bf16.mxu1 %v5409_v46 }
 0x321   : > { %1604 = vmatprep.subr.bf16.mxu0 %v4609_v29  ;;  %v4618_v35 = vld [vmem:[%s6065_s27 + $0x64] ss:$12 sps:$4 sm:$0xff]   ;;  %v4620_v36 = vld [vmem:[%s6065_s27 + $0x60] ss:$12 sps:$4 sm:$0xff]   ;;  %v4621_v37 = vld [vmem:[%s6065_s27 + $0x7c] ss:$12 sps:$4 sm:$0xff]  }
 0x322   : > { %v4623_v38 = vld [vmem:[%s6065_s27 + $0x78] ss:$12 sps:$4 sm:$0xff]   ;;  %v4624_v39 = vld [vmem:[%s6065_s27 + $0x94] ss:$12 sps:$4 sm:$0xff]   ;;  %v4626_v40 = vld [vmem:[%s6065_s27 + $0x90] ss:$12 sps:$4 sm:$0xff]  }
 0x323   : > { %v4627_v41 = vld [vmem:[%s6065_s27 + $0xac] ss:$12 sps:$4 sm:$0xff]   ;;  %v4629_v42 = vld [vmem:[%s6065_s27 + $0xa8] ss:$12 sps:$4 sm:$0xff]   ;;  %v6101_v43 = vld [vmem:[#allocation2] sm:$0xff]  ;;  %vm5410_vm0 = vmmov 0  }
 0x324   : > { %1605 = vmatpush1.bf16.msra.mxu0 %v4611_v30  ;;  %v6103_v44 = vld [vmem:[#allocation2 + $0x8] sm:$0xff]  ;;  %4207 = vmatprep.mubr.msk.bf16.mxu1 %vm5410_vm0, %v5409_v46  ;;  %v6116_v48 = vshrl.u32 %v1459_v47, 7  ;;  %v6120_v50 = vld [vmem:[%s6070_s14] sm:$0x7]  ;;  %vm1696_vm1 = vcmask 261120   ;;  %s5411_s5 = smov 96  }
 0x325   : > { %1606 = vmatprep.subr.bf16.mxu0 %v4612_v31  ;;  %v6107_v45 = vpack.c.bf16 %v6103_v44, %v6101_v43  ;;  %v4630_v1 = vld [vmem:[%s6065_s27 + $0x8] ss:$12 sps:$4 sm:$0xff]   ;;  %v4631_v2 = vld [vmem:[%s6065_s27 + $0x20] ss:$12 sps:$4 sm:$0xff]   ;;  %v4632_v3 = vld [vmem:[%s6065_s27 + $0x38] ss:$12 sps:$4 sm:$0xff]  }
 0x326   : > { %v1461_v49 = vsub.s32 0, %v6116_v48  ;;  %v1465_v51 = vsub.s32 1, %v6116_v48  ;;  %4192 = vmatpush3.bf16.msra.mxu1 %v4630_v1  ;;  %v4633_v4 = vld [vmem:[%s6065_s27 + $0x50] ss:$12 sps:$4 sm:$0xff]   ;;  %v4634_v5 = vld [vmem:[%s6065_s27 + $0x68] ss:$12 sps:$4 sm:$0xff]  }
 0x327   : > { %4193 = vmatprep.subr.bf16.mxu1 %v5409_v46  ;;  %v4635_v8 = vld [vmem:[%s6065_s27 + $0x80] ss:$12 sps:$4 sm:$0xff]   ;;  %s6669_s10 = sld [smem:[#allocation41_spill]]  ;;  %v4636_v9 = vld [vmem:[%s6065_s27 + $0x98] ss:$12 sps:$4 sm:$0xff]   ;;  %vm1744_vm2 = vcmask 130048  }
 0x328   : > { %1607 = vmatpush1.bf16.msra.mxu0 %v4614_v32  ;;  %v1462_v52 = vrot.slane %v6120_v50, %v1461_v49  ;;  %v1466_v54 = vrot.slane %v6120_v50, %v1465_v51  ;;  %v4637_v11 = vld [vmem:[%s6065_s27 + $0xb0] ss:$12 sps:$4 sm:$0xff]   ;;  %s5412_s27 = smov 64  }
 0x329   : > { %1608 = vmatprep.subr.bf16.mxu0 %v4615_v33 }
 0x32a   : > { %4194 = vmatpush3.bf16.msra.mxu1 %v4631_v2 }
 0x32b   : > { %4195 = vmatprep.subr.bf16.mxu1 %v5409_v46 }
 0x32c   : > { %1609 = vmatpush1.bf16.msra.mxu0 %v4617_v34 }
 0x32d   : > { %1610 = vmatprep.subr.bf16.mxu0 %v4618_v35  ;;  %s6670_s4 = scalar_lea.vmem %s6669_s10, %s6715_s26  ;;  %s5413_s26 = smov 32  }
 0x32e   : > { %4196 = vmatpush3.bf16.msra.mxu1 %v4632_v3  ;;  %v6171_v12 = vld [vmem:[%s6670_s4] ss:$0 sm:$0xff] }
 0x32f   : > { %4197 = vmatprep.subr.bf16.mxu1 %v5409_v46 }
 0x330   : > { %1611 = vmatpush1.bf16.msra.mxu0 %v4620_v36  ;;  %v1469_v36 = vsub.s32 2, %v6116_v48 }
 0x331   : > { %1612 = vmatprep.subr.bf16.mxu0 %v4621_v37 }
 0x332   : > { %4198 = vmatpush3.bf16.msra.mxu1 %v4633_v4 }
 0x333   : > { %4199 = vmatprep.subr.bf16.mxu1 %v5409_v46 }
 0x334   : > { %1613 = vmatpush1.bf16.msra.mxu0 %v4623_v38 }
 0x335   : > { %1614 = vmatprep.subr.bf16.mxu0 %v4624_v39  ;;  %v1470_v39 = vrot.slane %v6120_v50, %v1469_v36 }
 0x336   : > { %4200 = vmatpush3.bf16.msra.mxu1 %v4634_v5 }
 0x337   : > { %4201 = vmatprep.subr.bf16.mxu1 %v5409_v46 }
 0x338   : > { %1615 = vmatpush1.bf16.msra.mxu0 %v4626_v40 }
 0x339   : > { %1616 = vmatprep.subr.bf16.mxu0 %v4627_v41 }
 0x33a   : > { %4202 = vmatpush3.bf16.msra.mxu1 %v4635_v8 }
 0x33b   : > { %4203 = vmatprep.subr.bf16.mxu1 %v5409_v46 }
 0x33c   : > { %1617 = vmatpush1.bf16.msra.mxu0 %v4629_v42 }
 0x33d   : > { %4211 = vmatprep.subr.bf16.mxu0 %v5409_v46 }
 0x33e   : > { %4204 = vmatpush3.bf16.msra.mxu1 %v4636_v9 }
 0x33f   : > { %1635 = vmatmul.mubr.bf16.vlgmr.msra.gmra.mrb[0].mxu0 %v6107_v45  ;;  %4205 = vmatprep.subr.bf16.mxu1 %v5409_v46 }
 0x340   : > { %4213 = vmatprep.mubr.msk.bf16.mxu0 %vm5410_vm0, %v5409_v46 }
 0x342   : > { %4206 = vmatpush3.bf16.msra.mxu1 %v4637_v11  ;;  %v4641_v11 = vld [vmem:[%s6001_s2 + $0x18] sm:$0xff]  }
 0x343   : > { %4217 = vmatprep.subr.bf16.mxu1 %v5409_v46 }
 0x345   : > { %4208 = vmatmul.mubr.bf16.vlgmr.msra.gmra.mrb[0].mxu1 %v6107_v45 }
 0x346   : > { %4219 = vmatprep.mubr.msk.bf16.mxu1 %vm5410_vm0, %v5409_v46 }
 0x412   : > { %v1636_v53 = vpop.f32.mrb[0].mxu0 }
 0x413   : > { %v1638_v55 = vpop.f32.mrb[1].mxu0  ;;  %v1637_v57 = vadd.f32 %v1636_v53, %v1462_v52 }
 0x414   : > { %v1640_v56 = vpop.f32.mrb[2].mxu0  ;;  %v1639_v60 = vadd.f32 %v1638_v55, %v1466_v54 }
 0x415   : > { %v1641_v58 = vadd.f32 %v1640_v56, %v1462_v52  ;;  %v1642_v59 = vpop.f32.mrb[3].mxu0 }
 0x416   : > { %v1643_v61 = vadd.f32 %v1642_v59, %v1466_v54 }
 0x417   : > { %v6129_v62 = vpack.c.bf16 %v1641_v58, %v1637_v57 }
 0x418   : > { %v6131_v63 = vpack.c.bf16 %v1643_v61, %v1639_v60  ;;  %v1679_v37 = vpop.f32.mrb[0].mxu1 }
 0x419   : > { %v4209_v38 = vpop.f32.mrb[1].mxu1  ;;  %v1680_v42 = vadd.f32 %v1679_v37, %v1470_v39 }
 0x41a   : > { %1821 = vrot.lane.b32.xlu0 %v6131_v63, %s5411_s5  ;;  %v1701_v0 = vsel %vm1696_vm1, %v6131_v63, 0  ;;  %v1682_v40 = vpop.f32.mrb[2].mxu1 }
 0x41b   : > { %4212 = vmatpush3.bf16.xpose.msra.mxu0 %v1701_v0  ;;  %v4210_v41 = vpop.f32.mrb[3].mxu1  ;;  %v1683_v45 = vadd.f32 %v1682_v40, %v1470_v39 }
 0x41c   : > { %4223 = vmatprep.subr.bf16.mxu0 %v5409_v46 }
 0x41d   : > { %v6185_v47 = vpack.c.bf16 %v1683_v45, %v1680_v42 }
 0x41e   : > { %1818 = vrot.lane.b32.xlu0 %v6129_v62, %s5411_s5 }
 0x41f   : > { %4218 = vmatpush3.bf16.msra.mxu1 %v6185_v47 }
 0x420   : > { %4229 = vmatprep.subr.bf16.mxu1 %v5409_v46 }
 0x422   : > { %4214 = vmatmul.mubr.msk.bf16.vlgmr.msra.gmra.mrb[4].mxu0 %vm1696_vm1, %v6129_v62 }
 0x423   : > { %4225 = vmatprep.mubr.msk.bf16.mxu0 %vm5410_vm0, %v5409_v46 }
 0x48c   : > { %v1822_v6 = vpop.permute.xlu0 %1821 }
 0x48d   : > { %v1827_v7 = vsel %vm1696_vm1, %v1822_v6, 0 }
 0x48e   : > { %4224 = vmatpush3.bf16.xpose.msra.mxu0 %v1827_v7 }
 0x48f   : > { %4235 = vmatprep.subr.bf16.mxu0 %v5409_v46 }
 0x490   : > { %v1819_v10 = vpop.permute.xlu0 %1818 }
 0x495   : > { %4226 = vmatmul.mubr.msk.bf16.vlgmr.msra.gmra.mrb[8].mxu0 %vm1696_vm1, %v1819_v10  ;;  %v4640_v10 = vld [vmem:[%s6001_s2 + $0x10] sm:$0xff]  }
 0x496   : > { %4239 = vmatprep.mubr.msk.bf16.mxu0 %vm5410_vm0, %v5409_v46  ;;  %4236 = vmatpush3.bf16.msra.mxu0 %v4640_v10 }
 0x497   : > { %4237 = vmatprep.subr.bf16.mxu0 %v5409_v46 }
 0x49a   : > { %4238 = vmatpush3.bf16.msra.mxu0 %v4641_v11  ;;  %v4642_v11 = vld [vmem:[%s6001_s2 + $0x20] sm:$0xff]  }
 0x49b   : > { %4251 = vmatprep.subr.bf16.mxu0 %v5409_v46 }
 0x4f5   : > { %v1737_v13 = vpop.f32.mrb[4].mxu0 }
 0x4f6   : > { %v1738_v14 = vadd.f32 %v6171_v12, %v1737_v13  ;;  %v4215_v15 = vpop.f32.mrb[5].mxu0 }
 0x4f7   : > { %v1740_v16 = vpop.f32.mrb[6].mxu0 }
 0x4f8   : > { %v1741_v17 = vadd.f32 %v6171_v12, %v1740_v16  ;;  %v4216_v18 = vpop.f32.mrb[7].mxu0  ;;  %v1745_v19 = vsel %vm1744_vm2, %v1738_v14, -inf }
 0x4f9   : > { %1746 = vmax.xlane.f32.xlu1 %v1745_v19 }
 0x4fa   : > { %v1748_v20 = vsel %vm1744_vm2, %v1741_v17, -inf }
 0x4fd   : > { %1749 = vmax.xlane.f32.xlu1 %v1748_v20  ;;  %v4638_v20 = vld [vmem:[%s6001_s2] sm:$0xff]  }
 0x568   : > { %v1863_v21 = vpop.f32.mrb[8].mxu0 }
 0x569   : > { %v1864_v22 = vadd.f32 %v6171_v12, %v1863_v21  ;;  %v4227_v23 = vpop.f32.mrb[9].mxu0 }
 0x56a   : > { %v1866_v24 = vpop.f32.mrb[10].mxu0 }
 0x56b   : > { %v1867_v25 = vadd.f32 %v6171_v12, %v1866_v24  ;;  %v4228_v26 = vpop.f32.mrb[11].mxu0  ;;  %v1870_v27 = vsel %vm1744_vm2, %v1864_v22, -inf }
 0x56c   : > { %1871 = vmax.xlane.f32.xlu0 %v1870_v27 }
 0x56d   : > { %v1873_v29 = vsel %vm1744_vm2, %v1867_v25, -inf }
 0x56e   : > { %1874 = vmax.xlane.f32.xlu1 %v1873_v29 }
 0x582   : > { %2060 = vrot.lane.b32.xlu0 %v6131_v63, %s5412_s27 }
 0x586   : > { %v1747_v30 = vpop.xlane.xlu1 %1746 }
 0x587   : > { %v1751_v31 = vsub.f32 %v1738_v14, %v1747_v30 }
 0x589   : > { %v1753_v32 = vmul.f32 1.442695, %v1751_v31 }
 0x58a   : > { %v1750_v33 = vpop.xlane.xlu1 %1749 }
 0x58b   : > { %4686 = vpow2.f32 %v1753_v32  ;;  %v1752_v34 = vsub.f32 %v1741_v17, %v1750_v33 }
 0x58d   : > { %v1755_v35 = vmul.f32 1.442695, %v1752_v34 }
 0x58f   : > { %4688 = vpow2.f32 %v1755_v35 }
 0x595   : > { %v4687_v52 = vpop.eup %4686 }
 0x596   : > { %v1757_v53 = vsel %vm1744_vm2, %v4687_v52, 0.0 }
 0x597   : > { %1758 = vadd.xlane.f32.xlu1 %v1757_v53 }
 0x599   : > { %v4689_v54 = vpop.eup %4688 }
 0x59a   : > { %v1760_v55 = vsel %vm1744_vm2, %v4689_v54, 0.0 }
 0x59b   : > { %1761 = vadd.xlane.f32.xlu1 %v1760_v55 }
 0x5f9   : > { %v1872_v56 = vpop.xlane.xlu0 %1871 }
 0x5fa   : > { %v1876_v50 = vsub.f32 %v1864_v22, %v1872_v56  ;;  %v4639_v22 = vld [vmem:[%s6001_s2 + $0x8] sm:$0xff]  }
 0x5fb   : > { %v1875_v57 = vpop.xlane.xlu1 %1874 }
 0x5fc   : > { %v1878_v58 = vmul.f32 1.442695, %v1876_v50  ;;  %v1877_v59 = vsub.f32 %v1867_v25, %v1875_v57 }
 0x5fd   : > { %v2061_v31 = vpop.permute.xlu0 %2060 }
 0x5fe   : > { %4690 = vpow2.f32 %v1878_v58  ;;  %v1880_v60 = vmul.f32 1.442695, %v1877_v59  ;;  %v2066_v35 = vsel %vm1696_vm1, %v2061_v31, 0 }
 0x600   : > { %4692 = vpow2.f32 %v1880_v60 }
 0x608   : > { %v4691_v61 = vpop.eup %4690 }
 0x609   : > { %v1882_v0 = vsel %vm1744_vm2, %v4691_v61, 0.0 }
 0x60a   : > { %v4693_v1 = vpop.eup %4692  ;;  %1883 = vadd.xlane.f32.xlu1 %v1882_v0 }
 0x60b   : > { %v1885_v2 = vsel %vm1744_vm2, %v4693_v1, 0.0 }
 0x60e   : > { %1886 = vadd.xlane.f32.xlu1 %v1885_v2 }
 0x61f   : > { %1894 = vrot.lane.b32.xlu1 %v6185_v47, %s5411_s5 }
 0x623   : > { %2058 = vrot.lane.b32.xlu1 %v6129_v62, %s5412_s27 }
 0x624   : > { %v1759_v3 = vpop.xlane.xlu1 %1758 }
 0x625   : > { %4694 = vrcp.f32 %v1759_v3 }
 0x628   : > { %v1762_v4 = vpop.xlane.xlu1 %1761 }
 0x629   : > { %4696 = vrcp.f32 %v1762_v4 }
 0x62f   : > { %v4695_v5 = vpop.eup %4694 }
 0x630   : > { %v1765_v7 = vmul.f32 %v4695_v5, %v4687_v52 }
 0x633   : > { %v4697_v6 = vpop.eup %4696 }
 0x634   : > { %v1766_v8 = vmul.f32 %v4697_v6, %v4689_v54 }
 0x636   : > { %v1767_v9 = vpack.c.bf16 %v1766_v8, %v1765_v7 }
 0x638   : > { %4220 = vmatmul.mubr.msk.bf16.vlgmr.msra.gmra.mrb[4].mxu1 %vm1744_vm2, %v1767_v9 }
 0x639   : > { %4231 = vmatprep.mubr.msk.bf16.mxu1 %vm5410_vm0, %v5409_v46 }
 0x697   : > { %v1884_v13 = vpop.xlane.xlu1 %1883 }
 0x698   : > { %4698 = vrcp.f32 %v1884_v13 }
 0x69b   : > { %v1887_v14 = vpop.xlane.xlu1 %1886 }
 0x69c   : > { %4700 = vrcp.f32 %v1887_v14 }
 0x69f   : > { %v1895_v15 = vpop.permute.xlu1 %1894 }
 0x6a0   : > { %4230 = vmatpush3.bf16.msra.mxu1 %v1895_v15 }
 0x6a1   : > { %4243 = vmatprep.subr.bf16.mxu1 %v5409_v46 }
 0x6a2   : > { %v4699_v16 = vpop.eup %4698 }
 0x6a3   : > { %v1890_v18 = vmul.f32 %v4699_v16, %v4691_v61  ;;  %v2059_v36 = vpop.permute.xlu1 %2058 }
 0x6a6   : > { %v4701_v17 = vpop.eup %4700 }
 0x6a7   : > { %v1891_v19 = vmul.f32 %v4701_v17, %v4693_v1 }
 0x6a9   : > { %v1892_v21 = vpack.c.bf16 %v1891_v19, %v1890_v18 }
 0x6ab   : > { %4232 = vmatmul.mubr.msk.bf16.vlgmr.msra.gmra.mrb[8].mxu1 %vm1744_vm2, %v1892_v21  ;;  %v4643_v21 = vld [vmem:[%s6001_s2 + $0x28] sm:$0xff]  }
 0x6ac   : > { %4244 = vmatpush3.bf16.msra.mxu1 %v4638_v20  ;;  %4247 = vmatprep.mubr.msk.bf16.mxu1 %vm5410_vm0, %v5409_v46 }
 0x6ad   : > { %4245 = vmatprep.subr.bf16.mxu1 %v5409_v46 }
 0x6b0   : > { %4246 = vmatpush3.bf16.msra.mxu1 %v4639_v22 }
 0x6b1   : > { %4257 = vmatprep.subr.bf16.mxu1 %v5409_v46 }
 0x70b   : > { %v1805_v23 = vpop.f32.mrb[4].mxu1 }
 0x70c   : > { %v4221_v24 = vpop.f32.mrb[5].mxu1 }
 0x70d   : > { %v1808_v25 = vpop.f32.mrb[6].mxu1 }
 0x70e   : > { %v1812_v26 = vpack.c.bf16 %v1808_v25, %v1805_v23  ;;  %v4222_v27 = vpop.f32.mrb[7].mxu1 }
 0x710   : > { %4248 = vmatmul.mubr.msk.bf16.vlgmr.msra.gmra.mrb[12].mxu1 %vm1696_vm1, %v1812_v26 }
 0x711   : > { %4259 = vmatprep.mubr.msk.bf16.mxu1 %vm5410_vm0, %v5409_v46 }
 0x77e   : > { %v1934_v29 = vpop.f32.mrb[8].mxu1 }
 0x77f   : > { %v4233_v30 = vpop.f32.mrb[9].mxu1 }
 0x780   : > { %v1937_v32 = vpop.f32.mrb[10].mxu1 }
 0x781   : > { %v1941_v33 = vpack.c.bf16 %v1937_v32, %v1934_v29  ;;  %v4234_v34 = vpop.f32.mrb[11].mxu1 }
 0x783   : > { %4240 = vmatmul.mubr.msk.bf16.vlgmr.msra.gmra.mrb[12].mxu0 %vm1696_vm1, %v1941_v33 }
 0x784   : > { %4252 = vmatpush3.bf16.xpose.msra.mxu0 %v2066_v35  ;;  %4253 = vmatprep.mubr.msk.bf16.mxu0 %vm5410_vm0, %v5409_v46 }
 0x785   : > { %4263 = vmatprep.subr.bf16.mxu0 %v5409_v46 }
 0x78b   : > { %4254 = vmatmul.mubr.msk.bf16.vlgmr.msra.gmra.mrb[16].mxu0 %vm1696_vm1, %v2059_v36 }
 0x78c   : > { %4267 = vmatprep.mubr.msk.bf16.mxu0 %vm5410_vm0, %v5409_v46  ;;  %4264 = vmatpush3.bf16.msra.mxu0 %v4642_v11 }
 0x78d   : > { %4265 = vmatprep.subr.bf16.mxu0 %v5409_v46 }
 0x790   : > { %4266 = vmatpush3.bf16.msra.mxu0 %v4643_v21  ;;  %v4649_v21 = vld [vmem:[%s6012_s15 + $0x10] ss:$8 sps:$4 sm:$0xff]  }
 0x791   : > { %4277 = vmatprep.subr.bf16.mxu0 %v5409_v46 }
 0x7e3   : > { %v2051_v37 = vpop.f32.mrb[12].mxu1 }
 0x7e4   : > { %v4249_v38 = vpop.f32.mrb[13].mxu1 }
 0x7e5   : > { %v2054_v39 = vpop.f32.mrb[14].mxu1 }
 0x7e6   : > { %v4250_v40 = vpop.f32.mrb[15].mxu1 }
 0x856   : > { %v1995_v41 = vpop.f32.mrb[12].mxu0 }
 0x857   : > { %v6223_v42 = vadd.f32 %v2051_v37, %v1995_v41  ;;  %v4241_v45 = vpop.f32.mrb[13].mxu0 }
 0x858   : > { %v1998_v52 = vpop.f32.mrb[14].mxu0 }
 0x859   : > { %v6225_v53 = vadd.f32 %v2054_v39, %v1998_v52  ;;  %v4242_v54 = vpop.f32.mrb[15].mxu0 }
 0x85e   : > { %v2102_v55 = vpop.f32.mrb[16].mxu0 }
 0x85f   : > { %v2103_v56 = vadd.f32 %v6171_v12, %v2102_v55  ;;  %v4255_v50 = vpop.f32.mrb[17].mxu0 }
 0x860   : > { %v2105_v57 = vpop.f32.mrb[18].mxu0 }
 0x861   : > { %v2106_v58 = vadd.f32 %v6171_v12, %v2105_v57  ;;  %v4256_v59 = vpop.f32.mrb[19].mxu0  ;;  %v2109_v60 = vsel %vm1744_vm2, %v2103_v56, -inf }
 0x862   : > { %2110 = vmax.xlane.f32.xlu1 %v2109_v60 }
 0x863   : > { %v2112_v61 = vsel %vm1744_vm2, %v2106_v58, -inf }
 0x864   : > { %2113 = vmax.xlane.f32.xlu0 %v2112_v61 }
 0x87a   : > { %2132 = vrot.lane.b32.xlu0 %v6185_v47, %s5412_s27 }
 0x8ef   : > { %v2111_v0 = vpop.xlane.xlu1 %2110 }
 0x8f0   : > { %v2115_v1 = vsub.f32 %v2103_v56, %v2111_v0 }
 0x8f1   : > { %v2114_v2 = vpop.xlane.xlu0 %2113 }
 0x8f2   : > { %v2117_v3 = vmul.f32 1.442695, %v2115_v1  ;;  %v2116_v4 = vsub.f32 %v2106_v58, %v2114_v2 }
 0x8f4   : > { %4702 = vpow2.f32 %v2117_v3  ;;  %v2119_v5 = vmul.f32 1.442695, %v2116_v4 }
 0x8f5   : > { %v2133_v6 = vpop.permute.xlu0 %2132 }
 0x8f6   : > { %4704 = vpow2.f32 %v2119_v5  ;;  %4258 = vmatpush3.bf16.msra.mxu1 %v2133_v6 }
 0x8f7   : > { %4271 = vmatprep.subr.bf16.mxu1 %v5409_v46 }
 0x8fe   : > { %v4703_v7 = vpop.eup %4702 }
 0x8ff   : > { %v2121_v8 = vsel %vm1744_vm2, %v4703_v7, 0.0 }
 0x900   : > { %v4705_v9 = vpop.eup %4704  ;;  %2122 = vadd.xlane.f32.xlu1 %v2121_v8 }
 0x901   : > { %v2124_v10 = vsel %vm1744_vm2, %v4705_v9, 0.0 }
 0x904   : > { %2125 = vadd.xlane.f32.xlu1 %v2124_v10 }
 0x915   : > { %2244 = vrot.lane.b32.xlu1 %v6131_v63, %s5413_s26 }
 0x919   : > { %2242 = vrot.lane.b32.xlu1 %v6129_v62, %s5413_s26 }
 0x98d   : > { %v2123_v13 = vpop.xlane.xlu1 %2122 }
 0x98e   : > { %4706 = vrcp.f32 %v2123_v13 }
 0x991   : > { %v2126_v14 = vpop.xlane.xlu1 %2125 }
 0x992   : > { %4708 = vrcp.f32 %v2126_v14  ;;  %v3992_v14 = vld [vmem:[%s1358_s19] ss:$0 sm:$0xff] }
 0x995   : > { %v2245_v19 = vpop.permute.xlu1 %2244 }
 0x996   : > { %v2250_v63 = vsel %vm1696_vm1, %v2245_v19, 0 }
 0x998   : > { %v4707_v15 = vpop.eup %4706 }
 0x999   : > { %v2129_v17 = vmul.f32 %v4707_v15, %v4703_v7  ;;  %v2243_v62 = vpop.permute.xlu1 %2242 }
 0x99c   : > { %v4709_v16 = vpop.eup %4708 }
 0x99d   : > { %v2130_v18 = vmul.f32 %v4709_v16, %v4705_v9 }
 0x99f   : > { %v2131_v20 = vpack.c.bf16 %v2130_v18, %v2129_v17 }
 0x9a1   : > { %4260 = vmatmul.mubr.msk.bf16.vlgmr.msra.gmra.mrb[16].mxu1 %vm1744_vm2, %v2131_v20  ;;  %v4646_v20 = vld [vmem:[%s6012_s15] ss:$8 sps:$4 sm:$0xff]  }
 0x9a2   : > { %4272 = vmatpush3.bf16.xpose.msra.mxu1 %v2250_v63  ;;  %4273 = vmatprep.mubr.msk.bf16.mxu1 %vm5410_vm0, %v5409_v46  ;;  %v4648_v63 = vld [vmem:[%s6012_s15 + $0x4] ss:$8 sps:$4 sm:$0xff]  }
 0x9a3   : > { %4283 = vmatprep.subr.bf16.mxu1 %v5409_v46 }
 0x9a9   : > { %4274 = vmatmul.mubr.msk.bf16.vlgmr.msra.gmra.mrb[20].mxu1 %vm1696_vm1, %v2243_v62  ;;  %v4651_v62 = vld [vmem:[%s6012_s15 + $0x14] ss:$8 sps:$4 sm:$0xff]  }
 0x9aa   : > { %4287 = vmatprep.mubr.msk.bf16.mxu1 %vm5410_vm0, %v5409_v46 }
 0xa74   : > { %v2172_v22 = vpop.f32.mrb[16].mxu1 }
 0xa75   : > { %v4261_v23 = vpop.f32.mrb[17].mxu1 }
 0xa76   : > { %v2175_v24 = vpop.f32.mrb[18].mxu1 }
 0xa77   : > { %v2179_v25 = vpack.c.bf16 %v2175_v24, %v2172_v22  ;;  %v4262_v26 = vpop.f32.mrb[19].mxu1 }
 0xa79   : > { %4268 = vmatmul.mubr.msk.bf16.vlgmr.msra.gmra.mrb[20].mxu0 %vm1696_vm1, %v2179_v25 }
 0xa7a   : > { %4279 = vmatprep.mubr.msk.bf16.mxu0 %vm5410_vm0, %v5409_v46 }
 0xa7c   : > { %v2286_v27 = vpop.f32.mrb[20].mxu1 }
 0xa7d   : > { %v2287_v29 = vadd.f32 %v6171_v12, %v2286_v27  ;;  %v4275_v30 = vpop.f32.mrb[21].mxu1 }
 0xa7e   : > { %v2289_v31 = vpop.f32.mrb[22].mxu1  ;;  %v4652_v30 = vld [vmem:[%s6012_s15 + $0x20] ss:$8 sps:$4 sm:$0xff]  }
 0xa7f   : > { %v2290_v32 = vadd.f32 %v6171_v12, %v2289_v31  ;;  %v4276_v33 = vpop.f32.mrb[23].mxu1  ;;  %v2293_v34 = vsel %vm1744_vm2, %v2287_v29, -inf  ;;  %v4657_v31 = vld [vmem:[%s6012_s15 + $0x34] ss:$8 sps:$4 sm:$0xff]  }
 0xa80   : > { %2294 = vmax.xlane.f32.xlu0 %v2293_v34  ;;  %v4660_v33 = vld [vmem:[%s6012_s15 + $0x44] ss:$8 sps:$4 sm:$0xff]   ;;  %v4658_v34 = vld [vmem:[%s6012_s15 + $0x40] ss:$8 sps:$4 sm:$0xff]  }
 0xa81   : > { %v2296_v35 = vsel %vm1744_vm2, %v2290_v32, -inf }
 0xa82   : > { %2297 = vmax.xlane.f32.xlu1 %v2296_v35  ;;  %v4663_v35 = vld [vmem:[%s6012_s15 + $0x54] ss:$8 sps:$4 sm:$0xff]  }
 0xa93   : > { %2316 = vrot.lane.b32.xlu1 %v6185_v47, %s5413_s26  ;;  %v4644_v47 = vld [vmem:[%s6001_s2 + $0x30] sm:$0xff]  }
 0xa94   : > { %4284 = vmatpush3.bf16.msra.mxu1 %v4644_v47 }
 0xa95   : > { %4285 = vmatprep.subr.bf16.mxu1 %v5409_v46 }
 0xb0d   : > { %v2295_v36 = vpop.xlane.xlu0 %2294 }
 0xb0e   : > { %v2299_v37 = vsub.f32 %v2287_v29, %v2295_v36  ;;  %v4654_v29 = vld [vmem:[%s6012_s15 + $0x24] ss:$8 sps:$4 sm:$0xff]   ;;  %v4661_v36 = vld [vmem:[%s6012_s15 + $0x50] ss:$8 sps:$4 sm:$0xff]  }
 0xb0f   : > { %v2298_v38 = vpop.xlane.xlu1 %2297 }
 0xb10   : > { %v2301_v39 = vmul.f32 1.442695, %v2299_v37  ;;  %v2300_v40 = vsub.f32 %v2290_v32, %v2298_v38  ;;  %v4655_v32 = vld [vmem:[%s6012_s15 + $0x30] ss:$8 sps:$4 sm:$0xff]   ;;  %v4666_v37 = vld [vmem:[%s6012_s15 + $0x64] ss:$8 sps:$4 sm:$0xff]  }
 0xb11   : > { %v4664_v38 = vld [vmem:[%s6012_s15 + $0x60] ss:$8 sps:$4 sm:$0xff]  }
 0xb12   : > { %4710 = vpow2.f32 %v2301_v39  ;;  %v2303_v41 = vmul.f32 1.442695, %v2300_v40  ;;  %v4669_v39 = vld [vmem:[%s6012_s15 + $0x74] ss:$8 sps:$4 sm:$0xff]   ;;  %v4667_v40 = vld [vmem:[%s6012_s15 + $0x70] ss:$8 sps:$4 sm:$0xff]  }
 0xb13   : > { %v2317_v45 = vpop.permute.xlu1 %2316  ;;  %s6676_s15 = scalar_lea.vmem [#allocation14], %s5997_s18 }
 0xb14   : > { %4712 = vpow2.f32 %v2303_v41  ;;  %4278 = vmatpush3.bf16.msra.mxu0 %v2317_v45 }
 0xb15   : > { %2587 = vmatprep.subr.bf16.mxu0 %v4648_v63 }
 0xb1c   : > { %v4711_v12 = vpop.eup %4710 }
 0xb1d   : > { %v2305_v52 = vsel %vm1744_vm2, %v4711_v12, 0.0 }
 0xb1e   : > { %v4713_v54 = vpop.eup %4712  ;;  %2306 = vadd.xlane.f32.xlu0 %v2305_v52 }
 0xb1f   : > { %v2308_v55 = vsel %vm1744_vm2, %v4713_v54, 0.0 }
 0xb22   : > { %2309 = vadd.xlane.f32.xlu0 %v2308_v55 }
 0xb4c   : > { %v2233_v56 = vpop.f32.mrb[20].mxu0 }
 0xb4d   : > { %v2240_v50 = vadd.f32 %v2233_v56, %v6223_v42  ;;  %v4269_v57 = vpop.f32.mrb[21].mxu0  ;;  %v4645_v42 = vld [vmem:[%s6001_s2 + $0x38] sm:$0xff]  }
 0xb4e   : > { %v2236_v58 = vpop.f32.mrb[22].mxu0  ;;  %4286 = vmatpush3.bf16.msra.mxu1 %v4645_v42  ;;  %v4673_v42 = vld [vmem:[%s6018_s25 + $0x8] sm:$0xff]  }
 0xb4f   : > { %v2241_v59 = vadd.f32 %v2236_v58, %v6225_v53  ;;  %v4270_v60 = vpop.f32.mrb[23].mxu0 }
 0xb50   : > { %v3994_v60 = vld [vmem:[%s1364_s30] ss:$0 sm:$0xff] }
 0xbab   : > { %v2307_v61 = vpop.xlane.xlu0 %2306 }
 0xbac   : > { %4714 = vrcp.f32 %v2307_v61 }
 0xbaf   : > { %v2310_v0 = vpop.xlane.xlu0 %2309 }
 0xbb0   : > { %4716 = vrcp.f32 %v2310_v0 }
 0xbb6   : > { %v4715_v1 = vpop.eup %4714 }
 0xbb7   : > { %v2313_v3 = vmul.f32 %v4715_v1, %v4711_v12 }
 0xbba   : > { %v4717_v2 = vpop.eup %4716 }
 0xbbb   : > { %v2314_v4 = vmul.f32 %v4717_v2, %v4713_v54 }
 0xbbd   : > { %v2315_v46 = vpack.c.bf16 %v2314_v4, %v2313_v3  ;;  %v4670_v3 = vld [vmem:[%s6018_s25 + $0x40] sm:$0xff]  }
 0xbbe   : > { %v4671_v4 = vld [vmem:[%s6018_s25] sm:$0xff]   ;;  %4120 = vmatprep.subr.bf16.mxu1 %v4670_v3 }
 0xbbf   : > { %4280 = vmatmul.mubr.msk.bf16.vlgmr.msra.gmra.mrb[24].mxu0 %vm1744_vm2, %v2315_v46  ;;  %v4672_v46 = vld [vmem:[%s6018_s25 + $0x48] sm:$0xff]  }
 0xbc0   : > { %2619 = vmatprep.mubr.bf16.mxu0 %v5408_v28  ;;  %2588 = vmatpush1.bf16.msra.mxu0 %v4646_v20 }
 0xbc1   : > { %2589 = vmatprep.subr.bf16.mxu0 %v4651_v62 }
 0xbc4   : > { %2590 = vmatpush1.bf16.msra.mxu0 %v4649_v21 }
 0xbc5   : > { %2591 = vmatprep.subr.bf16.mxu0 %v4654_v29 }
 0xbc8   : > { %2592 = vmatpush1.bf16.msra.mxu0 %v4652_v30 }
 0xbc9   : > { %2593 = vmatprep.subr.bf16.mxu0 %v4657_v31 }
 0xbcc   : > { %2594 = vmatpush1.bf16.msra.mxu0 %v4655_v32 }
 0xbcd   : > { %2595 = vmatprep.subr.bf16.mxu0 %v4660_v33 }
 0xbd0   : > { %2596 = vmatpush1.bf16.msra.mxu0 %v4658_v34 }
 0xbd1   : > { %2597 = vmatprep.subr.bf16.mxu0 %v4663_v35 }
 0xbd4   : > { %2598 = vmatpush1.bf16.msra.mxu0 %v4661_v36 }
 0xbd5   : > { %2599 = vmatprep.subr.bf16.mxu0 %v4666_v37 }
 0xbd8   : > { %2600 = vmatpush1.bf16.msra.mxu0 %v4664_v38 }
 0xbd9   : > { %2601 = vmatprep.subr.bf16.mxu0 %v4669_v39 }
 0xbdc   : > { %2602 = vmatpush1.bf16.msra.mxu0 %v4667_v40 }
 0xc92   : > { %v2356_v5 = vpop.f32.mrb[24].mxu0 }
 0xc93   : > { %v4281_v53 = vpop.f32.mrb[25].mxu0 }
 0xc94   : > { %v2359_v6 = vpop.f32.mrb[26].mxu0  ;;  %v4675_v53 = vld [vmem:[%s6018_s25 + $0x10] sm:$0xff]  }
 0xc95   : > { %v2363_v7 = vpack.c.bf16 %v2359_v6, %v2356_v5  ;;  %v4282_v8 = vpop.f32.mrb[27].mxu0  ;;  %v4674_v5 = vld [vmem:[%s6018_s25 + $0x50] sm:$0xff]   ;;  %v4676_v6 = vld [vmem:[%s6018_s25 + $0x58] sm:$0xff]  }
 0xc96   : > { %v4678_v8 = vld [vmem:[%s6018_s25 + $0x60] sm:$0xff]  }
 0xc97   : > { %4288 = vmatmul.mubr.msk.bf16.vlgmr.msra.gmra.mrb[24].mxu1 %vm1696_vm1, %v2363_v7  ;;  %v4677_v7 = vld [vmem:[%s6018_s25 + $0x18] sm:$0xff]  }
 0xc98   : > { %4121 = vmatpush3.bf16.msra.mxu1 %v4671_v4 }
 0xc99   : > { %4122 = vmatprep.subr.bf16.mxu1 %v4672_v46 }
 0xc9c   : > { %4123 = vmatpush3.bf16.msra.mxu1 %v4673_v42 }
 0xc9d   : > { %4124 = vmatprep.subr.bf16.mxu1 %v4674_v5  ;;  %v4011_v5 = vld [vmem:[%s1371_s24] ss:$0 sm:$0xff] }
 0xca0   : > { %4125 = vmatpush3.bf16.msra.mxu1 %v4675_v53 }
 0xca1   : > { %4126 = vmatprep.subr.bf16.mxu1 %v4676_v6 }
 0xca4   : > { %4127 = vmatpush3.bf16.msra.mxu1 %v4677_v7 }
 0xca5   : > { %4128 = vmatprep.subr.bf16.mxu1 %v4678_v8 }
 0xd6a   : > { %v2417_v9 = vpop.f32.mrb[24].mxu1 }
 0xd6b   : > { %v2424_v10 = vadd.f32 %v2417_v9, %v2240_v50  ;;  %v4289_v11 = vpop.f32.mrb[25].mxu1  ;;  %v3993_v50 = vld [vmem:[%s1361_s23] ss:$0 sm:$0xff]  ;;  %v4679_v9 = vld [vmem:[%s6018_s25 + $0x20] sm:$0xff]   ;;  %s6675_s23 = scalar_lea.vmem [#allocation12], %s5997_s18 }
 0xd6c   : > { %v2420_v13 = vpop.f32.mrb[26].mxu1  ;;  %4129 = vmatpush3.bf16.msra.mxu1 %v4679_v9  ;;  %v4681_v11 = vld [vmem:[%s6018_s25 + $0x28] sm:$0xff]  }
 0xd6d   : > { %v2426_v28 = vadd.f32 %v2424_v10, %v6101_v43  ;;  %v2425_v15 = vadd.f32 %v2420_v13, %v2241_v59  ;;  %v4290_v16 = vpop.f32.mrb[27].mxu1  ;;  %v4680_v10 = vld [vmem:[%s6018_s25 + $0x68] sm:$0xff]   ;;  %v4682_v13 = vld [vmem:[%s6018_s25 + $0x70] sm:$0xff]  }
 0xd6e   : > { %4130 = vmatprep.subr.bf16.mxu1 %v4680_v10  ;;  %v2495_v16 = vld [vmem:[%s6074_s1] sm:$0x3] }
 0xd6f   : > { %v2427_v17 = vadd.f32 %v2425_v15, %v6103_v44  ;;  %v2435_v18 = vadd.f32 %v3992_v14, %v2426_v28  ;;  %v4684_v28 = vld [vmem:[%s6018_s25 + $0x78] sm:$0xff]  }
 0xd70   : > { %4131 = vmatpush3.bf16.msra.mxu1 %v4681_v11  ;;  %v4685_v15 = vld [vmem:[%s6018_s25 + $0x38] sm:$0xff]  }
 0xd71   : > { %2439 = vadd.xlane.f32.xlu0 %v2435_v18  ;;  %v2436_v19 = vadd.f32 %v3992_v14, %v2427_v17  ;;  %v4683_v14 = vld [vmem:[%s6018_s25 + $0x30] sm:$0xff]   ;;  %4132 = vmatprep.subr.bf16.mxu1 %v4682_v13  ;;  %v2500_v17 = vrot.slane %v2495_v16, %v1461_v49  ;;  %s6677_s25 = sld [smem:[#allocation76_spill]] }
 0xd74   : > { %4133 = vmatpush3.bf16.msra.mxu1 %v4683_v14 }
 0xd75   : > { %2441 = vadd.xlane.f32.xlu0 %v2436_v19  ;;  %4134 = vmatprep.subr.bf16.mxu1 %v4684_v28 }
 0xd77   : > { %p4030_p4 = scmp.ne.s32.totalorder %s6677_s25, 1 }
 0xd78   : > { %4135 = vmatpush3.bf16.msra.mxu1 %v4685_v15  ;;  %s6678_s8 = sld [smem:[#allocation77_spill]] (!%p4030_p4)  ;;  %vm5415_vm3 = vmmov (!%p4030_p4), 0   ;;  %s6679_s22 = sld [smem:[#allocation62_spill]] (!%p4030_p4)  ;;  %vm2901_vm4 = vcmask (!%p4030_p4), 1040384   ;;  %vm3017_vm5 = vcmask (!%p4030_p4), 1041408  }
 0xd79   : > { %s6681_s14 = sld [smem:[#allocation57_spill]] (!%p4030_p4)  ;;  %s6682_s9 = sld [smem:[#allocation58_spill]] (!%p4030_p4) }
 0xd7a   : > { %s6683_s1 = sld [smem:[#allocation59_spill]] (!%p4030_p4)  ;;  %s6684_s24 = sld [smem:[#allocation61_spill]] (!%p4030_p4) }
 0xd7e   : > { %s2895_s18 = sld [smem:[#allocation5 + %s6678_s8]] (!%p4030_p4)  ;;  %s6680_s7 = smov (!%p4030_p4), %s6679_s22 }
 0xd7f   : > { %s2892_s17 = sld [smem:[#allocation4 + %s6678_s8]] (!%p4030_p4) }
 0xd84   : > { %s2896_s13 = scalar_lea.vmem (!%p4030_p4), [#allocation2], %s2895_s18 }
 0xd85   : > { %s2893_s12 = scalar_lea.vmem (!%p4030_p4), [#allocation2], %s2892_s17 }
 0xdfe   : > { %v2440_v43 = vpop.xlane.xlu0 %2439 }
 0xdff   : > { %v2444_v22 = vmul.f32 0.0078125, %v2440_v43 }
 0xe01   : > { %v2446_v23 = vsub.f32 %v2435_v18, %v2444_v22  ;;  %v2504_v18 = vrot.slane %v2495_v16, %v1465_v51 }
 0xe02   : > { %v2442_v44 = vpop.xlane.xlu0 %2441 }
 0xe03   : > { %v2445_v24 = vmul.f32 0.0078125, %v2442_v44  ;;  %v2448_v25 = vmul.f32 %v2446_v23, %v2446_v23 }
 0xe05   : > { %v2447_v26 = vsub.f32 %v2436_v19, %v2445_v24  ;;  %2450 = vadd.xlane.f32.xlu0 %v2448_v25 }
 0xe07   : > { %v2449_v27 = vmul.f32 %v2447_v26, %v2447_v26 }
 0xe09   : > { %2452 = vadd.xlane.f32.xlu0 %v2449_v27 }
 0xe92   : > { %v2451_v41 = vpop.xlane.xlu0 %2450 }
 0xe93   : > { %v2454_v45 = vmul.f32 0.0078125, %v2451_v41 }
 0xe95   : > { %v2456_v12 = vadd.f32 1e-05, %v2454_v45 }
 0xe96   : > { %v2453_v52 = vpop.xlane.xlu0 %2452 }
 0xe97   : > { %4718 = vrsqrt.f32 %v2456_v12  ;;  %v2455_v54 = vmul.f32 0.0078125, %v2453_v52 }
 0xe99   : > { %v2457_v55 = vadd.f32 1e-05, %v2455_v54 }
 0xe9b   : > { %4720 = vrsqrt.f32 %v2457_v55 }
 0xea1   : > { %v4719_v47 = vpop.eup %4718 }
 0xea2   : > { %v2460_v56 = vmul.f32 %v4719_v47, %v2446_v23 }
 0xea4   : > { %v2468_v59 = vmul.f32 %v3993_v50, %v2460_v56 }
 0xea5   : > { %v4721_v57 = vpop.eup %4720 }
 0xea6   : > { %v2461_v58 = vmul.f32 %v4721_v57, %v2447_v26  ;;  %v6298_v0 = vadd.f32 %v3994_v60, %v2468_v59 }
 0xea8   : > { %v2469_v61 = vmul.f32 %v3993_v50, %v2461_v58 }
 0xeaa   : > { %v6300_v1 = vadd.f32 %v3994_v60, %v2469_v61 }
 0xeac   : > { %v2478_v2 = vpack.c.bf16 %v6300_v1, %v6298_v0 }
 0xeae   : > { %2620 = vmatmul.mubr.bf16.vlgmr.msra.gmra.mrb[28].mxu0 %v2478_v2 }
 0xf81   : > { %v2621_v19 = vpop.f32.mrb[28].mxu0 }
 0xf82   : > { %v2622_v20 = vadd.f32 %v2621_v19, %v2500_v17  ;;  %v2623_v63 = vpop.f32.mrb[29].mxu0 }
 0xf83   : > { %v2624_v62 = vadd.f32 %v2623_v63, %v2504_v18  ;;  %v2625_v21 = vpop.f32.mrb[30].mxu0 }
 0xf84   : > { %v2630_v43 = vmul.f32 %v2622_v20, %v2622_v20  ;;  %v2626_v22 = vadd.f32 %v2625_v21, %v2500_v17  ;;  %v2627_v23 = vpop.f32.mrb[31].mxu0 }
 0xf85   : > { %v2631_v44 = vmul.f32 %v2624_v62, %v2624_v62  ;;  %v2628_v24 = vadd.f32 %v2627_v23, %v2504_v18 }
 0xf86   : > { %v2634_v25 = vmul.f32 %v2630_v43, %v2622_v20  ;;  %v2632_v26 = vmul.f32 %v2626_v22, %v2626_v22 }
 0xf87   : > { %v2635_v27 = vmul.f32 %v2631_v44, %v2624_v62  ;;  %v2633_v29 = vmul.f32 %v2628_v24, %v2628_v24  ;;  %v4028_v44 = vld [vmem:[%s6675_s23] ss:$0 sm:$0xff] }
 0xf88   : > { %v2638_v30 = vmul.f32 0.044715, %v2634_v25  ;;  %v2636_v31 = vmul.f32 %v2632_v26, %v2626_v22  ;;  %v4029_v25 = vld [vmem:[%s6676_s15] ss:$0 sm:$0xff] }
 0xf89   : > { %v2639_v49 = vmul.f32 0.044715, %v2635_v27  ;;  %v2637_v32 = vmul.f32 %v2633_v29, %v2628_v24 }
 0xf8a   : > { %v2642_v48 = vadd.f32 %v2638_v30, %v2622_v20  ;;  %v2640_v51 = vmul.f32 0.044715, %v2636_v31 }
 0xf8b   : > { %v2643_v33 = vadd.f32 %v2639_v49, %v2624_v62  ;;  %v2641_v34 = vmul.f32 0.044715, %v2637_v32  ;;  %v4734_v32 = vld [vmem:[#allocation15] sm:$0xff] (!%p4030_p4)  }
 0xf8c   : > { %v2646_v35 = vmul.f32 0.7978846, %v2642_v48  ;;  %v2644_v36 = vadd.f32 %v2640_v51, %v2626_v22  ;;  %v5414_v48 = vmov (!%p4030_p4), 0.0   ;;  %v4735_v51 = vld [vmem:[#allocation15 + $0x8] sm:$0xff] (!%p4030_p4)  }
 0xf8d   : > { %v2647_v37 = vmul.f32 0.7978846, %v2643_v33  ;;  %v2645_v38 = vadd.f32 %v2641_v34, %v2628_v24  ;;  %4291 = vmatprep.subr.bf16.mxu0 (!%p4030_p4), %v5414_v48  ;;  %4311 = vmatprep.subr.bf16.mxu1 (!%p4030_p4), %v5414_v48  ;;  %v4736_v33 = vld [vmem:[#allocation15 + $0x10] sm:$0xff] (!%p4030_p4)   ;;  %v4737_v34 = vld [vmem:[#allocation15 + $0x18] sm:$0xff] (!%p4030_p4)  }
 0xf8e   : > { %4722 = vtanh.f32 %v2646_v35  ;;  %v2648_v39 = vmul.f32 0.7978846, %v2644_v36  ;;  %4292 = vmatpush3.bf16.msra.mxu0 (!%p4030_p4), %v4734_v32  ;;  %4307 = vmatprep.mubr.msk.bf16.mxu0 (!%p4030_p4), %vm5415_vm3, %v5414_v48  ;;  %v4738_v35 = vld [vmem:[#allocation15 + $0x20] sm:$0xff] (!%p4030_p4)   ;;  %v4739_v36 = vld [vmem:[#allocation15 + $0x28] sm:$0xff] (!%p4030_p4)  }
 0xf8f   : > { %4724 = vtanh.f32 %v2647_v37  ;;  %v2649_v40 = vmul.f32 0.7978846, %v2645_v38  ;;  %4293 = vmatprep.subr.bf16.mxu0 (!%p4030_p4), %v5414_v48  ;;  %v4740_v38 = vld [vmem:[#allocation15 + $0x30] sm:$0xff] (!%p4030_p4)  }
 0xf90   : > { %4726 = vtanh.f32 %v2648_v39 }
 0xf91   : > { %4728 = vtanh.f32 %v2649_v40 }
 0xf92   : > { %4294 = vmatpush3.bf16.msra.mxu0 (!%p4030_p4), %v4735_v51 }
 0xf93   : > { %4295 = vmatprep.subr.bf16.mxu0 (!%p4030_p4), %v5414_v48 }
 0xf96   : > { %4296 = vmatpush3.bf16.msra.mxu0 (!%p4030_p4), %v4736_v33 }
 0xf97   : > { %4297 = vmatprep.subr.bf16.mxu0 (!%p4030_p4), %v5414_v48 }
 0xf98   : > { %v4723_v41 = vpop.eup %4722 }
 0xf99   : > { %v4725_v45 = vpop.eup %4724  ;;  %v2654_v12 = vadd.f32 1.0, %v4723_v41  ;;  %v4741_v41 = vld [vmem:[#allocation15 + $0x38] sm:$0xff] (!%p4030_p4)  }
 0xf9a   : > { %v4727_v52 = vpop.eup %4726  ;;  %v2655_v54 = vadd.f32 1.0, %v4725_v45  ;;  %4298 = vmatpush3.bf16.msra.mxu0 (!%p4030_p4), %v4737_v34  ;;  %v4742_v45 = vld [vmem:[%s6679_s22 + $0x40] sm:$0xff] (!%p4030_p4)  }
 0xf9b   : > { %v4729_v55 = vpop.eup %4728  ;;  %v2658_v47 = vmul.f32 0.5, %v2654_v12  ;;  %v2656_v56 = vadd.f32 1.0, %v4727_v52  ;;  %4299 = vmatprep.subr.bf16.mxu0 (!%p4030_p4), %v5414_v48  ;;  %v4743_v52 = vld [vmem:[%s6680_s7] sm:$0xff] (!%p4030_p4)  }
 0xf9c   : > { %v2657_v50 = vadd.f32 1.0, %v4729_v55  ;;  %v2659_v57 = vmul.f32 0.5, %v2655_v54  ;;  %v4744_v55 = vld [vmem:[%s6680_s7 + $0x48] sm:$0xff] (!%p4030_p4)  }
 0xf9d   : > { %v2660_v58 = vmul.f32 0.5, %v2656_v56  ;;  %v2662_v60 = vmul.f32 %v2658_v47, %v2622_v20  ;;  %v4745_v56 = vld [vmem:[%s6680_s7 + $0x8] sm:$0xff] (!%p4030_p4)  }
 0xf9e   : > { %v2661_v59 = vmul.f32 0.5, %v2657_v50  ;;  %v2663_v2 = vmul.f32 %v2659_v57, %v2624_v62  ;;  %4300 = vmatpush3.bf16.msra.mxu0 (!%p4030_p4), %v4738_v35  ;;  %v4746_v50 = vld [vmem:[%s6680_s7 + $0x50] sm:$0xff] (!%p4030_p4)  }
 0xf9f   : > { %v2664_v61 = vmul.f32 %v2660_v58, %v2626_v22  ;;  %4301 = vmatprep.subr.bf16.mxu0 (!%p4030_p4), %v5414_v48  ;;  %v4747_v57 = vld [vmem:[%s6680_s7 + $0x10] sm:$0xff] (!%p4030_p4)   ;;  %v4748_v58 = vld [vmem:[%s6680_s7 + $0x58] sm:$0xff] (!%p4030_p4)  }
 0xfa0   : > { %v2665_v3 = vmul.f32 %v2661_v59, %v2628_v24  ;;  %v4749_v59 = vld [vmem:[%s6680_s7 + $0x18] sm:$0xff] (!%p4030_p4)  }
 0xfa1   : > { %v2666_v4 = vpack.c.bf16 %v2664_v61, %v2662_v60  ;;  %v4750_v60 = vld [vmem:[%s6680_s7 + $0x60] sm:$0xff] (!%p4030_p4)  }
 0xfa2   : > { %v2667_v46 = vpack.c.bf16 %v2665_v3, %v2663_v2  ;;  %4302 = vmatpush3.bf16.msra.mxu0 (!%p4030_p4), %v4739_v36  ;;  %v4751_v61 = vld [vmem:[%s6680_s7 + $0x20] sm:$0xff] (!%p4030_p4)   ;;  %v4752_v2 = vld [vmem:[%s6680_s7 + $0x68] sm:$0xff] (!%p4030_p4)  }
 0xfa3   : > { %4303 = vmatprep.subr.bf16.mxu0 (!%p4030_p4), %v5414_v48  ;;  %v4753_v3 = vld [vmem:[%s6680_s7 + $0x28] sm:$0xff] (!%p4030_p4)   ;;  %v4040_v36 = vld [vmem:[%s6682_s9] ss:$0 sm:$0xff] (!%p4030_p4) }
 0xfa4   : > { %2835 = vmatprep.mubr.bf16.mxu1 %v2667_v46  ;;  %v4755_v46 = vld [vmem:[%s6680_s7 + $0x30] sm:$0xff] (!%p4030_p4)  }
 0xfa5   : > { %2836 = vmatmul.mubr.bf16.vlgmr.msra.gmra.mrb[28].mxu1 %v2666_v4  ;;  %v4754_v4 = vld [vmem:[%s6680_s7 + $0x70] sm:$0xff] (!%p4030_p4)  }
 0xfa6   : > { %4327 = vmatprep.mubr.msk.bf16.mxu1 (!%p4030_p4), %vm5415_vm3, %v5414_v48  ;;  %4304 = vmatpush3.bf16.msra.mxu0 (!%p4030_p4), %v4740_v38  ;;  %v4041_v38 = vld [vmem:[%s6683_s1] ss:$0 sm:$0xff] (!%p4030_p4) }
 0xfa7   : > { %4305 = vmatprep.subr.bf16.mxu0 (!%p4030_p4), %v5414_v48 }
 0xfaa   : > { %4306 = vmatpush3.bf16.msra.mxu0 (!%p4030_p4), %v4741_v41 }
 0xfab   : > { %4160 = vmatprep.subr.bf16.mxu0 (!%p4030_p4), %v4742_v45  ;;  %v4766_v45 = vld [vmem:[#allocation23] sm:$0xff] (!%p4030_p4)  }
0x1078   : > { %v4136_v42 = vpop.f32.mrb[28].mxu1 }
0x1079   : > { %v4137_v53 = vpop.f32.mrb[29].mxu1 }
0x107a   : > { %v4138_v6 = vadd.f32 %v4137_v53, %v4136_v42  ;;  %v4139_v7 = vpop.f32.mrb[30].mxu1  ;;  %v4756_v42 = vld [vmem:[%s6680_s7 + $0x78] sm:$0xff] (!%p4030_p4)  }
0x107b   : > { %v4140_v8 = vpop.f32.mrb[31].mxu1 }
0x107c   : > { %v2838_v9 = vadd.f32 %v4138_v6, %v4011_v5  ;;  %v4141_v10 = vadd.f32 %v4140_v8, %v4139_v7  ;;  %v4031_v6 = vld [vmem:[%s6681_s14] ss:$0 sm:$0xff] (!%p4030_p4) }
0x107e   : > { %v2841_v11 = vadd.f32 %v4141_v10, %v4011_v5  ;;  %v2844_v13 = vadd.f32 %v2838_v9, %v6298_v0  ;;  %v4757_v5 = vld [vmem:[%s6680_s7 + $0x38] sm:$0xff] (!%p4030_p4)  }
0x1080   : > { %2848 = vadd.xlane.f32.xlu1 %v2844_v13  ;;  %v2845_v14 = vadd.f32 %v2841_v11, %v6300_v1 }
0x1082   : > { %2850 = vadd.xlane.f32.xlu0 %v2845_v14 }
0x110d   : > { %v2849_v28 = vpop.xlane.xlu1 %2848 }
0x110e   : > { %v2852_v15 = vmul.f32 0.0078125, %v2849_v28 }
0x110f   : > { %v2851_v16 = vpop.xlane.xlu0 %2850 }
0x1110   : > { %v2854_v17 = vsub.f32 %v2844_v13, %v2852_v15  ;;  %v2853_v18 = vmul.f32 0.0078125, %v2851_v16  ;;  %v3194_v15 = vld [vmem:[#allocation18] sm:$0x1] (!%p4030_p4) }
0x1112   : > { %v2855_v19 = vsub.f32 %v2845_v14, %v2853_v18  ;;  %v2856_v20 = vmul.f32 %v2854_v17, %v2854_v17 }
0x1114   : > { %2858 = vadd.xlane.f32.xlu0 %v2856_v20  ;;  %v2857_v63 = vmul.f32 %v2855_v19, %v2855_v19 }
0x1118   : > { %2860 = vadd.xlane.f32.xlu0 %v2857_v63  ;;  %v4758_v63 = vld [vmem:[#allocation17] sm:$0xff] (!%p4030_p4)  }
0x1119   : > { %4312 = vmatpush3.bf16.msra.mxu1 (!%p4030_p4), %v4758_v63 }
0x111a   : > { %4313 = vmatprep.subr.bf16.mxu1 (!%p4030_p4), %v5414_v48 }
0x11a1   : > { %v2859_v62 = vpop.xlane.xlu0 %2858 }
0x11a2   : > { %v2862_v21 = vmul.f32 0.0078125, %v2859_v62  ;;  %v4759_v62 = vld [vmem:[#allocation17 + $0x8] sm:$0xff] (!%p4030_p4)  }
0x11a3   : > { %4314 = vmatpush3.bf16.msra.mxu1 (!%p4030_p4), %v4759_v62 }
0x11a4   : > { %v2864_v43 = vadd.f32 1e-05, %v2862_v21  ;;  %4315 = vmatprep.subr.bf16.mxu1 (!%p4030_p4), %v5414_v48 }
0x11a5   : > { %v2861_v0 = vpop.xlane.xlu0 %2860 }
0x11a6   : > { %4730 = vrsqrt.f32 %v2864_v43  ;;  %v2863_v22 = vmul.f32 0.0078125, %v2861_v0 }
0x11a8   : > { %v2865_v1 = vadd.f32 1e-05, %v2863_v22 }
0x11aa   : > { %4732 = vrsqrt.f32 %v2865_v1 }
0x11b0   : > { %v4731_v23 = vpop.eup %4730 }
0x11b1   : > { %v2868_v24 = vmul.f32 %v4731_v23, %v2854_v17  ;;  %v4760_v23 = vld [vmem:[#allocation17 + $0x10] sm:$0xff] (!%p4030_p4)  }
0x11b2   : > { %4316 = vmatpush3.bf16.msra.mxu1 (!%p4030_p4), %v4760_v23 }
0x11b3   : > { %v2876_v26 = vmul.f32 %v4028_v44, %v2868_v24  ;;  %4317 = vmatprep.subr.bf16.mxu1 (!%p4030_p4), %v5414_v48  ;;  %v4762_v24 = vld [vmem:[#allocation17 + $0x20] sm:$0xff] (!%p4030_p4)  }
0x11b4   : > { %v4733_v27 = vpop.eup %4732 }
0x11b5   : > { %v2884_v29 = vadd.f32 %v4029_v25, %v2876_v26  ;;  %v2869_v30 = vmul.f32 %v4733_v27, %v2855_v19  ;;  %2891 = sbr.rel (%p4030_p4) target bundleno = 5333 (0x14d5), region = 188 }
0x11b7   : > { %2886 = vst [vmem:[#allocation2] sm:$0xff] %v2884_v29  ;;  %v2877_v31 = vmul.f32 %v4028_v44, %v2869_v30  ;;  %v4761_v44 = vld [vmem:[#allocation17 + $0x18] sm:$0xff] (!%p4030_p4)   ;;  %v4764_v29 = vld [vmem:[#allocation17 + $0x30] sm:$0xff] (!%p4030_p4)  }
0x11b8   : > { %4318 = vmatpush3.bf16.msra.mxu1 (!%p4030_p4), %v4761_v44 }
0x11b9   : > { %v2885_v49 = vadd.f32 %v4029_v25, %v2877_v31  ;;  %4319 = vmatprep.subr.bf16.mxu1 (!%p4030_p4), %v5414_v48  ;;  %v4763_v25 = vld [vmem:[#allocation17 + $0x28] sm:$0xff] (!%p4030_p4)  }
0x11bb   : > { %2887 = vst [vmem:[#allocation2 + $0x8] sm:$0xff] %v2885_v49  ;;  %v4765_v49 = vld [vmem:[#allocation17 + $0x38] sm:$0xff] (!%p4030_p4)  }
0x11bc   : > { %4320 = vmatpush3.bf16.msra.mxu1 %v4762_v24 }
0x11bd   : > { %4321 = vmatprep.subr.bf16.mxu1 %v5414_v48 }
0x11c0   : > { %4322 = vmatpush3.bf16.msra.mxu1 %v4763_v25 }
0x11c1   : > { %4323 = vmatprep.subr.bf16.mxu1 %v5414_v48 }
0x11c2   : > { %v2897_v37 = vld [vmem:[%s2896_s13] sm:$0x1] }
0x11c3   : > { %v2899_v39 = vrot.slane %v2897_v37, 7  ;;  %v2894_v40 = vld [vmem:[%s2893_s12] sm:$0x1]  ;;  %v3161_v47 = vpack.c.bf16 %v2897_v37, %v2897_v37 }
0x11c4   : > { %v3160_v53 = vpack.c.bf16 %v2894_v40, %v2894_v40  ;;  %4324 = vmatpush3.bf16.msra.mxu1 %v4764_v29 }
0x11c5   : > { %v2902_v12 = vsel %vm2901_vm4, %v2894_v40, %v2899_v39  ;;  %4325 = vmatprep.subr.bf16.mxu1 %v5414_v48 }
0x11c6   : > { %v2903_v54 = vpack.c.bf16 %v2902_v12, %v2902_v12 }
0x11c8   : > { %4308 = vmatmul.mubr.bf16.vlgmr.msra.gmra.mrb[0].mxu0 %v2903_v54  ;;  %4326 = vmatpush3.bf16.msra.mxu1 %v4765_v49  ;;  %v4768_v54 = vld [vmem:[#allocation23 + $0x10] sm:$0xff]  }
0x11c9   : > { %4161 = vmatpush3.bf16.msra.mxu0 %v4743_v52  ;;  %3323 = vmatprep.mubr.bf16.mxu0 %v3161_v47  ;;  %v4767_v52 = vld [vmem:[#allocation23 + $0x8] sm:$0xff]   ;;  %v4769_v47 = vld [vmem:[#allocation23 + $0x18] sm:$0xff]  }
0x11ca   : > { %4162 = vmatprep.subr.bf16.mxu0 %v4744_v55  ;;  %4331 = vmatprep.subr.bf16.mxu1 %v5414_v48 }
0x11cd   : > { %4163 = vmatpush3.bf16.msra.mxu0 %v4745_v56 }
0x11ce   : > { %4164 = vmatprep.subr.bf16.mxu0 %v4746_v50 }
0x11d1   : > { %4165 = vmatpush3.bf16.msra.mxu0 %v4747_v57  ;;  %v4770_v57 = vld [vmem:[#allocation23 + $0x20] sm:$0xff]  }
0x11d2   : > { %4166 = vmatprep.subr.bf16.mxu0 %v4748_v58  ;;  %v4771_v58 = vld [vmem:[#allocation23 + $0x28] sm:$0xff]  }
0x11d5   : > { %4167 = vmatpush3.bf16.msra.mxu0 %v4749_v59  ;;  %v4772_v59 = vld [vmem:[#allocation23 + $0x30] sm:$0xff]  }
0x11d6   : > { %4168 = vmatprep.subr.bf16.mxu0 %v4750_v60 }
0x11d9   : > { %4169 = vmatpush3.bf16.msra.mxu0 %v4751_v61  ;;  %v3331_v61 = vld [vmem:[#allocation20] sm:$0x1] }
0x11da   : > { %4170 = vmatprep.subr.bf16.mxu0 %v4752_v2 }
0x11dd   : > { %4171 = vmatpush3.bf16.msra.mxu0 %v4753_v3  ;;  %v4773_v3 = vld [vmem:[#allocation23 + $0x38] sm:$0xff]  }
0x11de   : > { %4172 = vmatprep.subr.bf16.mxu0 %v4754_v4  ;;  %v3332_v4 = vld [vmem:[#allocation21] sm:$0x1] }
0x11e1   : > { %4173 = vmatpush3.bf16.msra.mxu0 %v4755_v46 }
0x11e2   : > { %4174 = vmatprep.subr.bf16.mxu0 %v4756_v42 }
0x11e5   : > { %4175 = vmatpush3.bf16.msra.mxu0 %v4757_v5 }
0x11e8   : > { %3324 = vmatmul.mubr.bf16.vlgmr.msra.gmra.mrb[4].mxu0 %v3160_v53 }
0x129b   : > { %v3009_v7 = vpop.f32.mrb[0].mxu0 }
0x129c   : > { %v3010_v8 = vadd.f32 %v4031_v6, %v3009_v7  ;;  %v4309_v9 = vpop.f32.mrb[1].mxu0  ;;  %v4042_v6 = vld [vmem:[%s6684_s24] ss:$0 sm:$0xff] }
0x129d   : > { %v3012_v10 = vpop.f32.mrb[2].mxu0 }
0x129e   : > { %v4310_v11 = vpop.f32.mrb[3].mxu0  ;;  %v3018_v13 = vsel %vm3017_vm5, %v3010_v8, 0.0 }
0x129f   : > { %3019 = vadd.xlane.f32.xlu0 %v3018_v13  ;;  %v3366_v13 = vld [vmem:[#allocation24] sm:$0x1] }
0x12bb   : > { %v4176_v14 = vpop.f32.mrb[4].mxu0 }
0x12bc   : > { %v4177_v28 = vpop.f32.mrb[5].mxu0 }
0x12bd   : > { %v4178_v16 = vadd.f32 %v4177_v28, %v4176_v14  ;;  %v4179_v17 = vpop.f32.mrb[6].mxu0 }
0x12be   : > { %v4180_v18 = vpop.f32.mrb[7].mxu0 }
0x12bf   : > { %v3326_v19 = vadd.f32 %v4178_v16, %v3194_v15 }
0x12c1   : > { %v3333_v20 = vsel %vm2901_vm4, %v3326_v19, 0.0 }
0x12c2   : > { %3334 = vadd.xlane.f32.xlu0 %v3333_v20 }
0x132c   : > { %v3020_v21 = vpop.xlane.xlu0 %3019 }
0x132d   : > { %v3021_v43 = vmul.f32 0.0078125, %v3020_v21 }
0x132f   : > { %v3022_v0 = vsub.f32 %v3010_v8, %v3021_v43 }
0x1331   : > { %v3023_v22 = vmul.f32 %v3022_v0, %v3022_v0 }
0x1333   : > { %v3024_v1 = vsel %vm3017_vm5, %v3023_v22, 0.0 }
0x1334   : > { %3025 = vadd.xlane.f32.xlu1 %v3024_v1 }
0x134f   : > { %v3335_v26 = vpop.xlane.xlu0 %3334 }
0x1350   : > { %v3336_v27 = vmul.f32 0.0078125, %v3335_v26 }
0x1352   : > { %v3337_v30 = vsub.f32 %v3326_v19, %v3336_v27 }
0x1354   : > { %v3338_v31 = vmul.f32 %v3337_v30, %v3337_v30 }
0x1356   : > { %v3339_v32 = vsel %vm2901_vm4, %v3338_v31, 0.0 }
0x1357   : > { %3340 = vadd.xlane.f32.xlu1 %v3339_v32 }
0x13c1   : > { %v3026_v51 = vpop.xlane.xlu1 %3025 }
0x13c2   : > { %v3027_v33 = vmul.f32 0.0078125, %v3026_v51 }
0x13c4   : > { %v3028_v34 = vadd.f32 1e-05, %v3027_v33 }
0x13c6   : > { %4774 = vrsqrt.f32 %v3028_v34 }
0x13d0   : > { %v4775_v35 = vpop.eup %4774 }
0x13d1   : > { %v3030_v37 = vmul.f32 %v4775_v35, %v3022_v0 }
0x13d3   : > { %v3037_v39 = vmul.f32 %v4040_v36, %v3030_v37 }
0x13d5   : > { %v3044_v40 = vadd.f32 %v4041_v38, %v3037_v39 }
0x13d7   : > { %v3045_v41 = vmax.f32 %v3044_v40, 0.0 }
0x13d9   : > { %v3046_v12 = vpack.c.bf16 %v3045_v41, %v3045_v41 }
0x13db   : > { %4328 = vmatmul.mubr.bf16.vlgmr.msra.gmra.mrb[0].mxu1 %v3046_v12 }
0x13dc   : > { %4332 = vmatpush3.bf16.msra.mxu1 %v4766_v45  ;;  %4347 = vmatprep.mubr.msk.bf16.mxu1 %vm5415_vm3, %v5414_v48 }
0x13dd   : > { %4333 = vmatprep.subr.bf16.mxu1 %v5414_v48 }
0x13e0   : > { %4334 = vmatpush3.bf16.msra.mxu1 %v4767_v52 }
0x13e1   : > { %4335 = vmatprep.subr.bf16.mxu1 %v5414_v48 }
0x13e4   : > { %v3341_v55 = vpop.xlane.xlu1 %3340  ;;  %4336 = vmatpush3.bf16.msra.mxu1 %v4768_v54 }
0x13e5   : > { %v3342_v56 = vmul.f32 0.0078125, %v3341_v55  ;;  %4337 = vmatprep.subr.bf16.mxu1 %v5414_v48 }
0x13e7   : > { %v3343_v50 = vadd.f32 1e-05, %v3342_v56 }
0x13e8   : > { %4338 = vmatpush3.bf16.msra.mxu1 %v4769_v47 }
0x13e9   : > { %4776 = vrsqrt.f32 %v3343_v50  ;;  %4339 = vmatprep.subr.bf16.mxu1 %v5414_v48 }
0x13ec   : > { %4340 = vmatpush3.bf16.msra.mxu1 %v4770_v57 }
0x13ed   : > { %4341 = vmatprep.subr.bf16.mxu1 %v5414_v48 }
0x13f0   : > { %4342 = vmatpush3.bf16.msra.mxu1 %v4771_v58 }
0x13f1   : > { %4343 = vmatprep.subr.bf16.mxu1 %v5414_v48 }
0x13f3   : > { %v4777_v60 = vpop.eup %4776 }
0x13f4   : > { %v3345_v2 = vmul.f32 %v4777_v60, %v3337_v30  ;;  %4344 = vmatpush3.bf16.msra.mxu1 %v4772_v59 }
0x13f5   : > { %4345 = vmatprep.subr.bf16.mxu1 %v5414_v48 }
0x13f6   : > { %v3346_v46 = vmul.f32 %v3345_v2, %v3331_v61 }
0x13f8   : > { %4346 = vmatpush3.bf16.msra.mxu1 %v4773_v3  ;;  %v3347_v42 = vadd.f32 %v3346_v46, %v3332_v4 }
0x13fa   : > { %v3348_v5 = vmax.f32 %v3347_v42, 0.0 }
0x13fc   : > { %v3349_v53 = vpack.c.bf16 %v3348_v5, %v3348_v5 }
0x13fe   : > { %4348 = vmatmul.mubr.bf16.vlgmr.msra.gmra.mrb[4].mxu1 %v3349_v53 }
0x14ae   : > { %v3152_v7 = vpop.f32.mrb[0].mxu1 }
0x14af   : > { %v3153_v8 = vadd.f32 %v4042_v6, %v3152_v7  ;;  %v4329_v9 = vpop.f32.mrb[1].mxu1 }
0x14b0   : > { %v3155_v10 = vpop.f32.mrb[2].mxu1 }
0x14b1   : > { %3158 = vst [vmem:[%s1325_s3] sm:$0x1] %v3153_v8  ;;  %3159 = vst [vmem:[%s1331_s28 - $0x1] sm:$0x2] %v3153_v8  ;;  %v4330_v11 = vpop.f32.mrb[3].mxu1 }
0x14d1   : > { %v3449_v48 = vpop.f32.mrb[4].mxu1 }
0x14d2   : > { %v3450_v14 = vadd.f32 %v3449_v48, %v3366_v13  ;;  %v4349_v28 = vpop.f32.mrb[5].mxu1 }
0x14d3   : > { %v3452_v15 = vpop.f32.mrb[6].mxu1 }
0x14d4   : > { %3455 = vst [vmem:[%s1337_s29] sm:$0x1] %v3450_v14  ;;  %v4350_v16 = vpop.f32.mrb[7].mxu1 }
0x14d5 PF: > { %s6685_s6 = sld [smem:[#allocation77_spill]]  ;;  %s6686_s20 = sld [smem:[#allocation69_spill]] }
0x14d6   : > { %s6687_s5 = sld [smem:[#allocation85_spill]]  ;;  %s3490_s27 = sshll.u32 %s1331_s28, 4  ;;  %s3491_s27 = int_to_ptr.vmem [resolvable:$true] %s3490_s27 }
0x14d7   : > { %s3461_s26 = scalar_lea.sflag [#allocation28], %s6008_s16  ;;  %s5148_s11 = scalar_lea.vmem %s3491_s27, 16 }
0x14d8   : > { %p5149_p9 = scmp.ne.s32.totalorder %s3491_s27, %s5148_s11  ;;  %s5416_s19 = smov [#allocation27]  }
0x14d9   : > { %s5152_s2 = sshll.u32 %s5416_s19, 4  ;;  %s5153_s2 = int_to_ptr.vmem [resolvable:$false] %s5152_s2 }
0x14da   : > { %s5154_s30 = scalar_lea.vmem %s5153_s2, 32  ;;  %p5155_p8 = scmp.lt.s32.totalorder %s3491_s27, %s5153_s2 }
0x14db   : > { %s6399_s10 = sshll.u32 %s6685_s6, 4  ;;  %p5156_p6 = scmp.lt.s32.totalorder %s5154_s30, %s5148_s11 }
0x14dc   : > { %s6403_s4 = scalar_lea.hbm %s6686_s20, %s6399_s10  ;;  %p6688_p0 = scmp.ne.s32.totalorder %s6687_s5, 0 }
0x14dd   : > { %p5157_p10 = por %p5156_p6, %p5155_p8 }
0x14de   : > { %p5150_p13 = pnand %p5149_p9, %p6688_p0 }
0x14e0   : > { %p5151_p11 = pneg %p5150_p13 }
0x14e2   : > { %p5158_p1 = pnand %p5157_p10, %p5151_p11 }
0x14e4   : > { %5161 = shalt.err (!%p5158_p1)
}
0x14e5   : > { %s5162_s28 = scalar_lea.hbm %s6403_s4, 16  ;;  %s5166_s23 = scalar_lea.hbm %s6686_s20, 32 }
0x14e6   : > { %p5163_p3 = scmp.ne.s32.totalorder %s6403_s4, %s5162_s28  ;;  %p5167_p5 = scmp.lt.u32.totalorder %s6403_s4, %s6686_s20 }
0x14e7   : > { %p5168_p12 = scmp.lt.u32.totalorder %s5166_s23, %s5162_s28  ;;  %p5170_p9 = scmp.lt.u32.totalorder %s5162_s28, %s6403_s4 }
0x14e8   : > { %p5164_p7 = pnand %p5163_p3, %p6688_p0 }
0x14e9   : > { %p5169_p4 = por %p5168_p12, %p5167_p5 }
0x14ea   : > { %p5165_p2 = pneg %p5164_p7 }
0x14eb   : > { %p5171_p13 = por %p5170_p9, %p5169_p4 }
0x14ed   : > { %p5172_p11 = pnand %p5171_p13, %p5165_p2 }
0x14ef   : > { %5175 = shalt.err (!%p5172_p11)
}
0x14f0   : > { %s6689_s15 = sld [smem:[#allocation68_spill]]  ;;  %s6691_s8 = sld [smem:[#allocation70_spill]] }
0x14f1   : > { %4392 = dma.vmem_to_hbm [thread:$0]  (%p6688_p0), %s3491_s27, 16, %s6403_s4, %s3461_s26  }
0x14f2   : > { %s3477_s17 = sshll.u32 %s1325_s3, 4  ;;  %s3457_s13 = scalar_lea.sflag [#allocation8], %s6044_s0  ;;  %s6429_s17 = int_to_ptr.vmem [resolvable:$true] %s3477_s17 }
0x14f3   : > { %s5176_s12 = scalar_lea.vmem %s6429_s17, 16  ;;  %s5417_s14 = smov [#allocation26]  }
0x14f4   : > { %p5177_p8 = scmp.ne.s32.totalorder %s6429_s17, %s5176_s12  ;;  %s5180_s9 = sshll.u32 %s5417_s14, 4  ;;  %s5181_s9 = int_to_ptr.vmem [resolvable:$false] %s5180_s9 }
0x14f5   : > { %s5182_s1 = scalar_lea.vmem %s5181_s9, 32  ;;  %p5183_p1 = scmp.lt.s32.totalorder %s6429_s17, %s5181_s9 }
0x14f6   : > { %s6690_s25 = smov %s6689_s15  ;;  %s6425_s18 = scalar_lea.hbm %s6689_s15, %s6399_s10 }
0x14f7   : > { %s6433_s22 = scalar_lea.hbm %s6691_s8, %s6399_s10  ;;  %p5178_p6 = pnand %p5177_p8, %p6688_p0 }
0x14f8   : > { %p5184_p3 = scmp.lt.s32.totalorder %s5182_s1, %s5176_s12 }
0x14f9   : > { %p5179_p10 = pneg %p5178_p6 }
0x14fa   : > { %p5185_p7 = por %p5184_p3, %p5183_p1 }
0x14fc   : > { %p5186_p2 = pnand %p5185_p7, %p5179_p10 }
0x14fe   : > { %5189 = shalt.err (!%p5186_p2)
}
0x14ff   : > { %s5190_s3 = scalar_lea.hbm %s6425_s18, 16  ;;  %s5194_s24 = scalar_lea.hbm %s6690_s25, 32 }
0x1500   : > { %p5191_p5 = scmp.ne.s32.totalorder %s6425_s18, %s5190_s3  ;;  %p5195_p9 = scmp.lt.u32.totalorder %s6425_s18, %s6690_s25 }
0x1501   : > { %p5196_p13 = scmp.lt.u32.totalorder %s5194_s24, %s5190_s3  ;;  %p5198_p8 = scmp.lt.u32.totalorder %s5190_s3, %s6425_s18 }
0x1502   : > { %p5192_p12 = pnand %p5191_p5, %p6688_p0 }
0x1503   : > { %p5197_p11 = por %p5196_p13, %p5195_p9 }
0x1504   : > { %p5193_p4 = pneg %p5192_p12 }
0x1505   : > { %p5199_p6 = por %p5198_p8, %p5197_p11 }
0x1507   : > { %p5200_p10 = pnand %p5199_p6, %p5193_p4 }
0x1509   : > { %5203 = shalt.err (!%p5200_p10)
}
0x150a   : > { %4391 = dma.vmem_to_hbm [thread:$0]  (%p6688_p0), %s6429_s17, 16, %s6425_s18, %s3457_s13  }
0x150b   : > { %s3503_s6 = sshll.u32 %s1337_s29, 4  ;;  %s5418_s4 = smov [#allocation29]   ;;  %s3504_s6 = int_to_ptr.vmem [resolvable:$true] %s3503_s6 }
0x150c   : > { %s5204_s10 = scalar_lea.vmem %s3504_s6, 16  ;;  %s5208_s27 = sshll.u32 %s5418_s4, 4  ;;  %s5209_s27 = int_to_ptr.vmem [resolvable:$false] %s5208_s27 }
0x150d   : > { %p5205_p1 = scmp.ne.s32.totalorder %s3504_s6, %s5204_s10  ;;  %s5210_s11 = scalar_lea.vmem %s5209_s27, 32 }
0x150e   : > { %p5211_p2 = scmp.lt.s32.totalorder %s3504_s6, %s5209_s27  ;;  %p5212_p5 = scmp.lt.s32.totalorder %s5210_s11, %s5204_s10 }
0x150f   : > { %p5206_p3 = pnand %p5205_p1, %p6688_p0 }
0x1510   : > { %p5213_p12 = por %p5212_p5, %p5211_p2 }
0x1511   : > { %p5207_p7 = pneg %p5206_p3 }
0x1513   : > { %p5214_p4 = pnand %p5213_p12, %p5207_p7 }
0x1515   : > { %5217 = shalt.err (!%p5214_p4)
}
0x1516   : > { %s5218_s29 = scalar_lea.hbm %s6433_s22, 16  ;;  %s5222_s0 = scalar_lea.hbm %s6691_s8, 32 }
0x1517   : > { %p5219_p9 = scmp.ne.s32.totalorder %s6433_s22, %s5218_s29  ;;  %p5223_p8 = scmp.lt.u32.totalorder %s6433_s22, %s6691_s8 }
0x1518   : > { %p5224_p6 = scmp.lt.u32.totalorder %s5222_s0, %s5218_s29  ;;  %p5226_p1 = scmp.lt.u32.totalorder %s5218_s29, %s6433_s22 }
0x1519   : > { %p5220_p13 = pnand %p5219_p9, %p6688_p0 }
0x151a   : > { %p5225_p10 = por %p5224_p6, %p5223_p8 }
0x151b   : > { %p5221_p11 = pneg %p5220_p13 }
0x151c   : > { %p5227_p3 = por %p5226_p1, %p5225_p10 }
0x151e   : > { %p5228_p7 = pnand %p5227_p3, %p5221_p11 }
0x1520   : > { %5231 = shalt.err (!%p5228_p7)
}
0x1521   : > { %4393 = dma.vmem_to_hbm [thread:$0]  (%p6688_p0), %s3504_s6, 16, %s6433_s22, %s3461_s26  }
0x1522 PF: > { %s6692_s19 = sld [smem:[#allocation71_spill]]  ;;  %s6693_s2 = sld [smem:[#allocation86_spill]] }
0x1523   : > { %p4460_p2 = scmp.ge.s32.totalorder %s5356_s21, 2 }
0x1528   : > { %s3515_s30 = sand.u32 1, %s6692_s19   ;;  %p6694_p5 = scmp.ne.s32.totalorder %s6693_s2, 0 }
0x1529   : > { %s3516_s28 = scalar_lea.sflag [#allocation8], %s3515_s30 }
0x152a   : > { %p4436_p12 = pnand %p4460_p2, %p6694_p5 }
0x152c   : > { %5307 = dma.done.wait (!%p4436_p12), %s3516_s28, 16  }
0x152d   : > { %5309 = vsyncadd (!%p4436_p12), %s3516_s28, 4294967280  ;;  %s6695_s23 = sadd.s32 4294967294, %s5356_s21  }
0x152e   : > { %s3523_s15 = sand.u32 1, %s6695_s23  }
0x152f   : > { %s3524_s18 = scalar_lea.sflag [#allocation28], %s3523_s15 }
0x1530   : > { %5311 = dma.done.wait (!%p4436_p12), %s3524_s18, 32  }
0x1531   : > { %5313 = vsyncadd (!%p4436_p12), %s3524_s18, 4294967264  ;;  %s105_s21 = sadd.s32 1, %s5356_s21   ;;  %s6696_s0 = sld [smem:[#allocation72_spill]] }
0x1532   : > { %p102_p0 = scmp.ge.s32.totalorder %s105_s21, 6   ;;  %s6697_s17 = sld [smem:[#allocation73_spill]] }
0x1533   : > { %s6698_s15 = sld [smem:[#allocation84_spill]]  ;;  %s6699_s18 = sld [smem:[#allocation74_spill]] }
0x1534   : > { %s6700_s29 = sld [smem:[#allocation75_spill]]  ;;  %s6701_s22 = sld [smem:[#allocation83_spill]] }
0x1535   : > { %s6702_s26 = sld [smem:[#allocation78_spill]]  ;;  %s6703_s12 = sld [smem:[#allocation79_spill]] }
0x1536   : > { %s6704_s28 = sld [smem:[#allocation81_spill]]  ;;  %s6705_s2 = sld [smem:[#allocation82_spill]] }
0x1537   :  { %104 = sbr.rel (!%p102_p0) target bundleno = 109 (0x6d), region = 354 }
0x153e   :  { %3536 = vsyncpa [#allocation7], 1 }
0x153f   :  { %3538 = vsyncpa [#allocation7 + $0x1], 1 }
0x1540   :  { %3539 = vsyncpa [#allocation10], 1 }
0x1541   :  { %3541 = vsyncpa [#allocation10 + $0x1], 1 }
0x1542   :  { %3542 = vsyncpa [#allocation13], 1 }
0x1543   :  { %3544 = vsyncpa [#allocation13 + $0x1], 1 }
0x1544   :  { %3545 = vsyncpa [#allocation16], 1 }
0x1545   :  { %3546 = vsyncpa [#allocation19], 1 }
0x1546   :  { %3547 = vsyncpa [#allocation22], 1 }
0x1547   :  { %3548 = vsyncpa [#allocation25], 1 }
0x1548   :  { %3549 = vsyncpa [#allocation8], 1 }
0x1549   :  { %3551 = vsyncpa [#allocation8 + $0x1], 1 }
0x154a   :  { %3552 = vsyncpa [#allocation28], 1 }
0x154b   :  { %3554 = vsyncpa [#allocation28 + $0x1], 1 }

</bundles_post_ra>
